<compile_context>
chip_gen: v6e
topology: v6e:2x2x1
jax: 0.10.0
libtpu: 0.0.40
codegen_flags: <defaults>
</compile_context>

<pallas_src>
import math
from functools import partial

import jax
import jax.numpy as jnp
from jax.experimental import pallas as pl
from jax.experimental.pallas import tpu as pltpu

# ----------------------- model hyper-parameters -----------------------
D_MODEL = 32
NHEAD = 4
NUM_LAYERS = 2
MAX_SEQ_LEN = 64
NUM_CLASSES = 20
NUM_SS_CLASSES = 8
DIM_FF = 2048          # nn.TransformerEncoderLayer default dim_feedforward
LN_EPS = 1e-5
C_PAD = 128            # lane-dense padded head width (sliced back to NUM_CLASSES outside)
FF_CHUNK = 256         # FFN columns per step (keeps the (M, DIM_FF) intermediate small)
CONV_TAPS = 5          # combined 5-tap window covering both convs


def _layernorm(x, w, b):
    mu = jnp.mean(x, axis=-1, keepdims=True)
    xc = x - mu
    var = jnp.mean(xc * xc, axis=-1, keepdims=True)
    return xc * jax.lax.rsqrt(var + LN_EPS) * w + b


# ----------------------- the single fused Pallas kernel -----------------------
def fused_forward_kernel(
        x_ref,       # (B, S, D)  f32  embeddings + positional encoding
        t_ref,       # (B, D)     f32  raw sinusoidal timestep embedding
        maskk_ref,   # (B, S)     f32  float key_padding_mask (added to logits)
        masko_ref,   # (M, 1)     f32  output multiply mask
        sidx_ref,    # (M, 1)     i32  sequence index of each flattened row
        wt1_ref, bt1_ref, wt2_ref, bt2_ref,           # timestep MLP
        wconv_ref, bconv_ref,                         # (5, D, 2D), (1, 2D)
        wqkv_ref, bqkv_ref, wo_ref, bo_ref,           # stacked over layers (L, ...)
        ln1w_ref, ln1b_ref, ln2w_ref, ln2b_ref,       # (L, 1, D)
        wff1_ref, bff1_ref, wff2_ref, bff2_ref,       # wff1/wff2 stored bf16
        wp_ref, bp_ref,                               # head, lane-padded to C_PAD
        o_ref,                                        # (M, C_PAD) f32
        *, B, S, nhead, num_layers):
    D = x_ref.shape[-1]
    M = B * S
    dh = D // nhead
    scale = 1.0 / math.sqrt(dh)

    # ---- timestep MLP: Linear -> ReLU -> Linear (whole batch at once) ----
    t_raw = t_ref[...]                                                         # (B, D)
    th = jnp.maximum(
        jnp.dot(t_raw, wt1_ref[...], preferred_element_type=jnp.float32) + bt1_ref[...], 0.0)
    t_emb = jnp.dot(th, wt2_ref[...], preferred_element_type=jnp.float32) + bt2_ref[...]

    # ---- add t_emb (broadcast over sequence) and flatten batch into matmul-M ----
    rows = [x_ref[b] + t_emb[b:b + 1, :] for b in range(B)]
    x = jnp.concatenate(rows, axis=0)                                          # (M, D)

    # ---- fused conv1(k=3,p=1) + conv2(k=5,p=2): 5 taps of (M,D)@(D,2D) ----
    # roll over the flattened batch*seq axis + per-batch edge masking is exactly
    # zero-padded Conv1d (out-of-range / cross-batch rows are masked to zero).
    s_idx = sidx_ref[...]                                                      # (M, 1) int32
    y = jnp.zeros((M, 2 * D), jnp.float32)
    for o in range(-2, 3):
        if o == 0:
            xs = x
        else:
            xs = pltpu.roll(x, shift=(-o) % M, axis=0)
            valid = (s_idx + o >= 0) & (s_idx + o < S)
            xs = jnp.where(valid, xs, 0.0)
        y = y + jnp.dot(xs, wconv_ref[o + 2], preferred_element_type=jnp.float32)
    y = y + bconv_ref[...]
    x = jnp.maximum(y[:, :D], 0.0) + jnp.maximum(y[:, D:], 0.0)                # (M, D)

    maskk = maskk_ref[...]                                                     # (B, S)

    # ---- transformer encoder layers (post-norm), statically unrolled ----
    for l in range(num_layers):
        qkv = jnp.dot(x, wqkv_ref[l], preferred_element_type=jnp.float32) + bqkv_ref[l]  # (M, 3D)
        attn_rows = []
        for b in range(B):
            qkv_b = qkv[b * S:(b + 1) * S, :]
            mask_b = maskk[b:b + 1, :]            # float mask added to logits per key
            acc_b = jnp.zeros((S, D), jnp.float32)
            for h in range(nhead):
                qh = qkv_b[:, h * dh:(h + 1) * dh] * scale
                kh = qkv_b[:, D + h * dh:D + (h + 1) * dh]
                vh = qkv_b[:, 2 * D + h * dh:2 * D + (h + 1) * dh]
                sc = jnp.einsum('qd,kd->qk', qh, kh,
                                preferred_element_type=jnp.float32) + mask_b
                sc = sc - jnp.max(sc, axis=-1, keepdims=True)
                p = jnp.exp(sc)
                p = p * pl.reciprocal(jnp.sum(p, axis=-1, keepdims=True), approx=True)
                ho = jnp.dot(p, vh, preferred_element_type=jnp.float32)
                # fold the output projection per head -> no head concatenation needed
                acc_b = acc_b + jnp.dot(ho, wo_ref[l, h * dh:(h + 1) * dh, :],
                                        preferred_element_type=jnp.float32)
            attn_rows.append(acc_b)
        attn = jnp.concatenate(attn_rows, axis=0) + bo_ref[l]                  # (M, D)
        yln = _layernorm(x + attn, ln1w_ref[l], ln1b_ref[l])

        # ---- chunked FFN: bf16 weights on the MXU, f32 accumulation ----
        ybf = yln.astype(jnp.bfloat16)
        ff = jnp.zeros((M, D), jnp.float32)
        for c in range(0, DIM_FF, FF_CHUNK):
            hch = jnp.dot(ybf, wff1_ref[l, :, c:c + FF_CHUNK],
                          preferred_element_type=jnp.float32)
            hch = jnp.maximum(hch + bff1_ref[l, :, c:c + FF_CHUNK], 0.0).astype(jnp.bfloat16)
            ff = ff + jnp.dot(hch, wff2_ref[l, c:c + FF_CHUNK, :],
                              preferred_element_type=jnp.float32)
        ff = ff + bff2_ref[l]
        x = _layernorm(yln + ff, ln2w_ref[l], ln2b_ref[l])

    # ---- post head (lane-dense, C_PAD columns) + padding-mask multiply ----
    logits = jnp.dot(x, wp_ref[...], preferred_element_type=jnp.float32) + bp_ref[...]
    o_ref[...] = (logits * masko_ref[...]).astype(o_ref.dtype)


# ----------------------- pallas_call wrapper -----------------------
def fused_forward(params, x_emb, t_raw, mask_key, mask_out, s_idx, B, S):
    M = B * S
    kernel = partial(fused_forward_kernel, B=B, S=S, nhead=NHEAD, num_layers=NUM_LAYERS)
    # Single invocation (no grid): every operand lives as a full block in VMEM
    # (total footprint < 1 MiB), the only HBM traffic is inputs/weights in and the
    # lane-dense (M, 128) output back out.
    return pl.pallas_call(
        kernel,
        out_shape=jax.ShapeDtypeStruct((M, C_PAD), jnp.float32),
    )(x_emb, t_raw, mask_key, mask_out, s_idx,
      params['wt1'], params['bt1'], params['wt2'], params['bt2'],
      params['wconv'], params['bconv'],
      params['wqkv'], params['bqkv'], params['wo'], params['bo'],
      params['ln1w'], params['ln1b'], params['ln2w'], params['ln2b'],
      params['wff1'], params['bff1'], params['wff2'], params['bff2'],
      params['wp_pad'], params['bp_pad'])


# ----------------------- glue: tables, embeddings, params -----------------------
def build_pe(max_len, d):
    pos = jnp.arange(max_len, dtype=jnp.float32)[:, None]
    div = jnp.exp(jnp.arange(0, d, 2, dtype=jnp.float32) * (-math.log(10000.0) / d))
    ang = pos * div
    return jnp.stack([jnp.sin(ang), jnp.cos(ang)], axis=-1).reshape(max_len, d)


def timestep_embedding(t, d):
    half = d // 2
    freqs = jnp.exp(jnp.arange(half, dtype=jnp.float32) * (-math.log(10000.0) / (half - 1)))
    ang = t.astype(jnp.float32)[:, None] * freqs[None, :]
    return jnp.concatenate([jnp.sin(ang), jnp.cos(ang)], axis=1)   # d is even here


def init_params(key):
    keys = iter(jax.random.split(key, 64))

    def rnd(shape, scale=0.05):
        return scale * jax.random.normal(next(keys), shape, jnp.float32)

    D = D_MODEL
    # conv weights in (tap, D_in, D_out) layout (permute PyTorch (D_out, D_in, k) weights).
    conv1_w = rnd((3, D, D)); conv1_b = rnd((1, D))
    conv2_w = rnd((5, D, D)); conv2_b = rnd((1, D))
    # combined 5-tap weight: cols [0,D) = conv1 (taps 1..3, zero at taps 0/4), cols [D,2D) = conv2
    wconv = jnp.zeros((CONV_TAPS, D, 2 * D), jnp.float32)
    wconv = wconv.at[1:4, :, :D].set(conv1_w)
    wconv = wconv.at[:, :, D:].set(conv2_w)
    bconv = jnp.concatenate([conv1_b, conv2_b], axis=-1)           # (1, 2D)

    wp = rnd((D, NUM_CLASSES)); bp = rnd((1, NUM_CLASSES))
    wp_pad = jnp.zeros((D, C_PAD), jnp.float32).at[:, :NUM_CLASSES].set(wp)
    bp_pad = jnp.zeros((1, C_PAD), jnp.float32).at[:, :NUM_CLASSES].set(bp)

    def stack(maker):
        return jnp.stack([maker() for _ in range(NUM_LAYERS)], axis=0)

    return dict(
        seq_embed=rnd((NUM_CLASSES, D), 0.5),
        ss_embed=rnd((NUM_SS_CLASSES, D), 0.5),
        wt1=rnd((D, D)), bt1=jnp.zeros((1, D), jnp.float32),
        wt2=rnd((D, D)), bt2=jnp.zeros((1, D), jnp.float32),
        wconv=wconv, bconv=bconv,
        wqkv=stack(lambda: rnd((D, 3 * D))), bqkv=stack(lambda: rnd((1, 3 * D))),
        wo=stack(lambda: rnd((D, D))), bo=stack(lambda: rnd((1, D))),
        ln1w=jnp.ones((NUM_LAYERS, 1, D), jnp.float32),
        ln1b=jnp.zeros((NUM_LAYERS, 1, D), jnp.float32),
        ln2w=jnp.ones((NUM_LAYERS, 1, D), jnp.float32),
        ln2b=jnp.zeros((NUM_LAYERS, 1, D), jnp.float32),
        wff1=stack(lambda: rnd((D, DIM_FF))).astype(jnp.bfloat16),   # bf16 MXU weights
        bff1=stack(lambda: rnd((1, DIM_FF))),
        wff2=stack(lambda: rnd((DIM_FF, D))).astype(jnp.bfloat16),   # bf16 MXU weights
        bff2=stack(lambda: rnd((1, D))),
        wp_pad=wp_pad, bp_pad=bp_pad,
    )


@jax.jit
def protein_denoiser_forward(params, seq, t, ss, padding_mask):
    B, S = seq.shape
    x = params['seq_embed'][seq] + params['ss_embed'][ss]              # (B, S, D)
    # Faithful to the PyTorch module: pe is (max_len, 1, D) and sliced with
    # x.size(0)==batch for batch_first inputs, so PE(position=b) is broadcast over
    # all sequence positions of batch element b.
    pe = build_pe(MAX_SEQ_LEN, D_MODEL)
    x = x + pe[:B][:, None, :]
    t_raw = timestep_embedding(t, D_MODEL)                             # (B, D)
    mask_key = padding_mask.astype(jnp.float32)                        # (B, S) added to logits
    mask_out = padding_mask.astype(jnp.float32).reshape(B * S, 1)      # (M, 1) output multiply
    s_idx = jnp.tile(jnp.arange(S, dtype=jnp.int32), B).reshape(B * S, 1)
    out = fused_forward(params, x, t_raw, mask_key, mask_out, s_idx, B, S)   # (M, C_PAD)
    return out.reshape(B, S, C_PAD)[:, :, :NUM_CLASSES]


# ----------------------- demo -----------------------
if __name__ == "__main__":
    B, S = 2, 8
    key = jax.random.PRNGKey(0)
    k1, k2, k3 = jax.random.split(key, 3)
    seq = jax.random.randint(k1, (B, S), 0, NUM_CLASSES)
    ss = jax.random.randint(k2, (B, S), 0, NUM_SS_CLASSES)
    t = jax.random.randint(k3, (B,), 0, 1000)
    # padding_mask: float mask, 1.0 = valid token, 0.0 = padding (PyTorch float
    # key_padding_mask semantics: values are added to attention logits; the module
    # also multiplies the final output by this mask).
    padding_mask = jnp.ones((B, S), jnp.float32).at[1, -3:].set(0.0)

    params = init_params(jax.random.PRNGKey(1))
    out = protein_denoiser_forward(params, seq, t, ss, padding_mask)
    out = jax.block_until_ready(out)
    assert out.shape == (B, S, NUM_CLASSES) and out.dtype == jnp.float32
    print("KERNEL_OK")
</pallas_src>

<mosaic_0001>
module attributes {stable_mosaic.version = 11 : i64} {
  func.func @fused_forward_kernel(%arg0: memref<2x8x32xf32, #tpu.memory_space<vmem>>, %arg1: memref<2x32xf32, #tpu.memory_space<vmem>>, %arg2: memref<2x8xf32, #tpu.memory_space<vmem>>, %arg3: memref<16x1xf32, #tpu.memory_space<vmem>>, %arg4: memref<16x1xi32, #tpu.memory_space<vmem>>, %arg5: memref<32x32xf32, #tpu.memory_space<vmem>>, %arg6: memref<1x32xf32, #tpu.memory_space<vmem>>, %arg7: memref<32x32xf32, #tpu.memory_space<vmem>>, %arg8: memref<1x32xf32, #tpu.memory_space<vmem>>, %arg9: memref<5x32x64xf32, #tpu.memory_space<vmem>>, %arg10: memref<1x64xf32, #tpu.memory_space<vmem>>, %arg11: memref<2x32x96xf32, #tpu.memory_space<vmem>>, %arg12: memref<2x1x96xf32, #tpu.memory_space<vmem>>, %arg13: memref<2x32x32xf32, #tpu.memory_space<vmem>>, %arg14: memref<2x1x32xf32, #tpu.memory_space<vmem>>, %arg15: memref<2x1x32xf32, #tpu.memory_space<vmem>>, %arg16: memref<2x1x32xf32, #tpu.memory_space<vmem>>, %arg17: memref<2x1x32xf32, #tpu.memory_space<vmem>>, %arg18: memref<2x1x32xf32, #tpu.memory_space<vmem>>, %arg19: memref<2x32x2048xbf16, #tpu.memory_space<vmem>>, %arg20: memref<2x1x2048xf32, #tpu.memory_space<vmem>>, %arg21: memref<2x2048x32xbf16, #tpu.memory_space<vmem>>, %arg22: memref<2x1x32xf32, #tpu.memory_space<vmem>>, %arg23: memref<32x128xf32, #tpu.memory_space<vmem>>, %arg24: memref<1x128xf32, #tpu.memory_space<vmem>>, %arg25: memref<16x128xf32, #tpu.memory_space<vmem>>) attributes {dimension_semantics = [], scalar_prefetch = 0 : i64, scratch_operands = 0 : i64, tpu.core_type = #tpu.core_type<tc>} {
    %c0 = arith.constant 0 : index
    %c0_0 = arith.constant 0 : index
    %0 = vector.load %arg1[%c0, %c0_0] : memref<2x32xf32, #tpu.memory_space<vmem>>, vector<2x32xf32>
    %c0_1 = arith.constant 0 : index
    %c0_2 = arith.constant 0 : index
    %1 = vector.load %arg5[%c0_1, %c0_2] : memref<32x32xf32, #tpu.memory_space<vmem>>, vector<32x32xf32>
    %cst = arith.constant dense<0.000000e+00> : vector<2x32xf32>
    %2 = tpu.matmul %0, %1, %cst {dimension_numbers = #tpu.dot_dimension_numbers<[1], [0], [0], [1], [0, 0, 1, 1], [], []>} : vector<2x32xf32>, vector<32x32xf32>, vector<2x32xf32> -> vector<2x32xf32>
    %c0_3 = arith.constant 0 : index
    %c0_4 = arith.constant 0 : index
    %3 = vector.load %arg6[%c0_3, %c0_4] : memref<1x32xf32, #tpu.memory_space<vmem>>, vector<1x32xf32>
    %4 = vector.broadcast %3 : vector<1x32xf32> to vector<2x32xf32>
    %5 = arith.addf %2, %4 : vector<2x32xf32>
    %cst_5 = arith.constant 0.000000e+00 : f32
    %6 = vector.broadcast %cst_5 : f32 to vector<2x32xf32>
    %7 = arith.maximumf %5, %6 : vector<2x32xf32>
    %c0_6 = arith.constant 0 : index
    %c0_7 = arith.constant 0 : index
    %8 = vector.load %arg7[%c0_6, %c0_7] : memref<32x32xf32, #tpu.memory_space<vmem>>, vector<32x32xf32>
    %cst_8 = arith.constant dense<0.000000e+00> : vector<2x32xf32>
    %9 = tpu.matmul %7, %8, %cst_8 {dimension_numbers = #tpu.dot_dimension_numbers<[1], [0], [0], [1], [0, 0, 1, 1], [], []>} : vector<2x32xf32>, vector<32x32xf32>, vector<2x32xf32> -> vector<2x32xf32>
    %c0_9 = arith.constant 0 : index
    %c0_10 = arith.constant 0 : index
    %10 = vector.load %arg8[%c0_9, %c0_10] : memref<1x32xf32, #tpu.memory_space<vmem>>, vector<1x32xf32>
    %11 = vector.broadcast %10 : vector<1x32xf32> to vector<2x32xf32>
    %12 = arith.addf %9, %11 : vector<2x32xf32>
    %c0_11 = arith.constant 0 : index
    %c0_12 = arith.constant 0 : index
    %c0_13 = arith.constant 0 : index
    %13 = vector.load %arg0[%c0_11, %c0_12, %c0_13] : memref<2x8x32xf32, #tpu.memory_space<vmem>>, vector<1x8x32xf32>
    %14 = vector.shape_cast %13 : vector<1x8x32xf32> to vector<8x32xf32>
    %15 = vector.extract_strided_slice %12 {offsets = [0, 0], sizes = [1, 32], strides = [1, 1]} : vector<2x32xf32> to vector<1x32xf32>
    %16 = vector.broadcast %15 : vector<1x32xf32> to vector<8x32xf32>
    %17 = arith.addf %14, %16 : vector<8x32xf32>
    %c1 = arith.constant 1 : index
    %c0_14 = arith.constant 0 : index
    %c0_15 = arith.constant 0 : index
    %18 = vector.load %arg0[%c1, %c0_14, %c0_15] : memref<2x8x32xf32, #tpu.memory_space<vmem>>, vector<1x8x32xf32>
    %19 = vector.shape_cast %18 : vector<1x8x32xf32> to vector<8x32xf32>
    %20 = vector.extract_strided_slice %12 {offsets = [1, 0], sizes = [1, 32], strides = [1, 1]} : vector<2x32xf32> to vector<1x32xf32>
    %21 = vector.broadcast %20 : vector<1x32xf32> to vector<8x32xf32>
    %22 = arith.addf %19, %21 : vector<8x32xf32>
    %23 = tpu.concatenate %17, %22 in 0 : vector<8x32xf32>, vector<8x32xf32> -> vector<16x32xf32>
    %c0_16 = arith.constant 0 : index
    %c0_17 = arith.constant 0 : index
    %24 = vector.load %arg4[%c0_16, %c0_17] : memref<16x1xi32, #tpu.memory_space<vmem>>, vector<16x1xi32>
    %cst_18 = arith.constant 0.000000e+00 : f32
    %25 = vector.broadcast %cst_18 : f32 to vector<16x64xf32>
    %c2_i32 = arith.constant 2 : i32
    %26 = tpu.dynamic_rotate %23 by %c2_i32 dim 0 : vector<16x32xf32>, i32 -> vector<16x32xf32>
    %c-2_i32 = arith.constant -2 : i32
    %27 = vector.broadcast %c-2_i32 : i32 to vector<16x1xi32>
    %28 = arith.addi %24, %27 : vector<16x1xi32>
    %c0_i32 = arith.constant 0 : i32
    %29 = vector.broadcast %c0_i32 : i32 to vector<16x1xi32>
    %30 = arith.cmpi sge, %28, %29 : vector<16x1xi32>
    %c-2_i32_19 = arith.constant -2 : i32
    %31 = vector.broadcast %c-2_i32_19 : i32 to vector<16x1xi32>
    %32 = arith.addi %24, %31 : vector<16x1xi32>
    %c8_i32 = arith.constant 8 : i32
    %33 = vector.broadcast %c8_i32 : i32 to vector<16x1xi32>
    %34 = arith.cmpi slt, %32, %33 : vector<16x1xi32>
    %35 = arith.andi %30, %34 : vector<16x1xi1>
    %cst_20 = arith.constant 0.000000e+00 : f32
    %36 = vector.shape_cast %35 : vector<16x1xi1> to vector<16x1xi1>
    %37 = vector.broadcast %36 : vector<16x1xi1> to vector<16x32xi1>
    %38 = vector.broadcast %cst_20 : f32 to vector<16x32xf32>
    %39 = arith.select %37, %26, %38 : vector<16x32xi1>, vector<16x32xf32>
    %c0_21 = arith.constant 0 : index
    %c0_22 = arith.constant 0 : index
    %c0_23 = arith.constant 0 : index
    %40 = vector.load %arg9[%c0_21, %c0_22, %c0_23] : memref<5x32x64xf32, #tpu.memory_space<vmem>>, vector<1x32x64xf32>
    %41 = vector.shape_cast %40 : vector<1x32x64xf32> to vector<32x64xf32>
    %cst_24 = arith.constant dense<0.000000e+00> : vector<16x64xf32>
    %42 = tpu.matmul %39, %41, %cst_24 {dimension_numbers = #tpu.dot_dimension_numbers<[1], [0], [0], [1], [0, 0, 1, 1], [], []>} : vector<16x32xf32>, vector<32x64xf32>, vector<16x64xf32> -> vector<16x64xf32>
    %43 = arith.addf %25, %42 : vector<16x64xf32>
    %c1_i32 = arith.constant 1 : i32
    %44 = tpu.dynamic_rotate %23 by %c1_i32 dim 0 : vector<16x32xf32>, i32 -> vector<16x32xf32>
    %c-1_i32 = arith.constant -1 : i32
    %45 = vector.broadcast %c-1_i32 : i32 to vector<16x1xi32>
    %46 = arith.addi %24, %45 : vector<16x1xi32>
    %c0_i32_25 = arith.constant 0 : i32
    %47 = vector.broadcast %c0_i32_25 : i32 to vector<16x1xi32>
    %48 = arith.cmpi sge, %46, %47 : vector<16x1xi32>
    %c-1_i32_26 = arith.constant -1 : i32
    %49 = vector.broadcast %c-1_i32_26 : i32 to vector<16x1xi32>
    %50 = arith.addi %24, %49 : vector<16x1xi32>
    %c8_i32_27 = arith.constant 8 : i32
    %51 = vector.broadcast %c8_i32_27 : i32 to vector<16x1xi32>
    %52 = arith.cmpi slt, %50, %51 : vector<16x1xi32>
    %53 = arith.andi %48, %52 : vector<16x1xi1>
    %cst_28 = arith.constant 0.000000e+00 : f32
    %54 = vector.shape_cast %53 : vector<16x1xi1> to vector<16x1xi1>
    %55 = vector.broadcast %54 : vector<16x1xi1> to vector<16x32xi1>
    %56 = vector.broadcast %cst_28 : f32 to vector<16x32xf32>
    %57 = arith.select %55, %44, %56 : vector<16x32xi1>, vector<16x32xf32>
    %c1_29 = arith.constant 1 : index
    %c0_30 = arith.constant 0 : index
    %c0_31 = arith.constant 0 : index
    %58 = vector.load %arg9[%c1_29, %c0_30, %c0_31] : memref<5x32x64xf32, #tpu.memory_space<vmem>>, vector<1x32x64xf32>
    %59 = vector.shape_cast %58 : vector<1x32x64xf32> to vector<32x64xf32>
    %cst_32 = arith.constant dense<0.000000e+00> : vector<16x64xf32>
    %60 = tpu.matmul %57, %59, %cst_32 {dimension_numbers = #tpu.dot_dimension_numbers<[1], [0], [0], [1], [0, 0, 1, 1], [], []>} : vector<16x32xf32>, vector<32x64xf32>, vector<16x64xf32> -> vector<16x64xf32>
    %61 = arith.addf %43, %60 : vector<16x64xf32>
    %c2 = arith.constant 2 : index
    %c0_33 = arith.constant 0 : index
    %c0_34 = arith.constant 0 : index
    %62 = vector.load %arg9[%c2, %c0_33, %c0_34] : memref<5x32x64xf32, #tpu.memory_space<vmem>>, vector<1x32x64xf32>
    %63 = vector.shape_cast %62 : vector<1x32x64xf32> to vector<32x64xf32>
    %cst_35 = arith.constant dense<0.000000e+00> : vector<16x64xf32>
    %64 = tpu.matmul %23, %63, %cst_35 {dimension_numbers = #tpu.dot_dimension_numbers<[1], [0], [0], [1], [0, 0, 1, 1], [], []>} : vector<16x32xf32>, vector<32x64xf32>, vector<16x64xf32> -> vector<16x64xf32>
    %65 = arith.addf %61, %64 : vector<16x64xf32>
    %c15_i32 = arith.constant 15 : i32
    %66 = tpu.dynamic_rotate %23 by %c15_i32 dim 0 : vector<16x32xf32>, i32 -> vector<16x32xf32>
    %c1_i32_36 = arith.constant 1 : i32
    %67 = vector.broadcast %c1_i32_36 : i32 to vector<16x1xi32>
    %68 = arith.addi %24, %67 : vector<16x1xi32>
    %c0_i32_37 = arith.constant 0 : i32
    %69 = vector.broadcast %c0_i32_37 : i32 to vector<16x1xi32>
    %70 = arith.cmpi sge, %68, %69 : vector<16x1xi32>
    %c1_i32_38 = arith.constant 1 : i32
    %71 = vector.broadcast %c1_i32_38 : i32 to vector<16x1xi32>
    %72 = arith.addi %24, %71 : vector<16x1xi32>
    %c8_i32_39 = arith.constant 8 : i32
    %73 = vector.broadcast %c8_i32_39 : i32 to vector<16x1xi32>
    %74 = arith.cmpi slt, %72, %73 : vector<16x1xi32>
    %75 = arith.andi %70, %74 : vector<16x1xi1>
    %cst_40 = arith.constant 0.000000e+00 : f32
    %76 = vector.shape_cast %75 : vector<16x1xi1> to vector<16x1xi1>
    %77 = vector.broadcast %76 : vector<16x1xi1> to vector<16x32xi1>
    %78 = vector.broadcast %cst_40 : f32 to vector<16x32xf32>
    %79 = arith.select %77, %66, %78 : vector<16x32xi1>, vector<16x32xf32>
    %c3 = arith.constant 3 : index
    %c0_41 = arith.constant 0 : index
    %c0_42 = arith.constant 0 : index
    %80 = vector.load %arg9[%c3, %c0_41, %c0_42] : memref<5x32x64xf32, #tpu.memory_space<vmem>>, vector<1x32x64xf32>
    %81 = vector.shape_cast %80 : vector<1x32x64xf32> to vector<32x64xf32>
    %cst_43 = arith.constant dense<0.000000e+00> : vector<16x64xf32>
    %82 = tpu.matmul %79, %81, %cst_43 {dimension_numbers = #tpu.dot_dimension_numbers<[1], [0], [0], [1], [0, 0, 1, 1], [], []>} : vector<16x32xf32>, vector<32x64xf32>, vector<16x64xf32> -> vector<16x64xf32>
    %83 = arith.addf %65, %82 : vector<16x64xf32>
    %c14_i32 = arith.constant 14 : i32
    %84 = tpu.dynamic_rotate %23 by %c14_i32 dim 0 : vector<16x32xf32>, i32 -> vector<16x32xf32>
    %c2_i32_44 = arith.constant 2 : i32
    %85 = vector.broadcast %c2_i32_44 : i32 to vector<16x1xi32>
    %86 = arith.addi %24, %85 : vector<16x1xi32>
    %c0_i32_45 = arith.constant 0 : i32
    %87 = vector.broadcast %c0_i32_45 : i32 to vector<16x1xi32>
    %88 = arith.cmpi sge, %86, %87 : vector<16x1xi32>
    %c2_i32_46 = arith.constant 2 : i32
    %89 = vector.broadcast %c2_i32_46 : i32 to vector<16x1xi32>
    %90 = arith.addi %24, %89 : vector<16x1xi32>
    %c8_i32_47 = arith.constant 8 : i32
    %91 = vector.broadcast %c8_i32_47 : i32 to vector<16x1xi32>
    %92 = arith.cmpi slt, %90, %91 : vector<16x1xi32>
    %93 = arith.andi %88, %92 : vector<16x1xi1>
    %cst_48 = arith.constant 0.000000e+00 : f32
    %94 = vector.shape_cast %93 : vector<16x1xi1> to vector<16x1xi1>
    %95 = vector.broadcast %94 : vector<16x1xi1> to vector<16x32xi1>
    %96 = vector.broadcast %cst_48 : f32 to vector<16x32xf32>
    %97 = arith.select %95, %84, %96 : vector<16x32xi1>, vector<16x32xf32>
    %c4 = arith.constant 4 : index
    %c0_49 = arith.constant 0 : index
    %c0_50 = arith.constant 0 : index
    %98 = vector.load %arg9[%c4, %c0_49, %c0_50] : memref<5x32x64xf32, #tpu.memory_space<vmem>>, vector<1x32x64xf32>
    %99 = vector.shape_cast %98 : vector<1x32x64xf32> to vector<32x64xf32>
    %cst_51 = arith.constant dense<0.000000e+00> : vector<16x64xf32>
    %100 = tpu.matmul %97, %99, %cst_51 {dimension_numbers = #tpu.dot_dimension_numbers<[1], [0], [0], [1], [0, 0, 1, 1], [], []>} : vector<16x32xf32>, vector<32x64xf32>, vector<16x64xf32> -> vector<16x64xf32>
    %101 = arith.addf %83, %100 : vector<16x64xf32>
    %c0_52 = arith.constant 0 : index
    %c0_53 = arith.constant 0 : index
    %102 = vector.load %arg10[%c0_52, %c0_53] : memref<1x64xf32, #tpu.memory_space<vmem>>, vector<1x64xf32>
    %103 = vector.broadcast %102 : vector<1x64xf32> to vector<16x64xf32>
    %104 = arith.addf %101, %103 : vector<16x64xf32>
    %105 = vector.extract_strided_slice %104 {offsets = [0, 0], sizes = [16, 32], strides = [1, 1]} : vector<16x64xf32> to vector<16x32xf32>
    %cst_54 = arith.constant 0.000000e+00 : f32
    %106 = vector.broadcast %cst_54 : f32 to vector<16x32xf32>
    %107 = arith.maximumf %105, %106 : vector<16x32xf32>
    %108 = vector.extract_strided_slice %104 {offsets = [0, 32], sizes = [16, 32], strides = [1, 1]} : vector<16x64xf32> to vector<16x32xf32>
    %cst_55 = arith.constant 0.000000e+00 : f32
    %109 = vector.broadcast %cst_55 : f32 to vector<16x32xf32>
    %110 = arith.maximumf %108, %109 : vector<16x32xf32>
    %111 = arith.addf %107, %110 : vector<16x32xf32>
    %c0_56 = arith.constant 0 : index
    %c0_57 = arith.constant 0 : index
    %112 = vector.load %arg2[%c0_56, %c0_57] : memref<2x8xf32, #tpu.memory_space<vmem>>, vector<2x8xf32>
    %c0_58 = arith.constant 0 : index
    %c0_59 = arith.constant 0 : index
    %c0_60 = arith.constant 0 : index
    %113 = vector.load %arg11[%c0_58, %c0_59, %c0_60] : memref<2x32x96xf32, #tpu.memory_space<vmem>>, vector<1x32x96xf32>
    %114 = vector.shape_cast %113 : vector<1x32x96xf32> to vector<32x96xf32>
    %cst_61 = arith.constant dense<0.000000e+00> : vector<16x96xf32>
    %115 = tpu.matmul %111, %114, %cst_61 {dimension_numbers = #tpu.dot_dimension_numbers<[1], [0], [0], [1], [0, 0, 1, 1], [], []>} : vector<16x32xf32>, vector<32x96xf32>, vector<16x96xf32> -> vector<16x96xf32>
    %c0_62 = arith.constant 0 : index
    %c0_63 = arith.constant 0 : index
    %c0_64 = arith.constant 0 : index
    %116 = vector.load %arg12[%c0_62, %c0_63, %c0_64] : memref<2x1x96xf32, #tpu.memory_space<vmem>>, vector<1x1x96xf32>
    %117 = vector.shape_cast %116 : vector<1x1x96xf32> to vector<1x96xf32>
    %118 = vector.broadcast %117 : vector<1x96xf32> to vector<16x96xf32>
    %119 = arith.addf %115, %118 : vector<16x96xf32>
    %120 = vector.extract_strided_slice %119 {offsets = [0, 0], sizes = [8, 96], strides = [1, 1]} : vector<16x96xf32> to vector<8x96xf32>
    %121 = vector.extract_strided_slice %112 {offsets = [0, 0], sizes = [1, 8], strides = [1, 1]} : vector<2x8xf32> to vector<1x8xf32>
    %cst_65 = arith.constant 0.000000e+00 : f32
    %122 = vector.broadcast %cst_65 : f32 to vector<8x32xf32>
    %123 = vector.extract_strided_slice %120 {offsets = [0, 0], sizes = [8, 8], strides = [1, 1]} : vector<8x96xf32> to vector<8x8xf32>
    %cst_66 = arith.constant 0.353553385 : f32
    %124 = vector.broadcast %cst_66 : f32 to vector<8x8xf32>
    %125 = arith.mulf %123, %124 : vector<8x8xf32>
    %126 = vector.extract_strided_slice %120 {offsets = [0, 32], sizes = [8, 8], strides = [1, 1]} : vector<8x96xf32> to vector<8x8xf32>
    %127 = vector.extract_strided_slice %120 {offsets = [0, 64], sizes = [8, 8], strides = [1, 1]} : vector<8x96xf32> to vector<8x8xf32>
    "tpu.trace_start"() <{level = 10 : i32, message = "qd,kd->qk"}> : () -> ()
    %cst_67 = arith.constant dense<0.000000e+00> : vector<8x8xf32>
    %128 = tpu.matmul %125, %126, %cst_67 {dimension_numbers = #tpu.dot_dimension_numbers<[1], [1], [0], [0], [0, 0, 1, 0], [], []>} : vector<8x8xf32>, vector<8x8xf32>, vector<8x8xf32> -> vector<8x8xf32>
    "tpu.trace_stop"() : () -> ()
    %129 = vector.broadcast %121 : vector<1x8xf32> to vector<8x8xf32>
    %130 = arith.addf %128, %129 : vector<8x8xf32>
    %cst_68 = arith.constant dense<0xFF800000> : vector<8xf32>
    %131 = vector.multi_reduction <maximumf>, %130, %cst_68 [1] : vector<8x8xf32> to vector<8xf32>
    %132 = vector.shape_cast %131 : vector<8xf32> to vector<8x1xf32>
    %133 = vector.broadcast %132 : vector<8x1xf32> to vector<8x8xf32>
    %134 = arith.subf %130, %133 : vector<8x8xf32>
    %135 = math.exp %134 : vector<8x8xf32>
    %cst_69 = arith.constant dense<0.000000e+00> : vector<8xf32>
    %136 = vector.multi_reduction <add>, %135, %cst_69 [1] : vector<8x8xf32> to vector<8xf32>
    %137 = vector.shape_cast %136 : vector<8xf32> to vector<8x1xf32>
    %138 = tpu.reciprocal %137 {approx = true} : vector<8x1xf32> -> vector<8x1xf32>
    %139 = vector.broadcast %138 : vector<8x1xf32> to vector<8x8xf32>
    %140 = arith.mulf %135, %139 : vector<8x8xf32>
    %cst_70 = arith.constant dense<0.000000e+00> : vector<8x8xf32>
    %141 = tpu.matmul %140, %127, %cst_70 {dimension_numbers = #tpu.dot_dimension_numbers<[1], [0], [0], [1], [0, 0, 1, 1], [], []>} : vector<8x8xf32>, vector<8x8xf32>, vector<8x8xf32> -> vector<8x8xf32>
    %c0_71 = arith.constant 0 : index
    %c0_72 = arith.constant 0 : index
    %c0_73 = arith.constant 0 : index
    %142 = vector.load %arg13[%c0_71, %c0_72, %c0_73] : memref<2x32x32xf32, #tpu.memory_space<vmem>>, vector<1x8x32xf32>
    %143 = vector.shape_cast %142 : vector<1x8x32xf32> to vector<8x32xf32>
    %cst_74 = arith.constant dense<0.000000e+00> : vector<8x32xf32>
    %144 = tpu.matmul %141, %143, %cst_74 {dimension_numbers = #tpu.dot_dimension_numbers<[1], [0], [0], [1], [0, 0, 1, 1], [], []>} : vector<8x8xf32>, vector<8x32xf32>, vector<8x32xf32> -> vector<8x32xf32>
    %145 = arith.addf %122, %144 : vector<8x32xf32>
    %146 = vector.extract_strided_slice %120 {offsets = [0, 8], sizes = [8, 8], strides = [1, 1]} : vector<8x96xf32> to vector<8x8xf32>
    %cst_75 = arith.constant 0.353553385 : f32
    %147 = vector.broadcast %cst_75 : f32 to vector<8x8xf32>
    %148 = arith.mulf %146, %147 : vector<8x8xf32>
    %149 = vector.extract_strided_slice %120 {offsets = [0, 40], sizes = [8, 8], strides = [1, 1]} : vector<8x96xf32> to vector<8x8xf32>
    %150 = vector.extract_strided_slice %120 {offsets = [0, 72], sizes = [8, 8], strides = [1, 1]} : vector<8x96xf32> to vector<8x8xf32>
    "tpu.trace_start"() <{level = 10 : i32, message = "qd,kd->qk"}> : () -> ()
    %cst_76 = arith.constant dense<0.000000e+00> : vector<8x8xf32>
    %151 = tpu.matmul %148, %149, %cst_76 {dimension_numbers = #tpu.dot_dimension_numbers<[1], [1], [0], [0], [0, 0, 1, 0], [], []>} : vector<8x8xf32>, vector<8x8xf32>, vector<8x8xf32> -> vector<8x8xf32>
    "tpu.trace_stop"() : () -> ()
    %152 = vector.broadcast %121 : vector<1x8xf32> to vector<8x8xf32>
    %153 = arith.addf %151, %152 : vector<8x8xf32>
    %cst_77 = arith.constant dense<0xFF800000> : vector<8xf32>
    %154 = vector.multi_reduction <maximumf>, %153, %cst_77 [1] : vector<8x8xf32> to vector<8xf32>
    %155 = vector.shape_cast %154 : vector<8xf32> to vector<8x1xf32>
    %156 = vector.broadcast %155 : vector<8x1xf32> to vector<8x8xf32>
    %157 = arith.subf %153, %156 : vector<8x8xf32>
    %158 = math.exp %157 : vector<8x8xf32>
    %cst_78 = arith.constant dense<0.000000e+00> : vector<8xf32>
    %159 = vector.multi_reduction <add>, %158, %cst_78 [1] : vector<8x8xf32> to vector<8xf32>
    %160 = vector.shape_cast %159 : vector<8xf32> to vector<8x1xf32>
    %161 = tpu.reciprocal %160 {approx = true} : vector<8x1xf32> -> vector<8x1xf32>
    %162 = vector.broadcast %161 : vector<8x1xf32> to vector<8x8xf32>
    %163 = arith.mulf %158, %162 : vector<8x8xf32>
    %cst_79 = arith.constant dense<0.000000e+00> : vector<8x8xf32>
    %164 = tpu.matmul %163, %150, %cst_79 {dimension_numbers = #tpu.dot_dimension_numbers<[1], [0], [0], [1], [0, 0, 1, 1], [], []>} : vector<8x8xf32>, vector<8x8xf32>, vector<8x8xf32> -> vector<8x8xf32>
    %c0_80 = arith.constant 0 : index
    %c8 = arith.constant 8 : index
    %c0_81 = arith.constant 0 : index
    %165 = vector.load %arg13[%c0_80, %c8, %c0_81] : memref<2x32x32xf32, #tpu.memory_space<vmem>>, vector<1x8x32xf32>
    %166 = vector.shape_cast %165 : vector<1x8x32xf32> to vector<8x32xf32>
    %cst_82 = arith.constant dense<0.000000e+00> : vector<8x32xf32>
    %167 = tpu.matmul %164, %166, %cst_82 {dimension_numbers = #tpu.dot_dimension_numbers<[1], [0], [0], [1], [0, 0, 1, 1], [], []>} : vector<8x8xf32>, vector<8x32xf32>, vector<8x32xf32> -> vector<8x32xf32>
    %168 = arith.addf %145, %167 : vector<8x32xf32>
    %169 = vector.extract_strided_slice %120 {offsets = [0, 16], sizes = [8, 8], strides = [1, 1]} : vector<8x96xf32> to vector<8x8xf32>
    %cst_83 = arith.constant 0.353553385 : f32
    %170 = vector.broadcast %cst_83 : f32 to vector<8x8xf32>
    %171 = arith.mulf %169, %170 : vector<8x8xf32>
    %172 = vector.extract_strided_slice %120 {offsets = [0, 48], sizes = [8, 8], strides = [1, 1]} : vector<8x96xf32> to vector<8x8xf32>
    %173 = vector.extract_strided_slice %120 {offsets = [0, 80], sizes = [8, 8], strides = [1, 1]} : vector<8x96xf32> to vector<8x8xf32>
    "tpu.trace_start"() <{level = 10 : i32, message = "qd,kd->qk"}> : () -> ()
    %cst_84 = arith.constant dense<0.000000e+00> : vector<8x8xf32>
    %174 = tpu.matmul %171, %172, %cst_84 {dimension_numbers = #tpu.dot_dimension_numbers<[1], [1], [0], [0], [0, 0, 1, 0], [], []>} : vector<8x8xf32>, vector<8x8xf32>, vector<8x8xf32> -> vector<8x8xf32>
    "tpu.trace_stop"() : () -> ()
    %175 = vector.broadcast %121 : vector<1x8xf32> to vector<8x8xf32>
    %176 = arith.addf %174, %175 : vector<8x8xf32>
    %cst_85 = arith.constant dense<0xFF800000> : vector<8xf32>
    %177 = vector.multi_reduction <maximumf>, %176, %cst_85 [1] : vector<8x8xf32> to vector<8xf32>
    %178 = vector.shape_cast %177 : vector<8xf32> to vector<8x1xf32>
    %179 = vector.broadcast %178 : vector<8x1xf32> to vector<8x8xf32>
    %180 = arith.subf %176, %179 : vector<8x8xf32>
    %181 = math.exp %180 : vector<8x8xf32>
    %cst_86 = arith.constant dense<0.000000e+00> : vector<8xf32>
    %182 = vector.multi_reduction <add>, %181, %cst_86 [1] : vector<8x8xf32> to vector<8xf32>
    %183 = vector.shape_cast %182 : vector<8xf32> to vector<8x1xf32>
    %184 = tpu.reciprocal %183 {approx = true} : vector<8x1xf32> -> vector<8x1xf32>
    %185 = vector.broadcast %184 : vector<8x1xf32> to vector<8x8xf32>
    %186 = arith.mulf %181, %185 : vector<8x8xf32>
    %cst_87 = arith.constant dense<0.000000e+00> : vector<8x8xf32>
    %187 = tpu.matmul %186, %173, %cst_87 {dimension_numbers = #tpu.dot_dimension_numbers<[1], [0], [0], [1], [0, 0, 1, 1], [], []>} : vector<8x8xf32>, vector<8x8xf32>, vector<8x8xf32> -> vector<8x8xf32>
    %c0_88 = arith.constant 0 : index
    %c16 = arith.constant 16 : index
    %c0_89 = arith.constant 0 : index
    %188 = vector.load %arg13[%c0_88, %c16, %c0_89] : memref<2x32x32xf32, #tpu.memory_space<vmem>>, vector<1x8x32xf32>
    %189 = vector.shape_cast %188 : vector<1x8x32xf32> to vector<8x32xf32>
    %cst_90 = arith.constant dense<0.000000e+00> : vector<8x32xf32>
    %190 = tpu.matmul %187, %189, %cst_90 {dimension_numbers = #tpu.dot_dimension_numbers<[1], [0], [0], [1], [0, 0, 1, 1], [], []>} : vector<8x8xf32>, vector<8x32xf32>, vector<8x32xf32> -> vector<8x32xf32>
    %191 = arith.addf %168, %190 : vector<8x32xf32>
    %192 = vector.extract_strided_slice %120 {offsets = [0, 24], sizes = [8, 8], strides = [1, 1]} : vector<8x96xf32> to vector<8x8xf32>
    %cst_91 = arith.constant 0.353553385 : f32
    %193 = vector.broadcast %cst_91 : f32 to vector<8x8xf32>
    %194 = arith.mulf %192, %193 : vector<8x8xf32>
    %195 = vector.extract_strided_slice %120 {offsets = [0, 56], sizes = [8, 8], strides = [1, 1]} : vector<8x96xf32> to vector<8x8xf32>
    %196 = vector.extract_strided_slice %120 {offsets = [0, 88], sizes = [8, 8], strides = [1, 1]} : vector<8x96xf32> to vector<8x8xf32>
    "tpu.trace_start"() <{level = 10 : i32, message = "qd,kd->qk"}> : () -> ()
    %cst_92 = arith.constant dense<0.000000e+00> : vector<8x8xf32>
    %197 = tpu.matmul %194, %195, %cst_92 {dimension_numbers = #tpu.dot_dimension_numbers<[1], [1], [0], [0], [0, 0, 1, 0], [], []>} : vector<8x8xf32>, vector<8x8xf32>, vector<8x8xf32> -> vector<8x8xf32>
    "tpu.trace_stop"() : () -> ()
    %198 = vector.broadcast %121 : vector<1x8xf32> to vector<8x8xf32>
    %199 = arith.addf %197, %198 : vector<8x8xf32>
    %cst_93 = arith.constant dense<0xFF800000> : vector<8xf32>
    %200 = vector.multi_reduction <maximumf>, %199, %cst_93 [1] : vector<8x8xf32> to vector<8xf32>
    %201 = vector.shape_cast %200 : vector<8xf32> to vector<8x1xf32>
    %202 = vector.broadcast %201 : vector<8x1xf32> to vector<8x8xf32>
    %203 = arith.subf %199, %202 : vector<8x8xf32>
    %204 = math.exp %203 : vector<8x8xf32>
    %cst_94 = arith.constant dense<0.000000e+00> : vector<8xf32>
    %205 = vector.multi_reduction <add>, %204, %cst_94 [1] : vector<8x8xf32> to vector<8xf32>
    %206 = vector.shape_cast %205 : vector<8xf32> to vector<8x1xf32>
    %207 = tpu.reciprocal %206 {approx = true} : vector<8x1xf32> -> vector<8x1xf32>
    %208 = vector.broadcast %207 : vector<8x1xf32> to vector<8x8xf32>
    %209 = arith.mulf %204, %208 : vector<8x8xf32>
    %cst_95 = arith.constant dense<0.000000e+00> : vector<8x8xf32>
    %210 = tpu.matmul %209, %196, %cst_95 {dimension_numbers = #tpu.dot_dimension_numbers<[1], [0], [0], [1], [0, 0, 1, 1], [], []>} : vector<8x8xf32>, vector<8x8xf32>, vector<8x8xf32> -> vector<8x8xf32>
    %c0_96 = arith.constant 0 : index
    %c24 = arith.constant 24 : index
    %c0_97 = arith.constant 0 : index
    %211 = vector.load %arg13[%c0_96, %c24, %c0_97] : memref<2x32x32xf32, #tpu.memory_space<vmem>>, vector<1x8x32xf32>
    %212 = vector.shape_cast %211 : vector<1x8x32xf32> to vector<8x32xf32>
    %cst_98 = arith.constant dense<0.000000e+00> : vector<8x32xf32>
    %213 = tpu.matmul %210, %212, %cst_98 {dimension_numbers = #tpu.dot_dimension_numbers<[1], [0], [0], [1], [0, 0, 1, 1], [], []>} : vector<8x8xf32>, vector<8x32xf32>, vector<8x32xf32> -> vector<8x32xf32>
    %214 = arith.addf %191, %213 : vector<8x32xf32>
    %215 = vector.extract_strided_slice %119 {offsets = [8, 0], sizes = [8, 96], strides = [1, 1]} : vector<16x96xf32> to vector<8x96xf32>
    %216 = vector.extract_strided_slice %112 {offsets = [1, 0], sizes = [1, 8], strides = [1, 1]} : vector<2x8xf32> to vector<1x8xf32>
    %cst_99 = arith.constant 0.000000e+00 : f32
    %217 = vector.broadcast %cst_99 : f32 to vector<8x32xf32>
    %218 = vector.extract_strided_slice %215 {offsets = [0, 0], sizes = [8, 8], strides = [1, 1]} : vector<8x96xf32> to vector<8x8xf32>
    %cst_100 = arith.constant 0.353553385 : f32
    %219 = vector.broadcast %cst_100 : f32 to vector<8x8xf32>
    %220 = arith.mulf %218, %219 : vector<8x8xf32>
    %221 = vector.extract_strided_slice %215 {offsets = [0, 32], sizes = [8, 8], strides = [1, 1]} : vector<8x96xf32> to vector<8x8xf32>
    %222 = vector.extract_strided_slice %215 {offsets = [0, 64], sizes = [8, 8], strides = [1, 1]} : vector<8x96xf32> to vector<8x8xf32>
    "tpu.trace_start"() <{level = 10 : i32, message = "qd,kd->qk"}> : () -> ()
    %cst_101 = arith.constant dense<0.000000e+00> : vector<8x8xf32>
    %223 = tpu.matmul %220, %221, %cst_101 {dimension_numbers = #tpu.dot_dimension_numbers<[1], [1], [0], [0], [0, 0, 1, 0], [], []>} : vector<8x8xf32>, vector<8x8xf32>, vector<8x8xf32> -> vector<8x8xf32>
    "tpu.trace_stop"() : () -> ()
    %224 = vector.broadcast %216 : vector<1x8xf32> to vector<8x8xf32>
    %225 = arith.addf %223, %224 : vector<8x8xf32>
    %cst_102 = arith.constant dense<0xFF800000> : vector<8xf32>
    %226 = vector.multi_reduction <maximumf>, %225, %cst_102 [1] : vector<8x8xf32> to vector<8xf32>
    %227 = vector.shape_cast %226 : vector<8xf32> to vector<8x1xf32>
    %228 = vector.broadcast %227 : vector<8x1xf32> to vector<8x8xf32>
    %229 = arith.subf %225, %228 : vector<8x8xf32>
    %230 = math.exp %229 : vector<8x8xf32>
    %cst_103 = arith.constant dense<0.000000e+00> : vector<8xf32>
    %231 = vector.multi_reduction <add>, %230, %cst_103 [1] : vector<8x8xf32> to vector<8xf32>
    %232 = vector.shape_cast %231 : vector<8xf32> to vector<8x1xf32>
    %233 = tpu.reciprocal %232 {approx = true} : vector<8x1xf32> -> vector<8x1xf32>
    %234 = vector.broadcast %233 : vector<8x1xf32> to vector<8x8xf32>
    %235 = arith.mulf %230, %234 : vector<8x8xf32>
    %cst_104 = arith.constant dense<0.000000e+00> : vector<8x8xf32>
    %236 = tpu.matmul %235, %222, %cst_104 {dimension_numbers = #tpu.dot_dimension_numbers<[1], [0], [0], [1], [0, 0, 1, 1], [], []>} : vector<8x8xf32>, vector<8x8xf32>, vector<8x8xf32> -> vector<8x8xf32>
    %c0_105 = arith.constant 0 : index
    %c0_106 = arith.constant 0 : index
    %c0_107 = arith.constant 0 : index
    %237 = vector.load %arg13[%c0_105, %c0_106, %c0_107] : memref<2x32x32xf32, #tpu.memory_space<vmem>>, vector<1x8x32xf32>
    %238 = vector.shape_cast %237 : vector<1x8x32xf32> to vector<8x32xf32>
    %cst_108 = arith.constant dense<0.000000e+00> : vector<8x32xf32>
    %239 = tpu.matmul %236, %238, %cst_108 {dimension_numbers = #tpu.dot_dimension_numbers<[1], [0], [0], [1], [0, 0, 1, 1], [], []>} : vector<8x8xf32>, vector<8x32xf32>, vector<8x32xf32> -> vector<8x32xf32>
    %240 = arith.addf %217, %239 : vector<8x32xf32>
    %241 = vector.extract_strided_slice %215 {offsets = [0, 8], sizes = [8, 8], strides = [1, 1]} : vector<8x96xf32> to vector<8x8xf32>
    %cst_109 = arith.constant 0.353553385 : f32
    %242 = vector.broadcast %cst_109 : f32 to vector<8x8xf32>
    %243 = arith.mulf %241, %242 : vector<8x8xf32>
    %244 = vector.extract_strided_slice %215 {offsets = [0, 40], sizes = [8, 8], strides = [1, 1]} : vector<8x96xf32> to vector<8x8xf32>
    %245 = vector.extract_strided_slice %215 {offsets = [0, 72], sizes = [8, 8], strides = [1, 1]} : vector<8x96xf32> to vector<8x8xf32>
    "tpu.trace_start"() <{level = 10 : i32, message = "qd,kd->qk"}> : () -> ()
    %cst_110 = arith.constant dense<0.000000e+00> : vector<8x8xf32>
    %246 = tpu.matmul %243, %244, %cst_110 {dimension_numbers = #tpu.dot_dimension_numbers<[1], [1], [0], [0], [0, 0, 1, 0], [], []>} : vector<8x8xf32>, vector<8x8xf32>, vector<8x8xf32> -> vector<8x8xf32>
    "tpu.trace_stop"() : () -> ()
    %247 = vector.broadcast %216 : vector<1x8xf32> to vector<8x8xf32>
    %248 = arith.addf %246, %247 : vector<8x8xf32>
    %cst_111 = arith.constant dense<0xFF800000> : vector<8xf32>
    %249 = vector.multi_reduction <maximumf>, %248, %cst_111 [1] : vector<8x8xf32> to vector<8xf32>
    %250 = vector.shape_cast %249 : vector<8xf32> to vector<8x1xf32>
    %251 = vector.broadcast %250 : vector<8x1xf32> to vector<8x8xf32>
    %252 = arith.subf %248, %251 : vector<8x8xf32>
    %253 = math.exp %252 : vector<8x8xf32>
    %cst_112 = arith.constant dense<0.000000e+00> : vector<8xf32>
    %254 = vector.multi_reduction <add>, %253, %cst_112 [1] : vector<8x8xf32> to vector<8xf32>
    %255 = vector.shape_cast %254 : vector<8xf32> to vector<8x1xf32>
    %256 = tpu.reciprocal %255 {approx = true} : vector<8x1xf32> -> vector<8x1xf32>
    %257 = vector.broadcast %256 : vector<8x1xf32> to vector<8x8xf32>
    %258 = arith.mulf %253, %257 : vector<8x8xf32>
    %cst_113 = arith.constant dense<0.000000e+00> : vector<8x8xf32>
    %259 = tpu.matmul %258, %245, %cst_113 {dimension_numbers = #tpu.dot_dimension_numbers<[1], [0], [0], [1], [0, 0, 1, 1], [], []>} : vector<8x8xf32>, vector<8x8xf32>, vector<8x8xf32> -> vector<8x8xf32>
    %c0_114 = arith.constant 0 : index
    %c8_115 = arith.constant 8 : index
    %c0_116 = arith.constant 0 : index
    %260 = vector.load %arg13[%c0_114, %c8_115, %c0_116] : memref<2x32x32xf32, #tpu.memory_space<vmem>>, vector<1x8x32xf32>
    %261 = vector.shape_cast %260 : vector<1x8x32xf32> to vector<8x32xf32>
    %cst_117 = arith.constant dense<0.000000e+00> : vector<8x32xf32>
    %262 = tpu.matmul %259, %261, %cst_117 {dimension_numbers = #tpu.dot_dimension_numbers<[1], [0], [0], [1], [0, 0, 1, 1], [], []>} : vector<8x8xf32>, vector<8x32xf32>, vector<8x32xf32> -> vector<8x32xf32>
    %263 = arith.addf %240, %262 : vector<8x32xf32>
    %264 = vector.extract_strided_slice %215 {offsets = [0, 16], sizes = [8, 8], strides = [1, 1]} : vector<8x96xf32> to vector<8x8xf32>
    %cst_118 = arith.constant 0.353553385 : f32
    %265 = vector.broadcast %cst_118 : f32 to vector<8x8xf32>
    %266 = arith.mulf %264, %265 : vector<8x8xf32>
    %267 = vector.extract_strided_slice %215 {offsets = [0, 48], sizes = [8, 8], strides = [1, 1]} : vector<8x96xf32> to vector<8x8xf32>
    %268 = vector.extract_strided_slice %215 {offsets = [0, 80], sizes = [8, 8], strides = [1, 1]} : vector<8x96xf32> to vector<8x8xf32>
    "tpu.trace_start"() <{level = 10 : i32, message = "qd,kd->qk"}> : () -> ()
    %cst_119 = arith.constant dense<0.000000e+00> : vector<8x8xf32>
    %269 = tpu.matmul %266, %267, %cst_119 {dimension_numbers = #tpu.dot_dimension_numbers<[1], [1], [0], [0], [0, 0, 1, 0], [], []>} : vector<8x8xf32>, vector<8x8xf32>, vector<8x8xf32> -> vector<8x8xf32>
    "tpu.trace_stop"() : () -> ()
    %270 = vector.broadcast %216 : vector<1x8xf32> to vector<8x8xf32>
    %271 = arith.addf %269, %270 : vector<8x8xf32>
    %cst_120 = arith.constant dense<0xFF800000> : vector<8xf32>
    %272 = vector.multi_reduction <maximumf>, %271, %cst_120 [1] : vector<8x8xf32> to vector<8xf32>
    %273 = vector.shape_cast %272 : vector<8xf32> to vector<8x1xf32>
    %274 = vector.broadcast %273 : vector<8x1xf32> to vector<8x8xf32>
    %275 = arith.subf %271, %274 : vector<8x8xf32>
    %276 = math.exp %275 : vector<8x8xf32>
    %cst_121 = arith.constant dense<0.000000e+00> : vector<8xf32>
    %277 = vector.multi_reduction <add>, %276, %cst_121 [1] : vector<8x8xf32> to vector<8xf32>
    %278 = vector.shape_cast %277 : vector<8xf32> to vector<8x1xf32>
    %279 = tpu.reciprocal %278 {approx = true} : vector<8x1xf32> -> vector<8x1xf32>
    %280 = vector.broadcast %279 : vector<8x1xf32> to vector<8x8xf32>
    %281 = arith.mulf %276, %280 : vector<8x8xf32>
    %cst_122 = arith.constant dense<0.000000e+00> : vector<8x8xf32>
    %282 = tpu.matmul %281, %268, %cst_122 {dimension_numbers = #tpu.dot_dimension_numbers<[1], [0], [0], [1], [0, 0, 1, 1], [], []>} : vector<8x8xf32>, vector<8x8xf32>, vector<8x8xf32> -> vector<8x8xf32>
    %c0_123 = arith.constant 0 : index
    %c16_124 = arith.constant 16 : index
    %c0_125 = arith.constant 0 : index
    %283 = vector.load %arg13[%c0_123, %c16_124, %c0_125] : memref<2x32x32xf32, #tpu.memory_space<vmem>>, vector<1x8x32xf32>
    %284 = vector.shape_cast %283 : vector<1x8x32xf32> to vector<8x32xf32>
    %cst_126 = arith.constant dense<0.000000e+00> : vector<8x32xf32>
    %285 = tpu.matmul %282, %284, %cst_126 {dimension_numbers = #tpu.dot_dimension_numbers<[1], [0], [0], [1], [0, 0, 1, 1], [], []>} : vector<8x8xf32>, vector<8x32xf32>, vector<8x32xf32> -> vector<8x32xf32>
    %286 = arith.addf %263, %285 : vector<8x32xf32>
    %287 = vector.extract_strided_slice %215 {offsets = [0, 24], sizes = [8, 8], strides = [1, 1]} : vector<8x96xf32> to vector<8x8xf32>
    %cst_127 = arith.constant 0.353553385 : f32
    %288 = vector.broadcast %cst_127 : f32 to vector<8x8xf32>
    %289 = arith.mulf %287, %288 : vector<8x8xf32>
    %290 = vector.extract_strided_slice %215 {offsets = [0, 56], sizes = [8, 8], strides = [1, 1]} : vector<8x96xf32> to vector<8x8xf32>
    %291 = vector.extract_strided_slice %215 {offsets = [0, 88], sizes = [8, 8], strides = [1, 1]} : vector<8x96xf32> to vector<8x8xf32>
    "tpu.trace_start"() <{level = 10 : i32, message = "qd,kd->qk"}> : () -> ()
    %cst_128 = arith.constant dense<0.000000e+00> : vector<8x8xf32>
    %292 = tpu.matmul %289, %290, %cst_128 {dimension_numbers = #tpu.dot_dimension_numbers<[1], [1], [0], [0], [0, 0, 1, 0], [], []>} : vector<8x8xf32>, vector<8x8xf32>, vector<8x8xf32> -> vector<8x8xf32>
    "tpu.trace_stop"() : () -> ()
    %293 = vector.broadcast %216 : vector<1x8xf32> to vector<8x8xf32>
    %294 = arith.addf %292, %293 : vector<8x8xf32>
    %cst_129 = arith.constant dense<0xFF800000> : vector<8xf32>
    %295 = vector.multi_reduction <maximumf>, %294, %cst_129 [1] : vector<8x8xf32> to vector<8xf32>
    %296 = vector.shape_cast %295 : vector<8xf32> to vector<8x1xf32>
    %297 = vector.broadcast %296 : vector<8x1xf32> to vector<8x8xf32>
    %298 = arith.subf %294, %297 : vector<8x8xf32>
    %299 = math.exp %298 : vector<8x8xf32>
    %cst_130 = arith.constant dense<0.000000e+00> : vector<8xf32>
    %300 = vector.multi_reduction <add>, %299, %cst_130 [1] : vector<8x8xf32> to vector<8xf32>
    %301 = vector.shape_cast %300 : vector<8xf32> to vector<8x1xf32>
    %302 = tpu.reciprocal %301 {approx = true} : vector<8x1xf32> -> vector<8x1xf32>
    %303 = vector.broadcast %302 : vector<8x1xf32> to vector<8x8xf32>
    %304 = arith.mulf %299, %303 : vector<8x8xf32>
    %cst_131 = arith.constant dense<0.000000e+00> : vector<8x8xf32>
    %305 = tpu.matmul %304, %291, %cst_131 {dimension_numbers = #tpu.dot_dimension_numbers<[1], [0], [0], [1], [0, 0, 1, 1], [], []>} : vector<8x8xf32>, vector<8x8xf32>, vector<8x8xf32> -> vector<8x8xf32>
    %c0_132 = arith.constant 0 : index
    %c24_133 = arith.constant 24 : index
    %c0_134 = arith.constant 0 : index
    %306 = vector.load %arg13[%c0_132, %c24_133, %c0_134] : memref<2x32x32xf32, #tpu.memory_space<vmem>>, vector<1x8x32xf32>
    %307 = vector.shape_cast %306 : vector<1x8x32xf32> to vector<8x32xf32>
    %cst_135 = arith.constant dense<0.000000e+00> : vector<8x32xf32>
    %308 = tpu.matmul %305, %307, %cst_135 {dimension_numbers = #tpu.dot_dimension_numbers<[1], [0], [0], [1], [0, 0, 1, 1], [], []>} : vector<8x8xf32>, vector<8x32xf32>, vector<8x32xf32> -> vector<8x32xf32>
    %309 = arith.addf %286, %308 : vector<8x32xf32>
    %310 = tpu.concatenate %214, %309 in 0 : vector<8x32xf32>, vector<8x32xf32> -> vector<16x32xf32>
    %c0_136 = arith.constant 0 : index
    %c0_137 = arith.constant 0 : index
    %c0_138 = arith.constant 0 : index
    %311 = vector.load %arg14[%c0_136, %c0_137, %c0_138] : memref<2x1x32xf32, #tpu.memory_space<vmem>>, vector<1x1x32xf32>
    %312 = vector.shape_cast %311 : vector<1x1x32xf32> to vector<1x32xf32>
    %313 = vector.broadcast %312 : vector<1x32xf32> to vector<16x32xf32>
    %314 = arith.addf %310, %313 : vector<16x32xf32>
    %315 = arith.addf %111, %314 : vector<16x32xf32>
    %c0_139 = arith.constant 0 : index
    %c0_140 = arith.constant 0 : index
    %c0_141 = arith.constant 0 : index
    %316 = vector.load %arg15[%c0_139, %c0_140, %c0_141] : memref<2x1x32xf32, #tpu.memory_space<vmem>>, vector<1x1x32xf32>
    %317 = vector.shape_cast %316 : vector<1x1x32xf32> to vector<1x32xf32>
    %c0_142 = arith.constant 0 : index
    %c0_143 = arith.constant 0 : index
    %c0_144 = arith.constant 0 : index
    %318 = vector.load %arg16[%c0_142, %c0_143, %c0_144] : memref<2x1x32xf32, #tpu.memory_space<vmem>>, vector<1x1x32xf32>
    %319 = vector.shape_cast %318 : vector<1x1x32xf32> to vector<1x32xf32>
    %cst_145 = arith.constant dense<0.000000e+00> : vector<16xf32>
    %320 = vector.multi_reduction <add>, %315, %cst_145 [1] : vector<16x32xf32> to vector<16xf32>
    %321 = vector.shape_cast %320 : vector<16xf32> to vector<16x1xf32>
    %cst_146 = arith.constant 3.200000e+01 : f32
    %322 = vector.broadcast %cst_146 : f32 to vector<16x1xf32>
    %323 = arith.divf %321, %322 : vector<16x1xf32>
    %324 = vector.broadcast %323 : vector<16x1xf32> to vector<16x32xf32>
    %325 = arith.subf %315, %324 : vector<16x32xf32>
    %326 = arith.mulf %325, %325 : vector<16x32xf32>
    %cst_147 = arith.constant dense<0.000000e+00> : vector<16xf32>
    %327 = vector.multi_reduction <add>, %326, %cst_147 [1] : vector<16x32xf32> to vector<16xf32>
    %328 = vector.shape_cast %327 : vector<16xf32> to vector<16x1xf32>
    %cst_148 = arith.constant 3.200000e+01 : f32
    %329 = vector.broadcast %cst_148 : f32 to vector<16x1xf32>
    %330 = arith.divf %328, %329 : vector<16x1xf32>
    %cst_149 = arith.constant 9.99999974E-6 : f32
    %331 = vector.broadcast %cst_149 : f32 to vector<16x1xf32>
    %332 = arith.addf %330, %331 : vector<16x1xf32>
    %333 = math.rsqrt %332 : vector<16x1xf32>
    %334 = vector.broadcast %333 : vector<16x1xf32> to vector<16x32xf32>
    %335 = arith.mulf %325, %334 : vector<16x32xf32>
    %336 = vector.broadcast %317 : vector<1x32xf32> to vector<16x32xf32>
    %337 = arith.mulf %335, %336 : vector<16x32xf32>
    %338 = vector.broadcast %319 : vector<1x32xf32> to vector<16x32xf32>
    %339 = arith.addf %337, %338 : vector<16x32xf32>
    %340 = arith.truncf %339 : vector<16x32xf32> to vector<16x32xbf16>
    %cst_150 = arith.constant 0.000000e+00 : f32
    %341 = vector.broadcast %cst_150 : f32 to vector<16x32xf32>
    %c0_151 = arith.constant 0 : index
    %c0_152 = arith.constant 0 : index
    %c0_153 = arith.constant 0 : index
    %342 = vector.load %arg19[%c0_151, %c0_152, %c0_153] : memref<2x32x2048xbf16, #tpu.memory_space<vmem>>, vector<1x32x256xbf16>
    %343 = vector.shape_cast %342 : vector<1x32x256xbf16> to vector<32x256xbf16>
    %cst_154 = arith.constant dense<0.000000e+00> : vector<16x256xf32>
    %344 = tpu.matmul %340, %343, %cst_154 {dimension_numbers = #tpu.dot_dimension_numbers<[1], [0], [0], [1], [0, 0, 1, 1], [], []>} : vector<16x32xbf16>, vector<32x256xbf16>, vector<16x256xf32> -> vector<16x256xf32>
    %c0_155 = arith.constant 0 : index
    %c0_156 = arith.constant 0 : index
    %c0_157 = arith.constant 0 : index
    %345 = vector.load %arg20[%c0_155, %c0_156, %c0_157] : memref<2x1x2048xf32, #tpu.memory_space<vmem>>, vector<1x1x256xf32>
    %346 = vector.shape_cast %345 : vector<1x1x256xf32> to vector<1x256xf32>
    %347 = vector.broadcast %346 : vector<1x256xf32> to vector<16x256xf32>
    %348 = arith.addf %344, %347 : vector<16x256xf32>
    %cst_158 = arith.constant 0.000000e+00 : f32
    %349 = vector.broadcast %cst_158 : f32 to vector<16x256xf32>
    %350 = arith.maximumf %348, %349 : vector<16x256xf32>
    %351 = arith.truncf %350 : vector<16x256xf32> to vector<16x256xbf16>
    %c0_159 = arith.constant 0 : index
    %c0_160 = arith.constant 0 : index
    %c0_161 = arith.constant 0 : index
    %352 = vector.load %arg21[%c0_159, %c0_160, %c0_161] : memref<2x2048x32xbf16, #tpu.memory_space<vmem>>, vector<1x256x32xbf16>
    %353 = vector.shape_cast %352 : vector<1x256x32xbf16> to vector<256x32xbf16>
    %cst_162 = arith.constant dense<0.000000e+00> : vector<16x32xf32>
    %354 = tpu.matmul %351, %353, %cst_162 {dimension_numbers = #tpu.dot_dimension_numbers<[1], [0], [0], [1], [0, 0, 1, 1], [], []>} : vector<16x256xbf16>, vector<256x32xbf16>, vector<16x32xf32> -> vector<16x32xf32>
    %355 = arith.addf %341, %354 : vector<16x32xf32>
    %c0_163 = arith.constant 0 : index
    %c0_164 = arith.constant 0 : index
    %c256 = arith.constant 256 : index
    %356 = vector.load %arg19[%c0_163, %c0_164, %c256] : memref<2x32x2048xbf16, #tpu.memory_space<vmem>>, vector<1x32x256xbf16>
    %357 = vector.shape_cast %356 : vector<1x32x256xbf16> to vector<32x256xbf16>
    %cst_165 = arith.constant dense<0.000000e+00> : vector<16x256xf32>
    %358 = tpu.matmul %340, %357, %cst_165 {dimension_numbers = #tpu.dot_dimension_numbers<[1], [0], [0], [1], [0, 0, 1, 1], [], []>} : vector<16x32xbf16>, vector<32x256xbf16>, vector<16x256xf32> -> vector<16x256xf32>
    %c0_166 = arith.constant 0 : index
    %c0_167 = arith.constant 0 : index
    %c256_168 = arith.constant 256 : index
    %359 = vector.load %arg20[%c0_166, %c0_167, %c256_168] : memref<2x1x2048xf32, #tpu.memory_space<vmem>>, vector<1x1x256xf32>
    %360 = vector.shape_cast %359 : vector<1x1x256xf32> to vector<1x256xf32>
    %361 = vector.broadcast %360 : vector<1x256xf32> to vector<16x256xf32>
    %362 = arith.addf %358, %361 : vector<16x256xf32>
    %cst_169 = arith.constant 0.000000e+00 : f32
    %363 = vector.broadcast %cst_169 : f32 to vector<16x256xf32>
    %364 = arith.maximumf %362, %363 : vector<16x256xf32>
    %365 = arith.truncf %364 : vector<16x256xf32> to vector<16x256xbf16>
    %c0_170 = arith.constant 0 : index
    %c256_171 = arith.constant 256 : index
    %c0_172 = arith.constant 0 : index
    %366 = vector.load %arg21[%c0_170, %c256_171, %c0_172] : memref<2x2048x32xbf16, #tpu.memory_space<vmem>>, vector<1x256x32xbf16>
    %367 = vector.shape_cast %366 : vector<1x256x32xbf16> to vector<256x32xbf16>
    %cst_173 = arith.constant dense<0.000000e+00> : vector<16x32xf32>
    %368 = tpu.matmul %365, %367, %cst_173 {dimension_numbers = #tpu.dot_dimension_numbers<[1], [0], [0], [1], [0, 0, 1, 1], [], []>} : vector<16x256xbf16>, vector<256x32xbf16>, vector<16x32xf32> -> vector<16x32xf32>
    %369 = arith.addf %355, %368 : vector<16x32xf32>
    %c0_174 = arith.constant 0 : index
    %c0_175 = arith.constant 0 : index
    %c512 = arith.constant 512 : index
    %370 = vector.load %arg19[%c0_174, %c0_175, %c512] : memref<2x32x2048xbf16, #tpu.memory_space<vmem>>, vector<1x32x256xbf16>
    %371 = vector.shape_cast %370 : vector<1x32x256xbf16> to vector<32x256xbf16>
    %cst_176 = arith.constant dense<0.000000e+00> : vector<16x256xf32>
    %372 = tpu.matmul %340, %371, %cst_176 {dimension_numbers = #tpu.dot_dimension_numbers<[1], [0], [0], [1], [0, 0, 1, 1], [], []>} : vector<16x32xbf16>, vector<32x256xbf16>, vector<16x256xf32> -> vector<16x256xf32>
    %c0_177 = arith.constant 0 : index
    %c0_178 = arith.constant 0 : index
    %c512_179 = arith.constant 512 : index
    %373 = vector.load %arg20[%c0_177, %c0_178, %c512_179] : memref<2x1x2048xf32, #tpu.memory_space<vmem>>, vector<1x1x256xf32>
    %374 = vector.shape_cast %373 : vector<1x1x256xf32> to vector<1x256xf32>
    %375 = vector.broadcast %374 : vector<1x256xf32> to vector<16x256xf32>
    %376 = arith.addf %372, %375 : vector<16x256xf32>
    %cst_180 = arith.constant 0.000000e+00 : f32
    %377 = vector.broadcast %cst_180 : f32 to vector<16x256xf32>
    %378 = arith.maximumf %376, %377 : vector<16x256xf32>
    %379 = arith.truncf %378 : vector<16x256xf32> to vector<16x256xbf16>
    %c0_181 = arith.constant 0 : index
    %c512_182 = arith.constant 512 : index
    %c0_183 = arith.constant 0 : index
    %380 = vector.load %arg21[%c0_181, %c512_182, %c0_183] : memref<2x2048x32xbf16, #tpu.memory_space<vmem>>, vector<1x256x32xbf16>
    %381 = vector.shape_cast %380 : vector<1x256x32xbf16> to vector<256x32xbf16>
    %cst_184 = arith.constant dense<0.000000e+00> : vector<16x32xf32>
    %382 = tpu.matmul %379, %381, %cst_184 {dimension_numbers = #tpu.dot_dimension_numbers<[1], [0], [0], [1], [0, 0, 1, 1], [], []>} : vector<16x256xbf16>, vector<256x32xbf16>, vector<16x32xf32> -> vector<16x32xf32>
    %383 = arith.addf %369, %382 : vector<16x32xf32>
    %c0_185 = arith.constant 0 : index
    %c0_186 = arith.constant 0 : index
    %c768 = arith.constant 768 : index
    %384 = vector.load %arg19[%c0_185, %c0_186, %c768] : memref<2x32x2048xbf16, #tpu.memory_space<vmem>>, vector<1x32x256xbf16>
    %385 = vector.shape_cast %384 : vector<1x32x256xbf16> to vector<32x256xbf16>
    %cst_187 = arith.constant dense<0.000000e+00> : vector<16x256xf32>
    %386 = tpu.matmul %340, %385, %cst_187 {dimension_numbers = #tpu.dot_dimension_numbers<[1], [0], [0], [1], [0, 0, 1, 1], [], []>} : vector<16x32xbf16>, vector<32x256xbf16>, vector<16x256xf32> -> vector<16x256xf32>
    %c0_188 = arith.constant 0 : index
    %c0_189 = arith.constant 0 : index
    %c768_190 = arith.constant 768 : index
    %387 = vector.load %arg20[%c0_188, %c0_189, %c768_190] : memref<2x1x2048xf32, #tpu.memory_space<vmem>>, vector<1x1x256xf32>
    %388 = vector.shape_cast %387 : vector<1x1x256xf32> to vector<1x256xf32>
    %389 = vector.broadcast %388 : vector<1x256xf32> to vector<16x256xf32>
    %390 = arith.addf %386, %389 : vector<16x256xf32>
    %cst_191 = arith.constant 0.000000e+00 : f32
    %391 = vector.broadcast %cst_191 : f32 to vector<16x256xf32>
    %392 = arith.maximumf %390, %391 : vector<16x256xf32>
    %393 = arith.truncf %392 : vector<16x256xf32> to vector<16x256xbf16>
    %c0_192 = arith.constant 0 : index
    %c768_193 = arith.constant 768 : index
    %c0_194 = arith.constant 0 : index
    %394 = vector.load %arg21[%c0_192, %c768_193, %c0_194] : memref<2x2048x32xbf16, #tpu.memory_space<vmem>>, vector<1x256x32xbf16>
    %395 = vector.shape_cast %394 : vector<1x256x32xbf16> to vector<256x32xbf16>
    %cst_195 = arith.constant dense<0.000000e+00> : vector<16x32xf32>
    %396 = tpu.matmul %393, %395, %cst_195 {dimension_numbers = #tpu.dot_dimension_numbers<[1], [0], [0], [1], [0, 0, 1, 1], [], []>} : vector<16x256xbf16>, vector<256x32xbf16>, vector<16x32xf32> -> vector<16x32xf32>
    %397 = arith.addf %383, %396 : vector<16x32xf32>
    %c0_196 = arith.constant 0 : index
    %c0_197 = arith.constant 0 : index
    %c1024 = arith.constant 1024 : index
    %398 = vector.load %arg19[%c0_196, %c0_197, %c1024] : memref<2x32x2048xbf16, #tpu.memory_space<vmem>>, vector<1x32x256xbf16>
    %399 = vector.shape_cast %398 : vector<1x32x256xbf16> to vector<32x256xbf16>
    %cst_198 = arith.constant dense<0.000000e+00> : vector<16x256xf32>
    %400 = tpu.matmul %340, %399, %cst_198 {dimension_numbers = #tpu.dot_dimension_numbers<[1], [0], [0], [1], [0, 0, 1, 1], [], []>} : vector<16x32xbf16>, vector<32x256xbf16>, vector<16x256xf32> -> vector<16x256xf32>
    %c0_199 = arith.constant 0 : index
    %c0_200 = arith.constant 0 : index
    %c1024_201 = arith.constant 1024 : index
    %401 = vector.load %arg20[%c0_199, %c0_200, %c1024_201] : memref<2x1x2048xf32, #tpu.memory_space<vmem>>, vector<1x1x256xf32>
    %402 = vector.shape_cast %401 : vector<1x1x256xf32> to vector<1x256xf32>
    %403 = vector.broadcast %402 : vector<1x256xf32> to vector<16x256xf32>
    %404 = arith.addf %400, %403 : vector<16x256xf32>
    %cst_202 = arith.constant 0.000000e+00 : f32
    %405 = vector.broadcast %cst_202 : f32 to vector<16x256xf32>
    %406 = arith.maximumf %404, %405 : vector<16x256xf32>
    %407 = arith.truncf %406 : vector<16x256xf32> to vector<16x256xbf16>
    %c0_203 = arith.constant 0 : index
    %c1024_204 = arith.constant 1024 : index
    %c0_205 = arith.constant 0 : index
    %408 = vector.load %arg21[%c0_203, %c1024_204, %c0_205] : memref<2x2048x32xbf16, #tpu.memory_space<vmem>>, vector<1x256x32xbf16>
    %409 = vector.shape_cast %408 : vector<1x256x32xbf16> to vector<256x32xbf16>
    %cst_206 = arith.constant dense<0.000000e+00> : vector<16x32xf32>
    %410 = tpu.matmul %407, %409, %cst_206 {dimension_numbers = #tpu.dot_dimension_numbers<[1], [0], [0], [1], [0, 0, 1, 1], [], []>} : vector<16x256xbf16>, vector<256x32xbf16>, vector<16x32xf32> -> vector<16x32xf32>
    %411 = arith.addf %397, %410 : vector<16x32xf32>
    %c0_207 = arith.constant 0 : index
    %c0_208 = arith.constant 0 : index
    %c1280 = arith.constant 1280 : index
    %412 = vector.load %arg19[%c0_207, %c0_208, %c1280] : memref<2x32x2048xbf16, #tpu.memory_space<vmem>>, vector<1x32x256xbf16>
    %413 = vector.shape_cast %412 : vector<1x32x256xbf16> to vector<32x256xbf16>
    %cst_209 = arith.constant dense<0.000000e+00> : vector<16x256xf32>
    %414 = tpu.matmul %340, %413, %cst_209 {dimension_numbers = #tpu.dot_dimension_numbers<[1], [0], [0], [1], [0, 0, 1, 1], [], []>} : vector<16x32xbf16>, vector<32x256xbf16>, vector<16x256xf32> -> vector<16x256xf32>
    %c0_210 = arith.constant 0 : index
    %c0_211 = arith.constant 0 : index
    %c1280_212 = arith.constant 1280 : index
    %415 = vector.load %arg20[%c0_210, %c0_211, %c1280_212] : memref<2x1x2048xf32, #tpu.memory_space<vmem>>, vector<1x1x256xf32>
    %416 = vector.shape_cast %415 : vector<1x1x256xf32> to vector<1x256xf32>
    %417 = vector.broadcast %416 : vector<1x256xf32> to vector<16x256xf32>
    %418 = arith.addf %414, %417 : vector<16x256xf32>
    %cst_213 = arith.constant 0.000000e+00 : f32
    %419 = vector.broadcast %cst_213 : f32 to vector<16x256xf32>
    %420 = arith.maximumf %418, %419 : vector<16x256xf32>
    %421 = arith.truncf %420 : vector<16x256xf32> to vector<16x256xbf16>
    %c0_214 = arith.constant 0 : index
    %c1280_215 = arith.constant 1280 : index
    %c0_216 = arith.constant 0 : index
    %422 = vector.load %arg21[%c0_214, %c1280_215, %c0_216] : memref<2x2048x32xbf16, #tpu.memory_space<vmem>>, vector<1x256x32xbf16>
    %423 = vector.shape_cast %422 : vector<1x256x32xbf16> to vector<256x32xbf16>
    %cst_217 = arith.constant dense<0.000000e+00> : vector<16x32xf32>
    %424 = tpu.matmul %421, %423, %cst_217 {dimension_numbers = #tpu.dot_dimension_numbers<[1], [0], [0], [1], [0, 0, 1, 1], [], []>} : vector<16x256xbf16>, vector<256x32xbf16>, vector<16x32xf32> -> vector<16x32xf32>
    %425 = arith.addf %411, %424 : vector<16x32xf32>
    %c0_218 = arith.constant 0 : index
    %c0_219 = arith.constant 0 : index
    %c1536 = arith.constant 1536 : index
    %426 = vector.load %arg19[%c0_218, %c0_219, %c1536] : memref<2x32x2048xbf16, #tpu.memory_space<vmem>>, vector<1x32x256xbf16>
    %427 = vector.shape_cast %426 : vector<1x32x256xbf16> to vector<32x256xbf16>
    %cst_220 = arith.constant dense<0.000000e+00> : vector<16x256xf32>
    %428 = tpu.matmul %340, %427, %cst_220 {dimension_numbers = #tpu.dot_dimension_numbers<[1], [0], [0], [1], [0, 0, 1, 1], [], []>} : vector<16x32xbf16>, vector<32x256xbf16>, vector<16x256xf32> -> vector<16x256xf32>
    %c0_221 = arith.constant 0 : index
    %c0_222 = arith.constant 0 : index
    %c1536_223 = arith.constant 1536 : index
    %429 = vector.load %arg20[%c0_221, %c0_222, %c1536_223] : memref<2x1x2048xf32, #tpu.memory_space<vmem>>, vector<1x1x256xf32>
    %430 = vector.shape_cast %429 : vector<1x1x256xf32> to vector<1x256xf32>
    %431 = vector.broadcast %430 : vector<1x256xf32> to vector<16x256xf32>
    %432 = arith.addf %428, %431 : vector<16x256xf32>
    %cst_224 = arith.constant 0.000000e+00 : f32
    %433 = vector.broadcast %cst_224 : f32 to vector<16x256xf32>
    %434 = arith.maximumf %432, %433 : vector<16x256xf32>
    %435 = arith.truncf %434 : vector<16x256xf32> to vector<16x256xbf16>
    %c0_225 = arith.constant 0 : index
    %c1536_226 = arith.constant 1536 : index
    %c0_227 = arith.constant 0 : index
    %436 = vector.load %arg21[%c0_225, %c1536_226, %c0_227] : memref<2x2048x32xbf16, #tpu.memory_space<vmem>>, vector<1x256x32xbf16>
    %437 = vector.shape_cast %436 : vector<1x256x32xbf16> to vector<256x32xbf16>
    %cst_228 = arith.constant dense<0.000000e+00> : vector<16x32xf32>
    %438 = tpu.matmul %435, %437, %cst_228 {dimension_numbers = #tpu.dot_dimension_numbers<[1], [0], [0], [1], [0, 0, 1, 1], [], []>} : vector<16x256xbf16>, vector<256x32xbf16>, vector<16x32xf32> -> vector<16x32xf32>
    %439 = arith.addf %425, %438 : vector<16x32xf32>
    %c0_229 = arith.constant 0 : index
    %c0_230 = arith.constant 0 : index
    %c1792 = arith.constant 1792 : index
    %440 = vector.load %arg19[%c0_229, %c0_230, %c1792] : memref<2x32x2048xbf16, #tpu.memory_space<vmem>>, vector<1x32x256xbf16>
    %441 = vector.shape_cast %440 : vector<1x32x256xbf16> to vector<32x256xbf16>
    %cst_231 = arith.constant dense<0.000000e+00> : vector<16x256xf32>
    %442 = tpu.matmul %340, %441, %cst_231 {dimension_numbers = #tpu.dot_dimension_numbers<[1], [0], [0], [1], [0, 0, 1, 1], [], []>} : vector<16x32xbf16>, vector<32x256xbf16>, vector<16x256xf32> -> vector<16x256xf32>
    %c0_232 = arith.constant 0 : index
    %c0_233 = arith.constant 0 : index
    %c1792_234 = arith.constant 1792 : index
    %443 = vector.load %arg20[%c0_232, %c0_233, %c1792_234] : memref<2x1x2048xf32, #tpu.memory_space<vmem>>, vector<1x1x256xf32>
    %444 = vector.shape_cast %443 : vector<1x1x256xf32> to vector<1x256xf32>
    %445 = vector.broadcast %444 : vector<1x256xf32> to vector<16x256xf32>
    %446 = arith.addf %442, %445 : vector<16x256xf32>
    %cst_235 = arith.constant 0.000000e+00 : f32
    %447 = vector.broadcast %cst_235 : f32 to vector<16x256xf32>
    %448 = arith.maximumf %446, %447 : vector<16x256xf32>
    %449 = arith.truncf %448 : vector<16x256xf32> to vector<16x256xbf16>
    %c0_236 = arith.constant 0 : index
    %c1792_237 = arith.constant 1792 : index
    %c0_238 = arith.constant 0 : index
    %450 = vector.load %arg21[%c0_236, %c1792_237, %c0_238] : memref<2x2048x32xbf16, #tpu.memory_space<vmem>>, vector<1x256x32xbf16>
    %451 = vector.shape_cast %450 : vector<1x256x32xbf16> to vector<256x32xbf16>
    %cst_239 = arith.constant dense<0.000000e+00> : vector<16x32xf32>
    %452 = tpu.matmul %449, %451, %cst_239 {dimension_numbers = #tpu.dot_dimension_numbers<[1], [0], [0], [1], [0, 0, 1, 1], [], []>} : vector<16x256xbf16>, vector<256x32xbf16>, vector<16x32xf32> -> vector<16x32xf32>
    %453 = arith.addf %439, %452 : vector<16x32xf32>
    %c0_240 = arith.constant 0 : index
    %c0_241 = arith.constant 0 : index
    %c0_242 = arith.constant 0 : index
    %454 = vector.load %arg22[%c0_240, %c0_241, %c0_242] : memref<2x1x32xf32, #tpu.memory_space<vmem>>, vector<1x1x32xf32>
    %455 = vector.shape_cast %454 : vector<1x1x32xf32> to vector<1x32xf32>
    %456 = vector.broadcast %455 : vector<1x32xf32> to vector<16x32xf32>
    %457 = arith.addf %453, %456 : vector<16x32xf32>
    %458 = arith.addf %339, %457 : vector<16x32xf32>
    %c0_243 = arith.constant 0 : index
    %c0_244 = arith.constant 0 : index
    %c0_245 = arith.constant 0 : index
    %459 = vector.load %arg17[%c0_243, %c0_244, %c0_245] : memref<2x1x32xf32, #tpu.memory_space<vmem>>, vector<1x1x32xf32>
    %460 = vector.shape_cast %459 : vector<1x1x32xf32> to vector<1x32xf32>
    %c0_246 = arith.constant 0 : index
    %c0_247 = arith.constant 0 : index
    %c0_248 = arith.constant 0 : index
    %461 = vector.load %arg18[%c0_246, %c0_247, %c0_248] : memref<2x1x32xf32, #tpu.memory_space<vmem>>, vector<1x1x32xf32>
    %462 = vector.shape_cast %461 : vector<1x1x32xf32> to vector<1x32xf32>
    %cst_249 = arith.constant dense<0.000000e+00> : vector<16xf32>
    %463 = vector.multi_reduction <add>, %458, %cst_249 [1] : vector<16x32xf32> to vector<16xf32>
    %464 = vector.shape_cast %463 : vector<16xf32> to vector<16x1xf32>
    %cst_250 = arith.constant 3.200000e+01 : f32
    %465 = vector.broadcast %cst_250 : f32 to vector<16x1xf32>
    %466 = arith.divf %464, %465 : vector<16x1xf32>
    %467 = vector.broadcast %466 : vector<16x1xf32> to vector<16x32xf32>
    %468 = arith.subf %458, %467 : vector<16x32xf32>
    %469 = arith.mulf %468, %468 : vector<16x32xf32>
    %cst_251 = arith.constant dense<0.000000e+00> : vector<16xf32>
    %470 = vector.multi_reduction <add>, %469, %cst_251 [1] : vector<16x32xf32> to vector<16xf32>
    %471 = vector.shape_cast %470 : vector<16xf32> to vector<16x1xf32>
    %cst_252 = arith.constant 3.200000e+01 : f32
    %472 = vector.broadcast %cst_252 : f32 to vector<16x1xf32>
    %473 = arith.divf %471, %472 : vector<16x1xf32>
    %cst_253 = arith.constant 9.99999974E-6 : f32
    %474 = vector.broadcast %cst_253 : f32 to vector<16x1xf32>
    %475 = arith.addf %473, %474 : vector<16x1xf32>
    %476 = math.rsqrt %475 : vector<16x1xf32>
    %477 = vector.broadcast %476 : vector<16x1xf32> to vector<16x32xf32>
    %478 = arith.mulf %468, %477 : vector<16x32xf32>
    %479 = vector.broadcast %460 : vector<1x32xf32> to vector<16x32xf32>
    %480 = arith.mulf %478, %479 : vector<16x32xf32>
    %481 = vector.broadcast %462 : vector<1x32xf32> to vector<16x32xf32>
    %482 = arith.addf %480, %481 : vector<16x32xf32>
    %c1_254 = arith.constant 1 : index
    %c0_255 = arith.constant 0 : index
    %c0_256 = arith.constant 0 : index
    %483 = vector.load %arg11[%c1_254, %c0_255, %c0_256] : memref<2x32x96xf32, #tpu.memory_space<vmem>>, vector<1x32x96xf32>
    %484 = vector.shape_cast %483 : vector<1x32x96xf32> to vector<32x96xf32>
    %cst_257 = arith.constant dense<0.000000e+00> : vector<16x96xf32>
    %485 = tpu.matmul %482, %484, %cst_257 {dimension_numbers = #tpu.dot_dimension_numbers<[1], [0], [0], [1], [0, 0, 1, 1], [], []>} : vector<16x32xf32>, vector<32x96xf32>, vector<16x96xf32> -> vector<16x96xf32>
    %c1_258 = arith.constant 1 : index
    %c0_259 = arith.constant 0 : index
    %c0_260 = arith.constant 0 : index
    %486 = vector.load %arg12[%c1_258, %c0_259, %c0_260] : memref<2x1x96xf32, #tpu.memory_space<vmem>>, vector<1x1x96xf32>
    %487 = vector.shape_cast %486 : vector<1x1x96xf32> to vector<1x96xf32>
    %488 = vector.broadcast %487 : vector<1x96xf32> to vector<16x96xf32>
    %489 = arith.addf %485, %488 : vector<16x96xf32>
    %490 = vector.extract_strided_slice %489 {offsets = [0, 0], sizes = [8, 96], strides = [1, 1]} : vector<16x96xf32> to vector<8x96xf32>
    %491 = vector.extract_strided_slice %112 {offsets = [0, 0], sizes = [1, 8], strides = [1, 1]} : vector<2x8xf32> to vector<1x8xf32>
    %cst_261 = arith.constant 0.000000e+00 : f32
    %492 = vector.broadcast %cst_261 : f32 to vector<8x32xf32>
    %493 = vector.extract_strided_slice %490 {offsets = [0, 0], sizes = [8, 8], strides = [1, 1]} : vector<8x96xf32> to vector<8x8xf32>
    %cst_262 = arith.constant 0.353553385 : f32
    %494 = vector.broadcast %cst_262 : f32 to vector<8x8xf32>
    %495 = arith.mulf %493, %494 : vector<8x8xf32>
    %496 = vector.extract_strided_slice %490 {offsets = [0, 32], sizes = [8, 8], strides = [1, 1]} : vector<8x96xf32> to vector<8x8xf32>
    %497 = vector.extract_strided_slice %490 {offsets = [0, 64], sizes = [8, 8], strides = [1, 1]} : vector<8x96xf32> to vector<8x8xf32>
    "tpu.trace_start"() <{level = 10 : i32, message = "qd,kd->qk"}> : () -> ()
    %cst_263 = arith.constant dense<0.000000e+00> : vector<8x8xf32>
    %498 = tpu.matmul %495, %496, %cst_263 {dimension_numbers = #tpu.dot_dimension_numbers<[1], [1], [0], [0], [0, 0, 1, 0], [], []>} : vector<8x8xf32>, vector<8x8xf32>, vector<8x8xf32> -> vector<8x8xf32>
    "tpu.trace_stop"() : () -> ()
    %499 = vector.broadcast %491 : vector<1x8xf32> to vector<8x8xf32>
    %500 = arith.addf %498, %499 : vector<8x8xf32>
    %cst_264 = arith.constant dense<0xFF800000> : vector<8xf32>
    %501 = vector.multi_reduction <maximumf>, %500, %cst_264 [1] : vector<8x8xf32> to vector<8xf32>
    %502 = vector.shape_cast %501 : vector<8xf32> to vector<8x1xf32>
    %503 = vector.broadcast %502 : vector<8x1xf32> to vector<8x8xf32>
    %504 = arith.subf %500, %503 : vector<8x8xf32>
    %505 = math.exp %504 : vector<8x8xf32>
    %cst_265 = arith.constant dense<0.000000e+00> : vector<8xf32>
    %506 = vector.multi_reduction <add>, %505, %cst_265 [1] : vector<8x8xf32> to vector<8xf32>
    %507 = vector.shape_cast %506 : vector<8xf32> to vector<8x1xf32>
    %508 = tpu.reciprocal %507 {approx = true} : vector<8x1xf32> -> vector<8x1xf32>
    %509 = vector.broadcast %508 : vector<8x1xf32> to vector<8x8xf32>
    %510 = arith.mulf %505, %509 : vector<8x8xf32>
    %cst_266 = arith.constant dense<0.000000e+00> : vector<8x8xf32>
    %511 = tpu.matmul %510, %497, %cst_266 {dimension_numbers = #tpu.dot_dimension_numbers<[1], [0], [0], [1], [0, 0, 1, 1], [], []>} : vector<8x8xf32>, vector<8x8xf32>, vector<8x8xf32> -> vector<8x8xf32>
    %c1_267 = arith.constant 1 : index
    %c0_268 = arith.constant 0 : index
    %c0_269 = arith.constant 0 : index
    %512 = vector.load %arg13[%c1_267, %c0_268, %c0_269] : memref<2x32x32xf32, #tpu.memory_space<vmem>>, vector<1x8x32xf32>
    %513 = vector.shape_cast %512 : vector<1x8x32xf32> to vector<8x32xf32>
    %cst_270 = arith.constant dense<0.000000e+00> : vector<8x32xf32>
    %514 = tpu.matmul %511, %513, %cst_270 {dimension_numbers = #tpu.dot_dimension_numbers<[1], [0], [0], [1], [0, 0, 1, 1], [], []>} : vector<8x8xf32>, vector<8x32xf32>, vector<8x32xf32> -> vector<8x32xf32>
    %515 = arith.addf %492, %514 : vector<8x32xf32>
    %516 = vector.extract_strided_slice %490 {offsets = [0, 8], sizes = [8, 8], strides = [1, 1]} : vector<8x96xf32> to vector<8x8xf32>
    %cst_271 = arith.constant 0.353553385 : f32
    %517 = vector.broadcast %cst_271 : f32 to vector<8x8xf32>
    %518 = arith.mulf %516, %517 : vector<8x8xf32>
    %519 = vector.extract_strided_slice %490 {offsets = [0, 40], sizes = [8, 8], strides = [1, 1]} : vector<8x96xf32> to vector<8x8xf32>
    %520 = vector.extract_strided_slice %490 {offsets = [0, 72], sizes = [8, 8], strides = [1, 1]} : vector<8x96xf32> to vector<8x8xf32>
    "tpu.trace_start"() <{level = 10 : i32, message = "qd,kd->qk"}> : () -> ()
    %cst_272 = arith.constant dense<0.000000e+00> : vector<8x8xf32>
    %521 = tpu.matmul %518, %519, %cst_272 {dimension_numbers = #tpu.dot_dimension_numbers<[1], [1], [0], [0], [0, 0, 1, 0], [], []>} : vector<8x8xf32>, vector<8x8xf32>, vector<8x8xf32> -> vector<8x8xf32>
    "tpu.trace_stop"() : () -> ()
    %522 = vector.broadcast %491 : vector<1x8xf32> to vector<8x8xf32>
    %523 = arith.addf %521, %522 : vector<8x8xf32>
    %cst_273 = arith.constant dense<0xFF800000> : vector<8xf32>
    %524 = vector.multi_reduction <maximumf>, %523, %cst_273 [1] : vector<8x8xf32> to vector<8xf32>
    %525 = vector.shape_cast %524 : vector<8xf32> to vector<8x1xf32>
    %526 = vector.broadcast %525 : vector<8x1xf32> to vector<8x8xf32>
    %527 = arith.subf %523, %526 : vector<8x8xf32>
    %528 = math.exp %527 : vector<8x8xf32>
    %cst_274 = arith.constant dense<0.000000e+00> : vector<8xf32>
    %529 = vector.multi_reduction <add>, %528, %cst_274 [1] : vector<8x8xf32> to vector<8xf32>
    %530 = vector.shape_cast %529 : vector<8xf32> to vector<8x1xf32>
    %531 = tpu.reciprocal %530 {approx = true} : vector<8x1xf32> -> vector<8x1xf32>
    %532 = vector.broadcast %531 : vector<8x1xf32> to vector<8x8xf32>
    %533 = arith.mulf %528, %532 : vector<8x8xf32>
    %cst_275 = arith.constant dense<0.000000e+00> : vector<8x8xf32>
    %534 = tpu.matmul %533, %520, %cst_275 {dimension_numbers = #tpu.dot_dimension_numbers<[1], [0], [0], [1], [0, 0, 1, 1], [], []>} : vector<8x8xf32>, vector<8x8xf32>, vector<8x8xf32> -> vector<8x8xf32>
    %c1_276 = arith.constant 1 : index
    %c8_277 = arith.constant 8 : index
    %c0_278 = arith.constant 0 : index
    %535 = vector.load %arg13[%c1_276, %c8_277, %c0_278] : memref<2x32x32xf32, #tpu.memory_space<vmem>>, vector<1x8x32xf32>
    %536 = vector.shape_cast %535 : vector<1x8x32xf32> to vector<8x32xf32>
    %cst_279 = arith.constant dense<0.000000e+00> : vector<8x32xf32>
    %537 = tpu.matmul %534, %536, %cst_279 {dimension_numbers = #tpu.dot_dimension_numbers<[1], [0], [0], [1], [0, 0, 1, 1], [], []>} : vector<8x8xf32>, vector<8x32xf32>, vector<8x32xf32> -> vector<8x32xf32>
    %538 = arith.addf %515, %537 : vector<8x32xf32>
    %539 = vector.extract_strided_slice %490 {offsets = [0, 16], sizes = [8, 8], strides = [1, 1]} : vector<8x96xf32> to vector<8x8xf32>
    %cst_280 = arith.constant 0.353553385 : f32
    %540 = vector.broadcast %cst_280 : f32 to vector<8x8xf32>
    %541 = arith.mulf %539, %540 : vector<8x8xf32>
    %542 = vector.extract_strided_slice %490 {offsets = [0, 48], sizes = [8, 8], strides = [1, 1]} : vector<8x96xf32> to vector<8x8xf32>
    %543 = vector.extract_strided_slice %490 {offsets = [0, 80], sizes = [8, 8], strides = [1, 1]} : vector<8x96xf32> to vector<8x8xf32>
    "tpu.trace_start"() <{level = 10 : i32, message = "qd,kd->qk"}> : () -> ()
    %cst_281 = arith.constant dense<0.000000e+00> : vector<8x8xf32>
    %544 = tpu.matmul %541, %542, %cst_281 {dimension_numbers = #tpu.dot_dimension_numbers<[1], [1], [0], [0], [0, 0, 1, 0], [], []>} : vector<8x8xf32>, vector<8x8xf32>, vector<8x8xf32> -> vector<8x8xf32>
    "tpu.trace_stop"() : () -> ()
    %545 = vector.broadcast %491 : vector<1x8xf32> to vector<8x8xf32>
    %546 = arith.addf %544, %545 : vector<8x8xf32>
    %cst_282 = arith.constant dense<0xFF800000> : vector<8xf32>
    %547 = vector.multi_reduction <maximumf>, %546, %cst_282 [1] : vector<8x8xf32> to vector<8xf32>
    %548 = vector.shape_cast %547 : vector<8xf32> to vector<8x1xf32>
    %549 = vector.broadcast %548 : vector<8x1xf32> to vector<8x8xf32>
    %550 = arith.subf %546, %549 : vector<8x8xf32>
    %551 = math.exp %550 : vector<8x8xf32>
    %cst_283 = arith.constant dense<0.000000e+00> : vector<8xf32>
    %552 = vector.multi_reduction <add>, %551, %cst_283 [1] : vector<8x8xf32> to vector<8xf32>
    %553 = vector.shape_cast %552 : vector<8xf32> to vector<8x1xf32>
    %554 = tpu.reciprocal %553 {approx = true} : vector<8x1xf32> -> vector<8x1xf32>
    %555 = vector.broadcast %554 : vector<8x1xf32> to vector<8x8xf32>
    %556 = arith.mulf %551, %555 : vector<8x8xf32>
    %cst_284 = arith.constant dense<0.000000e+00> : vector<8x8xf32>
    %557 = tpu.matmul %556, %543, %cst_284 {dimension_numbers = #tpu.dot_dimension_numbers<[1], [0], [0], [1], [0, 0, 1, 1], [], []>} : vector<8x8xf32>, vector<8x8xf32>, vector<8x8xf32> -> vector<8x8xf32>
    %c1_285 = arith.constant 1 : index
    %c16_286 = arith.constant 16 : index
    %c0_287 = arith.constant 0 : index
    %558 = vector.load %arg13[%c1_285, %c16_286, %c0_287] : memref<2x32x32xf32, #tpu.memory_space<vmem>>, vector<1x8x32xf32>
    %559 = vector.shape_cast %558 : vector<1x8x32xf32> to vector<8x32xf32>
    %cst_288 = arith.constant dense<0.000000e+00> : vector<8x32xf32>
    %560 = tpu.matmul %557, %559, %cst_288 {dimension_numbers = #tpu.dot_dimension_numbers<[1], [0], [0], [1], [0, 0, 1, 1], [], []>} : vector<8x8xf32>, vector<8x32xf32>, vector<8x32xf32> -> vector<8x32xf32>
    %561 = arith.addf %538, %560 : vector<8x32xf32>
    %562 = vector.extract_strided_slice %490 {offsets = [0, 24], sizes = [8, 8], strides = [1, 1]} : vector<8x96xf32> to vector<8x8xf32>
    %cst_289 = arith.constant 0.353553385 : f32
    %563 = vector.broadcast %cst_289 : f32 to vector<8x8xf32>
    %564 = arith.mulf %562, %563 : vector<8x8xf32>
    %565 = vector.extract_strided_slice %490 {offsets = [0, 56], sizes = [8, 8], strides = [1, 1]} : vector<8x96xf32> to vector<8x8xf32>
    %566 = vector.extract_strided_slice %490 {offsets = [0, 88], sizes = [8, 8], strides = [1, 1]} : vector<8x96xf32> to vector<8x8xf32>
    "tpu.trace_start"() <{level = 10 : i32, message = "qd,kd->qk"}> : () -> ()
    %cst_290 = arith.constant dense<0.000000e+00> : vector<8x8xf32>
    %567 = tpu.matmul %564, %565, %cst_290 {dimension_numbers = #tpu.dot_dimension_numbers<[1], [1], [0], [0], [0, 0, 1, 0], [], []>} : vector<8x8xf32>, vector<8x8xf32>, vector<8x8xf32> -> vector<8x8xf32>
    "tpu.trace_stop"() : () -> ()
    %568 = vector.broadcast %491 : vector<1x8xf32> to vector<8x8xf32>
    %569 = arith.addf %567, %568 : vector<8x8xf32>
    %cst_291 = arith.constant dense<0xFF800000> : vector<8xf32>
    %570 = vector.multi_reduction <maximumf>, %569, %cst_291 [1] : vector<8x8xf32> to vector<8xf32>
    %571 = vector.shape_cast %570 : vector<8xf32> to vector<8x1xf32>
    %572 = vector.broadcast %571 : vector<8x1xf32> to vector<8x8xf32>
    %573 = arith.subf %569, %572 : vector<8x8xf32>
    %574 = math.exp %573 : vector<8x8xf32>
    %cst_292 = arith.constant dense<0.000000e+00> : vector<8xf32>
    %575 = vector.multi_reduction <add>, %574, %cst_292 [1] : vector<8x8xf32> to vector<8xf32>
    %576 = vector.shape_cast %575 : vector<8xf32> to vector<8x1xf32>
    %577 = tpu.reciprocal %576 {approx = true} : vector<8x1xf32> -> vector<8x1xf32>
    %578 = vector.broadcast %577 : vector<8x1xf32> to vector<8x8xf32>
    %579 = arith.mulf %574, %578 : vector<8x8xf32>
    %cst_293 = arith.constant dense<0.000000e+00> : vector<8x8xf32>
    %580 = tpu.matmul %579, %566, %cst_293 {dimension_numbers = #tpu.dot_dimension_numbers<[1], [0], [0], [1], [0, 0, 1, 1], [], []>} : vector<8x8xf32>, vector<8x8xf32>, vector<8x8xf32> -> vector<8x8xf32>
    %c1_294 = arith.constant 1 : index
    %c24_295 = arith.constant 24 : index
    %c0_296 = arith.constant 0 : index
    %581 = vector.load %arg13[%c1_294, %c24_295, %c0_296] : memref<2x32x32xf32, #tpu.memory_space<vmem>>, vector<1x8x32xf32>
    %582 = vector.shape_cast %581 : vector<1x8x32xf32> to vector<8x32xf32>
    %cst_297 = arith.constant dense<0.000000e+00> : vector<8x32xf32>
    %583 = tpu.matmul %580, %582, %cst_297 {dimension_numbers = #tpu.dot_dimension_numbers<[1], [0], [0], [1], [0, 0, 1, 1], [], []>} : vector<8x8xf32>, vector<8x32xf32>, vector<8x32xf32> -> vector<8x32xf32>
    %584 = arith.addf %561, %583 : vector<8x32xf32>
    %585 = vector.extract_strided_slice %489 {offsets = [8, 0], sizes = [8, 96], strides = [1, 1]} : vector<16x96xf32> to vector<8x96xf32>
    %586 = vector.extract_strided_slice %112 {offsets = [1, 0], sizes = [1, 8], strides = [1, 1]} : vector<2x8xf32> to vector<1x8xf32>
    %cst_298 = arith.constant 0.000000e+00 : f32
    %587 = vector.broadcast %cst_298 : f32 to vector<8x32xf32>
    %588 = vector.extract_strided_slice %585 {offsets = [0, 0], sizes = [8, 8], strides = [1, 1]} : vector<8x96xf32> to vector<8x8xf32>
    %cst_299 = arith.constant 0.353553385 : f32
    %589 = vector.broadcast %cst_299 : f32 to vector<8x8xf32>
    %590 = arith.mulf %588, %589 : vector<8x8xf32>
    %591 = vector.extract_strided_slice %585 {offsets = [0, 32], sizes = [8, 8], strides = [1, 1]} : vector<8x96xf32> to vector<8x8xf32>
    %592 = vector.extract_strided_slice %585 {offsets = [0, 64], sizes = [8, 8], strides = [1, 1]} : vector<8x96xf32> to vector<8x8xf32>
    "tpu.trace_start"() <{level = 10 : i32, message = "qd,kd->qk"}> : () -> ()
    %cst_300 = arith.constant dense<0.000000e+00> : vector<8x8xf32>
    %593 = tpu.matmul %590, %591, %cst_300 {dimension_numbers = #tpu.dot_dimension_numbers<[1], [1], [0], [0], [0, 0, 1, 0], [], []>} : vector<8x8xf32>, vector<8x8xf32>, vector<8x8xf32> -> vector<8x8xf32>
    "tpu.trace_stop"() : () -> ()
    %594 = vector.broadcast %586 : vector<1x8xf32> to vector<8x8xf32>
    %595 = arith.addf %593, %594 : vector<8x8xf32>
    %cst_301 = arith.constant dense<0xFF800000> : vector<8xf32>
    %596 = vector.multi_reduction <maximumf>, %595, %cst_301 [1] : vector<8x8xf32> to vector<8xf32>
    %597 = vector.shape_cast %596 : vector<8xf32> to vector<8x1xf32>
    %598 = vector.broadcast %597 : vector<8x1xf32> to vector<8x8xf32>
    %599 = arith.subf %595, %598 : vector<8x8xf32>
    %600 = math.exp %599 : vector<8x8xf32>
    %cst_302 = arith.constant dense<0.000000e+00> : vector<8xf32>
    %601 = vector.multi_reduction <add>, %600, %cst_302 [1] : vector<8x8xf32> to vector<8xf32>
    %602 = vector.shape_cast %601 : vector<8xf32> to vector<8x1xf32>
    %603 = tpu.reciprocal %602 {approx = true} : vector<8x1xf32> -> vector<8x1xf32>
    %604 = vector.broadcast %603 : vector<8x1xf32> to vector<8x8xf32>
    %605 = arith.mulf %600, %604 : vector<8x8xf32>
    %cst_303 = arith.constant dense<0.000000e+00> : vector<8x8xf32>
    %606 = tpu.matmul %605, %592, %cst_303 {dimension_numbers = #tpu.dot_dimension_numbers<[1], [0], [0], [1], [0, 0, 1, 1], [], []>} : vector<8x8xf32>, vector<8x8xf32>, vector<8x8xf32> -> vector<8x8xf32>
    %c1_304 = arith.constant 1 : index
    %c0_305 = arith.constant 0 : index
    %c0_306 = arith.constant 0 : index
    %607 = vector.load %arg13[%c1_304, %c0_305, %c0_306] : memref<2x32x32xf32, #tpu.memory_space<vmem>>, vector<1x8x32xf32>
    %608 = vector.shape_cast %607 : vector<1x8x32xf32> to vector<8x32xf32>
    %cst_307 = arith.constant dense<0.000000e+00> : vector<8x32xf32>
    %609 = tpu.matmul %606, %608, %cst_307 {dimension_numbers = #tpu.dot_dimension_numbers<[1], [0], [0], [1], [0, 0, 1, 1], [], []>} : vector<8x8xf32>, vector<8x32xf32>, vector<8x32xf32> -> vector<8x32xf32>
    %610 = arith.addf %587, %609 : vector<8x32xf32>
    %611 = vector.extract_strided_slice %585 {offsets = [0, 8], sizes = [8, 8], strides = [1, 1]} : vector<8x96xf32> to vector<8x8xf32>
    %cst_308 = arith.constant 0.353553385 : f32
    %612 = vector.broadcast %cst_308 : f32 to vector<8x8xf32>
    %613 = arith.mulf %611, %612 : vector<8x8xf32>
    %614 = vector.extract_strided_slice %585 {offsets = [0, 40], sizes = [8, 8], strides = [1, 1]} : vector<8x96xf32> to vector<8x8xf32>
    %615 = vector.extract_strided_slice %585 {offsets = [0, 72], sizes = [8, 8], strides = [1, 1]} : vector<8x96xf32> to vector<8x8xf32>
    "tpu.trace_start"() <{level = 10 : i32, message = "qd,kd->qk"}> : () -> ()
    %cst_309 = arith.constant dense<0.000000e+00> : vector<8x8xf32>
    %616 = tpu.matmul %613, %614, %cst_309 {dimension_numbers = #tpu.dot_dimension_numbers<[1], [1], [0], [0], [0, 0, 1, 0], [], []>} : vector<8x8xf32>, vector<8x8xf32>, vector<8x8xf32> -> vector<8x8xf32>
    "tpu.trace_stop"() : () -> ()
    %617 = vector.broadcast %586 : vector<1x8xf32> to vector<8x8xf32>
    %618 = arith.addf %616, %617 : vector<8x8xf32>
    %cst_310 = arith.constant dense<0xFF800000> : vector<8xf32>
    %619 = vector.multi_reduction <maximumf>, %618, %cst_310 [1] : vector<8x8xf32> to vector<8xf32>
    %620 = vector.shape_cast %619 : vector<8xf32> to vector<8x1xf32>
    %621 = vector.broadcast %620 : vector<8x1xf32> to vector<8x8xf32>
    %622 = arith.subf %618, %621 : vector<8x8xf32>
    %623 = math.exp %622 : vector<8x8xf32>
    %cst_311 = arith.constant dense<0.000000e+00> : vector<8xf32>
    %624 = vector.multi_reduction <add>, %623, %cst_311 [1] : vector<8x8xf32> to vector<8xf32>
    %625 = vector.shape_cast %624 : vector<8xf32> to vector<8x1xf32>
    %626 = tpu.reciprocal %625 {approx = true} : vector<8x1xf32> -> vector<8x1xf32>
    %627 = vector.broadcast %626 : vector<8x1xf32> to vector<8x8xf32>
    %628 = arith.mulf %623, %627 : vector<8x8xf32>
    %cst_312 = arith.constant dense<0.000000e+00> : vector<8x8xf32>
    %629 = tpu.matmul %628, %615, %cst_312 {dimension_numbers = #tpu.dot_dimension_numbers<[1], [0], [0], [1], [0, 0, 1, 1], [], []>} : vector<8x8xf32>, vector<8x8xf32>, vector<8x8xf32> -> vector<8x8xf32>
    %c1_313 = arith.constant 1 : index
    %c8_314 = arith.constant 8 : index
    %c0_315 = arith.constant 0 : index
    %630 = vector.load %arg13[%c1_313, %c8_314, %c0_315] : memref<2x32x32xf32, #tpu.memory_space<vmem>>, vector<1x8x32xf32>
    %631 = vector.shape_cast %630 : vector<1x8x32xf32> to vector<8x32xf32>
    %cst_316 = arith.constant dense<0.000000e+00> : vector<8x32xf32>
    %632 = tpu.matmul %629, %631, %cst_316 {dimension_numbers = #tpu.dot_dimension_numbers<[1], [0], [0], [1], [0, 0, 1, 1], [], []>} : vector<8x8xf32>, vector<8x32xf32>, vector<8x32xf32> -> vector<8x32xf32>
    %633 = arith.addf %610, %632 : vector<8x32xf32>
    %634 = vector.extract_strided_slice %585 {offsets = [0, 16], sizes = [8, 8], strides = [1, 1]} : vector<8x96xf32> to vector<8x8xf32>
    %cst_317 = arith.constant 0.353553385 : f32
    %635 = vector.broadcast %cst_317 : f32 to vector<8x8xf32>
    %636 = arith.mulf %634, %635 : vector<8x8xf32>
    %637 = vector.extract_strided_slice %585 {offsets = [0, 48], sizes = [8, 8], strides = [1, 1]} : vector<8x96xf32> to vector<8x8xf32>
    %638 = vector.extract_strided_slice %585 {offsets = [0, 80], sizes = [8, 8], strides = [1, 1]} : vector<8x96xf32> to vector<8x8xf32>
    "tpu.trace_start"() <{level = 10 : i32, message = "qd,kd->qk"}> : () -> ()
    %cst_318 = arith.constant dense<0.000000e+00> : vector<8x8xf32>
    %639 = tpu.matmul %636, %637, %cst_318 {dimension_numbers = #tpu.dot_dimension_numbers<[1], [1], [0], [0], [0, 0, 1, 0], [], []>} : vector<8x8xf32>, vector<8x8xf32>, vector<8x8xf32> -> vector<8x8xf32>
    "tpu.trace_stop"() : () -> ()
    %640 = vector.broadcast %586 : vector<1x8xf32> to vector<8x8xf32>
    %641 = arith.addf %639, %640 : vector<8x8xf32>
    %cst_319 = arith.constant dense<0xFF800000> : vector<8xf32>
    %642 = vector.multi_reduction <maximumf>, %641, %cst_319 [1] : vector<8x8xf32> to vector<8xf32>
    %643 = vector.shape_cast %642 : vector<8xf32> to vector<8x1xf32>
    %644 = vector.broadcast %643 : vector<8x1xf32> to vector<8x8xf32>
    %645 = arith.subf %641, %644 : vector<8x8xf32>
    %646 = math.exp %645 : vector<8x8xf32>
    %cst_320 = arith.constant dense<0.000000e+00> : vector<8xf32>
    %647 = vector.multi_reduction <add>, %646, %cst_320 [1] : vector<8x8xf32> to vector<8xf32>
    %648 = vector.shape_cast %647 : vector<8xf32> to vector<8x1xf32>
    %649 = tpu.reciprocal %648 {approx = true} : vector<8x1xf32> -> vector<8x1xf32>
    %650 = vector.broadcast %649 : vector<8x1xf32> to vector<8x8xf32>
    %651 = arith.mulf %646, %650 : vector<8x8xf32>
    %cst_321 = arith.constant dense<0.000000e+00> : vector<8x8xf32>
    %652 = tpu.matmul %651, %638, %cst_321 {dimension_numbers = #tpu.dot_dimension_numbers<[1], [0], [0], [1], [0, 0, 1, 1], [], []>} : vector<8x8xf32>, vector<8x8xf32>, vector<8x8xf32> -> vector<8x8xf32>
    %c1_322 = arith.constant 1 : index
    %c16_323 = arith.constant 16 : index
    %c0_324 = arith.constant 0 : index
    %653 = vector.load %arg13[%c1_322, %c16_323, %c0_324] : memref<2x32x32xf32, #tpu.memory_space<vmem>>, vector<1x8x32xf32>
    %654 = vector.shape_cast %653 : vector<1x8x32xf32> to vector<8x32xf32>
    %cst_325 = arith.constant dense<0.000000e+00> : vector<8x32xf32>
    %655 = tpu.matmul %652, %654, %cst_325 {dimension_numbers = #tpu.dot_dimension_numbers<[1], [0], [0], [1], [0, 0, 1, 1], [], []>} : vector<8x8xf32>, vector<8x32xf32>, vector<8x32xf32> -> vector<8x32xf32>
    %656 = arith.addf %633, %655 : vector<8x32xf32>
    %657 = vector.extract_strided_slice %585 {offsets = [0, 24], sizes = [8, 8], strides = [1, 1]} : vector<8x96xf32> to vector<8x8xf32>
    %cst_326 = arith.constant 0.353553385 : f32
    %658 = vector.broadcast %cst_326 : f32 to vector<8x8xf32>
    %659 = arith.mulf %657, %658 : vector<8x8xf32>
    %660 = vector.extract_strided_slice %585 {offsets = [0, 56], sizes = [8, 8], strides = [1, 1]} : vector<8x96xf32> to vector<8x8xf32>
    %661 = vector.extract_strided_slice %585 {offsets = [0, 88], sizes = [8, 8], strides = [1, 1]} : vector<8x96xf32> to vector<8x8xf32>
    "tpu.trace_start"() <{level = 10 : i32, message = "qd,kd->qk"}> : () -> ()
    %cst_327 = arith.constant dense<0.000000e+00> : vector<8x8xf32>
    %662 = tpu.matmul %659, %660, %cst_327 {dimension_numbers = #tpu.dot_dimension_numbers<[1], [1], [0], [0], [0, 0, 1, 0], [], []>} : vector<8x8xf32>, vector<8x8xf32>, vector<8x8xf32> -> vector<8x8xf32>
    "tpu.trace_stop"() : () -> ()
    %663 = vector.broadcast %586 : vector<1x8xf32> to vector<8x8xf32>
    %664 = arith.addf %662, %663 : vector<8x8xf32>
    %cst_328 = arith.constant dense<0xFF800000> : vector<8xf32>
    %665 = vector.multi_reduction <maximumf>, %664, %cst_328 [1] : vector<8x8xf32> to vector<8xf32>
    %666 = vector.shape_cast %665 : vector<8xf32> to vector<8x1xf32>
    %667 = vector.broadcast %666 : vector<8x1xf32> to vector<8x8xf32>
    %668 = arith.subf %664, %667 : vector<8x8xf32>
    %669 = math.exp %668 : vector<8x8xf32>
    %cst_329 = arith.constant dense<0.000000e+00> : vector<8xf32>
    %670 = vector.multi_reduction <add>, %669, %cst_329 [1] : vector<8x8xf32> to vector<8xf32>
    %671 = vector.shape_cast %670 : vector<8xf32> to vector<8x1xf32>
    %672 = tpu.reciprocal %671 {approx = true} : vector<8x1xf32> -> vector<8x1xf32>
    %673 = vector.broadcast %672 : vector<8x1xf32> to vector<8x8xf32>
    %674 = arith.mulf %669, %673 : vector<8x8xf32>
    %cst_330 = arith.constant dense<0.000000e+00> : vector<8x8xf32>
    %675 = tpu.matmul %674, %661, %cst_330 {dimension_numbers = #tpu.dot_dimension_numbers<[1], [0], [0], [1], [0, 0, 1, 1], [], []>} : vector<8x8xf32>, vector<8x8xf32>, vector<8x8xf32> -> vector<8x8xf32>
    %c1_331 = arith.constant 1 : index
    %c24_332 = arith.constant 24 : index
    %c0_333 = arith.constant 0 : index
    %676 = vector.load %arg13[%c1_331, %c24_332, %c0_333] : memref<2x32x32xf32, #tpu.memory_space<vmem>>, vector<1x8x32xf32>
    %677 = vector.shape_cast %676 : vector<1x8x32xf32> to vector<8x32xf32>
    %cst_334 = arith.constant dense<0.000000e+00> : vector<8x32xf32>
    %678 = tpu.matmul %675, %677, %cst_334 {dimension_numbers = #tpu.dot_dimension_numbers<[1], [0], [0], [1], [0, 0, 1, 1], [], []>} : vector<8x8xf32>, vector<8x32xf32>, vector<8x32xf32> -> vector<8x32xf32>
    %679 = arith.addf %656, %678 : vector<8x32xf32>
    %680 = tpu.concatenate %584, %679 in 0 : vector<8x32xf32>, vector<8x32xf32> -> vector<16x32xf32>
    %c1_335 = arith.constant 1 : index
    %c0_336 = arith.constant 0 : index
    %c0_337 = arith.constant 0 : index
    %681 = vector.load %arg14[%c1_335, %c0_336, %c0_337] : memref<2x1x32xf32, #tpu.memory_space<vmem>>, vector<1x1x32xf32>
    %682 = vector.shape_cast %681 : vector<1x1x32xf32> to vector<1x32xf32>
    %683 = vector.broadcast %682 : vector<1x32xf32> to vector<16x32xf32>
    %684 = arith.addf %680, %683 : vector<16x32xf32>
    %685 = arith.addf %482, %684 : vector<16x32xf32>
    %c1_338 = arith.constant 1 : index
    %c0_339 = arith.constant 0 : index
    %c0_340 = arith.constant 0 : index
    %686 = vector.load %arg15[%c1_338, %c0_339, %c0_340] : memref<2x1x32xf32, #tpu.memory_space<vmem>>, vector<1x1x32xf32>
    %687 = vector.shape_cast %686 : vector<1x1x32xf32> to vector<1x32xf32>
    %c1_341 = arith.constant 1 : index
    %c0_342 = arith.constant 0 : index
    %c0_343 = arith.constant 0 : index
    %688 = vector.load %arg16[%c1_341, %c0_342, %c0_343] : memref<2x1x32xf32, #tpu.memory_space<vmem>>, vector<1x1x32xf32>
    %689 = vector.shape_cast %688 : vector<1x1x32xf32> to vector<1x32xf32>
    %cst_344 = arith.constant dense<0.000000e+00> : vector<16xf32>
    %690 = vector.multi_reduction <add>, %685, %cst_344 [1] : vector<16x32xf32> to vector<16xf32>
    %691 = vector.shape_cast %690 : vector<16xf32> to vector<16x1xf32>
    %cst_345 = arith.constant 3.200000e+01 : f32
    %692 = vector.broadcast %cst_345 : f32 to vector<16x1xf32>
    %693 = arith.divf %691, %692 : vector<16x1xf32>
    %694 = vector.broadcast %693 : vector<16x1xf32> to vector<16x32xf32>
    %695 = arith.subf %685, %694 : vector<16x32xf32>
    %696 = arith.mulf %695, %695 : vector<16x32xf32>
    %cst_346 = arith.constant dense<0.000000e+00> : vector<16xf32>
    %697 = vector.multi_reduction <add>, %696, %cst_346 [1] : vector<16x32xf32> to vector<16xf32>
    %698 = vector.shape_cast %697 : vector<16xf32> to vector<16x1xf32>
    %cst_347 = arith.constant 3.200000e+01 : f32
    %699 = vector.broadcast %cst_347 : f32 to vector<16x1xf32>
    %700 = arith.divf %698, %699 : vector<16x1xf32>
    %cst_348 = arith.constant 9.99999974E-6 : f32
    %701 = vector.broadcast %cst_348 : f32 to vector<16x1xf32>
    %702 = arith.addf %700, %701 : vector<16x1xf32>
    %703 = math.rsqrt %702 : vector<16x1xf32>
    %704 = vector.broadcast %703 : vector<16x1xf32> to vector<16x32xf32>
    %705 = arith.mulf %695, %704 : vector<16x32xf32>
    %706 = vector.broadcast %687 : vector<1x32xf32> to vector<16x32xf32>
    %707 = arith.mulf %705, %706 : vector<16x32xf32>
    %708 = vector.broadcast %689 : vector<1x32xf32> to vector<16x32xf32>
    %709 = arith.addf %707, %708 : vector<16x32xf32>
    %710 = arith.truncf %709 : vector<16x32xf32> to vector<16x32xbf16>
    %cst_349 = arith.constant 0.000000e+00 : f32
    %711 = vector.broadcast %cst_349 : f32 to vector<16x32xf32>
    %c1_350 = arith.constant 1 : index
    %c0_351 = arith.constant 0 : index
    %c0_352 = arith.constant 0 : index
    %712 = vector.load %arg19[%c1_350, %c0_351, %c0_352] : memref<2x32x2048xbf16, #tpu.memory_space<vmem>>, vector<1x32x256xbf16>
    %713 = vector.shape_cast %712 : vector<1x32x256xbf16> to vector<32x256xbf16>
    %cst_353 = arith.constant dense<0.000000e+00> : vector<16x256xf32>
    %714 = tpu.matmul %710, %713, %cst_353 {dimension_numbers = #tpu.dot_dimension_numbers<[1], [0], [0], [1], [0, 0, 1, 1], [], []>} : vector<16x32xbf16>, vector<32x256xbf16>, vector<16x256xf32> -> vector<16x256xf32>
    %c1_354 = arith.constant 1 : index
    %c0_355 = arith.constant 0 : index
    %c0_356 = arith.constant 0 : index
    %715 = vector.load %arg20[%c1_354, %c0_355, %c0_356] : memref<2x1x2048xf32, #tpu.memory_space<vmem>>, vector<1x1x256xf32>
    %716 = vector.shape_cast %715 : vector<1x1x256xf32> to vector<1x256xf32>
    %717 = vector.broadcast %716 : vector<1x256xf32> to vector<16x256xf32>
    %718 = arith.addf %714, %717 : vector<16x256xf32>
    %cst_357 = arith.constant 0.000000e+00 : f32
    %719 = vector.broadcast %cst_357 : f32 to vector<16x256xf32>
    %720 = arith.maximumf %718, %719 : vector<16x256xf32>
    %721 = arith.truncf %720 : vector<16x256xf32> to vector<16x256xbf16>
    %c1_358 = arith.constant 1 : index
    %c0_359 = arith.constant 0 : index
    %c0_360 = arith.constant 0 : index
    %722 = vector.load %arg21[%c1_358, %c0_359, %c0_360] : memref<2x2048x32xbf16, #tpu.memory_space<vmem>>, vector<1x256x32xbf16>
    %723 = vector.shape_cast %722 : vector<1x256x32xbf16> to vector<256x32xbf16>
    %cst_361 = arith.constant dense<0.000000e+00> : vector<16x32xf32>
    %724 = tpu.matmul %721, %723, %cst_361 {dimension_numbers = #tpu.dot_dimension_numbers<[1], [0], [0], [1], [0, 0, 1, 1], [], []>} : vector<16x256xbf16>, vector<256x32xbf16>, vector<16x32xf32> -> vector<16x32xf32>
    %725 = arith.addf %711, %724 : vector<16x32xf32>
    %c1_362 = arith.constant 1 : index
    %c0_363 = arith.constant 0 : index
    %c256_364 = arith.constant 256 : index
    %726 = vector.load %arg19[%c1_362, %c0_363, %c256_364] : memref<2x32x2048xbf16, #tpu.memory_space<vmem>>, vector<1x32x256xbf16>
    %727 = vector.shape_cast %726 : vector<1x32x256xbf16> to vector<32x256xbf16>
    %cst_365 = arith.constant dense<0.000000e+00> : vector<16x256xf32>
    %728 = tpu.matmul %710, %727, %cst_365 {dimension_numbers = #tpu.dot_dimension_numbers<[1], [0], [0], [1], [0, 0, 1, 1], [], []>} : vector<16x32xbf16>, vector<32x256xbf16>, vector<16x256xf32> -> vector<16x256xf32>
    %c1_366 = arith.constant 1 : index
    %c0_367 = arith.constant 0 : index
    %c256_368 = arith.constant 256 : index
    %729 = vector.load %arg20[%c1_366, %c0_367, %c256_368] : memref<2x1x2048xf32, #tpu.memory_space<vmem>>, vector<1x1x256xf32>
    %730 = vector.shape_cast %729 : vector<1x1x256xf32> to vector<1x256xf32>
    %731 = vector.broadcast %730 : vector<1x256xf32> to vector<16x256xf32>
    %732 = arith.addf %728, %731 : vector<16x256xf32>
    %cst_369 = arith.constant 0.000000e+00 : f32
    %733 = vector.broadcast %cst_369 : f32 to vector<16x256xf32>
    %734 = arith.maximumf %732, %733 : vector<16x256xf32>
    %735 = arith.truncf %734 : vector<16x256xf32> to vector<16x256xbf16>
    %c1_370 = arith.constant 1 : index
    %c256_371 = arith.constant 256 : index
    %c0_372 = arith.constant 0 : index
    %736 = vector.load %arg21[%c1_370, %c256_371, %c0_372] : memref<2x2048x32xbf16, #tpu.memory_space<vmem>>, vector<1x256x32xbf16>
    %737 = vector.shape_cast %736 : vector<1x256x32xbf16> to vector<256x32xbf16>
    %cst_373 = arith.constant dense<0.000000e+00> : vector<16x32xf32>
    %738 = tpu.matmul %735, %737, %cst_373 {dimension_numbers = #tpu.dot_dimension_numbers<[1], [0], [0], [1], [0, 0, 1, 1], [], []>} : vector<16x256xbf16>, vector<256x32xbf16>, vector<16x32xf32> -> vector<16x32xf32>
    %739 = arith.addf %725, %738 : vector<16x32xf32>
    %c1_374 = arith.constant 1 : index
    %c0_375 = arith.constant 0 : index
    %c512_376 = arith.constant 512 : index
    %740 = vector.load %arg19[%c1_374, %c0_375, %c512_376] : memref<2x32x2048xbf16, #tpu.memory_space<vmem>>, vector<1x32x256xbf16>
    %741 = vector.shape_cast %740 : vector<1x32x256xbf16> to vector<32x256xbf16>
    %cst_377 = arith.constant dense<0.000000e+00> : vector<16x256xf32>
    %742 = tpu.matmul %710, %741, %cst_377 {dimension_numbers = #tpu.dot_dimension_numbers<[1], [0], [0], [1], [0, 0, 1, 1], [], []>} : vector<16x32xbf16>, vector<32x256xbf16>, vector<16x256xf32> -> vector<16x256xf32>
    %c1_378 = arith.constant 1 : index
    %c0_379 = arith.constant 0 : index
    %c512_380 = arith.constant 512 : index
    %743 = vector.load %arg20[%c1_378, %c0_379, %c512_380] : memref<2x1x2048xf32, #tpu.memory_space<vmem>>, vector<1x1x256xf32>
    %744 = vector.shape_cast %743 : vector<1x1x256xf32> to vector<1x256xf32>
    %745 = vector.broadcast %744 : vector<1x256xf32> to vector<16x256xf32>
    %746 = arith.addf %742, %745 : vector<16x256xf32>
    %cst_381 = arith.constant 0.000000e+00 : f32
    %747 = vector.broadcast %cst_381 : f32 to vector<16x256xf32>
    %748 = arith.maximumf %746, %747 : vector<16x256xf32>
    %749 = arith.truncf %748 : vector<16x256xf32> to vector<16x256xbf16>
    %c1_382 = arith.constant 1 : index
    %c512_383 = arith.constant 512 : index
    %c0_384 = arith.constant 0 : index
    %750 = vector.load %arg21[%c1_382, %c512_383, %c0_384] : memref<2x2048x32xbf16, #tpu.memory_space<vmem>>, vector<1x256x32xbf16>
    %751 = vector.shape_cast %750 : vector<1x256x32xbf16> to vector<256x32xbf16>
    %cst_385 = arith.constant dense<0.000000e+00> : vector<16x32xf32>
    %752 = tpu.matmul %749, %751, %cst_385 {dimension_numbers = #tpu.dot_dimension_numbers<[1], [0], [0], [1], [0, 0, 1, 1], [], []>} : vector<16x256xbf16>, vector<256x32xbf16>, vector<16x32xf32> -> vector<16x32xf32>
    %753 = arith.addf %739, %752 : vector<16x32xf32>
    %c1_386 = arith.constant 1 : index
    %c0_387 = arith.constant 0 : index
    %c768_388 = arith.constant 768 : index
    %754 = vector.load %arg19[%c1_386, %c0_387, %c768_388] : memref<2x32x2048xbf16, #tpu.memory_space<vmem>>, vector<1x32x256xbf16>
    %755 = vector.shape_cast %754 : vector<1x32x256xbf16> to vector<32x256xbf16>
    %cst_389 = arith.constant dense<0.000000e+00> : vector<16x256xf32>
    %756 = tpu.matmul %710, %755, %cst_389 {dimension_numbers = #tpu.dot_dimension_numbers<[1], [0], [0], [1], [0, 0, 1, 1], [], []>} : vector<16x32xbf16>, vector<32x256xbf16>, vector<16x256xf32> -> vector<16x256xf32>
    %c1_390 = arith.constant 1 : index
    %c0_391 = arith.constant 0 : index
    %c768_392 = arith.constant 768 : index
    %757 = vector.load %arg20[%c1_390, %c0_391, %c768_392] : memref<2x1x2048xf32, #tpu.memory_space<vmem>>, vector<1x1x256xf32>
    %758 = vector.shape_cast %757 : vector<1x1x256xf32> to vector<1x256xf32>
    %759 = vector.broadcast %758 : vector<1x256xf32> to vector<16x256xf32>
    %760 = arith.addf %756, %759 : vector<16x256xf32>
    %cst_393 = arith.constant 0.000000e+00 : f32
    %761 = vector.broadcast %cst_393 : f32 to vector<16x256xf32>
    %762 = arith.maximumf %760, %761 : vector<16x256xf32>
    %763 = arith.truncf %762 : vector<16x256xf32> to vector<16x256xbf16>
    %c1_394 = arith.constant 1 : index
    %c768_395 = arith.constant 768 : index
    %c0_396 = arith.constant 0 : index
    %764 = vector.load %arg21[%c1_394, %c768_395, %c0_396] : memref<2x2048x32xbf16, #tpu.memory_space<vmem>>, vector<1x256x32xbf16>
    %765 = vector.shape_cast %764 : vector<1x256x32xbf16> to vector<256x32xbf16>
    %cst_397 = arith.constant dense<0.000000e+00> : vector<16x32xf32>
    %766 = tpu.matmul %763, %765, %cst_397 {dimension_numbers = #tpu.dot_dimension_numbers<[1], [0], [0], [1], [0, 0, 1, 1], [], []>} : vector<16x256xbf16>, vector<256x32xbf16>, vector<16x32xf32> -> vector<16x32xf32>
    %767 = arith.addf %753, %766 : vector<16x32xf32>
    %c1_398 = arith.constant 1 : index
    %c0_399 = arith.constant 0 : index
    %c1024_400 = arith.constant 1024 : index
    %768 = vector.load %arg19[%c1_398, %c0_399, %c1024_400] : memref<2x32x2048xbf16, #tpu.memory_space<vmem>>, vector<1x32x256xbf16>
    %769 = vector.shape_cast %768 : vector<1x32x256xbf16> to vector<32x256xbf16>
    %cst_401 = arith.constant dense<0.000000e+00> : vector<16x256xf32>
    %770 = tpu.matmul %710, %769, %cst_401 {dimension_numbers = #tpu.dot_dimension_numbers<[1], [0], [0], [1], [0, 0, 1, 1], [], []>} : vector<16x32xbf16>, vector<32x256xbf16>, vector<16x256xf32> -> vector<16x256xf32>
    %c1_402 = arith.constant 1 : index
    %c0_403 = arith.constant 0 : index
    %c1024_404 = arith.constant 1024 : index
    %771 = vector.load %arg20[%c1_402, %c0_403, %c1024_404] : memref<2x1x2048xf32, #tpu.memory_space<vmem>>, vector<1x1x256xf32>
    %772 = vector.shape_cast %771 : vector<1x1x256xf32> to vector<1x256xf32>
    %773 = vector.broadcast %772 : vector<1x256xf32> to vector<16x256xf32>
    %774 = arith.addf %770, %773 : vector<16x256xf32>
    %cst_405 = arith.constant 0.000000e+00 : f32
    %775 = vector.broadcast %cst_405 : f32 to vector<16x256xf32>
    %776 = arith.maximumf %774, %775 : vector<16x256xf32>
    %777 = arith.truncf %776 : vector<16x256xf32> to vector<16x256xbf16>
    %c1_406 = arith.constant 1 : index
    %c1024_407 = arith.constant 1024 : index
    %c0_408 = arith.constant 0 : index
    %778 = vector.load %arg21[%c1_406, %c1024_407, %c0_408] : memref<2x2048x32xbf16, #tpu.memory_space<vmem>>, vector<1x256x32xbf16>
    %779 = vector.shape_cast %778 : vector<1x256x32xbf16> to vector<256x32xbf16>
    %cst_409 = arith.constant dense<0.000000e+00> : vector<16x32xf32>
    %780 = tpu.matmul %777, %779, %cst_409 {dimension_numbers = #tpu.dot_dimension_numbers<[1], [0], [0], [1], [0, 0, 1, 1], [], []>} : vector<16x256xbf16>, vector<256x32xbf16>, vector<16x32xf32> -> vector<16x32xf32>
    %781 = arith.addf %767, %780 : vector<16x32xf32>
    %c1_410 = arith.constant 1 : index
    %c0_411 = arith.constant 0 : index
    %c1280_412 = arith.constant 1280 : index
    %782 = vector.load %arg19[%c1_410, %c0_411, %c1280_412] : memref<2x32x2048xbf16, #tpu.memory_space<vmem>>, vector<1x32x256xbf16>
    %783 = vector.shape_cast %782 : vector<1x32x256xbf16> to vector<32x256xbf16>
    %cst_413 = arith.constant dense<0.000000e+00> : vector<16x256xf32>
    %784 = tpu.matmul %710, %783, %cst_413 {dimension_numbers = #tpu.dot_dimension_numbers<[1], [0], [0], [1], [0, 0, 1, 1], [], []>} : vector<16x32xbf16>, vector<32x256xbf16>, vector<16x256xf32> -> vector<16x256xf32>
    %c1_414 = arith.constant 1 : index
    %c0_415 = arith.constant 0 : index
    %c1280_416 = arith.constant 1280 : index
    %785 = vector.load %arg20[%c1_414, %c0_415, %c1280_416] : memref<2x1x2048xf32, #tpu.memory_space<vmem>>, vector<1x1x256xf32>
    %786 = vector.shape_cast %785 : vector<1x1x256xf32> to vector<1x256xf32>
    %787 = vector.broadcast %786 : vector<1x256xf32> to vector<16x256xf32>
    %788 = arith.addf %784, %787 : vector<16x256xf32>
    %cst_417 = arith.constant 0.000000e+00 : f32
    %789 = vector.broadcast %cst_417 : f32 to vector<16x256xf32>
    %790 = arith.maximumf %788, %789 : vector<16x256xf32>
    %791 = arith.truncf %790 : vector<16x256xf32> to vector<16x256xbf16>
    %c1_418 = arith.constant 1 : index
    %c1280_419 = arith.constant 1280 : index
    %c0_420 = arith.constant 0 : index
    %792 = vector.load %arg21[%c1_418, %c1280_419, %c0_420] : memref<2x2048x32xbf16, #tpu.memory_space<vmem>>, vector<1x256x32xbf16>
    %793 = vector.shape_cast %792 : vector<1x256x32xbf16> to vector<256x32xbf16>
    %cst_421 = arith.constant dense<0.000000e+00> : vector<16x32xf32>
    %794 = tpu.matmul %791, %793, %cst_421 {dimension_numbers = #tpu.dot_dimension_numbers<[1], [0], [0], [1], [0, 0, 1, 1], [], []>} : vector<16x256xbf16>, vector<256x32xbf16>, vector<16x32xf32> -> vector<16x32xf32>
    %795 = arith.addf %781, %794 : vector<16x32xf32>
    %c1_422 = arith.constant 1 : index
    %c0_423 = arith.constant 0 : index
    %c1536_424 = arith.constant 1536 : index
    %796 = vector.load %arg19[%c1_422, %c0_423, %c1536_424] : memref<2x32x2048xbf16, #tpu.memory_space<vmem>>, vector<1x32x256xbf16>
    %797 = vector.shape_cast %796 : vector<1x32x256xbf16> to vector<32x256xbf16>
    %cst_425 = arith.constant dense<0.000000e+00> : vector<16x256xf32>
    %798 = tpu.matmul %710, %797, %cst_425 {dimension_numbers = #tpu.dot_dimension_numbers<[1], [0], [0], [1], [0, 0, 1, 1], [], []>} : vector<16x32xbf16>, vector<32x256xbf16>, vector<16x256xf32> -> vector<16x256xf32>
    %c1_426 = arith.constant 1 : index
    %c0_427 = arith.constant 0 : index
    %c1536_428 = arith.constant 1536 : index
    %799 = vector.load %arg20[%c1_426, %c0_427, %c1536_428] : memref<2x1x2048xf32, #tpu.memory_space<vmem>>, vector<1x1x256xf32>
    %800 = vector.shape_cast %799 : vector<1x1x256xf32> to vector<1x256xf32>
    %801 = vector.broadcast %800 : vector<1x256xf32> to vector<16x256xf32>
    %802 = arith.addf %798, %801 : vector<16x256xf32>
    %cst_429 = arith.constant 0.000000e+00 : f32
    %803 = vector.broadcast %cst_429 : f32 to vector<16x256xf32>
    %804 = arith.maximumf %802, %803 : vector<16x256xf32>
    %805 = arith.truncf %804 : vector<16x256xf32> to vector<16x256xbf16>
    %c1_430 = arith.constant 1 : index
    %c1536_431 = arith.constant 1536 : index
    %c0_432 = arith.constant 0 : index
    %806 = vector.load %arg21[%c1_430, %c1536_431, %c0_432] : memref<2x2048x32xbf16, #tpu.memory_space<vmem>>, vector<1x256x32xbf16>
    %807 = vector.shape_cast %806 : vector<1x256x32xbf16> to vector<256x32xbf16>
    %cst_433 = arith.constant dense<0.000000e+00> : vector<16x32xf32>
    %808 = tpu.matmul %805, %807, %cst_433 {dimension_numbers = #tpu.dot_dimension_numbers<[1], [0], [0], [1], [0, 0, 1, 1], [], []>} : vector<16x256xbf16>, vector<256x32xbf16>, vector<16x32xf32> -> vector<16x32xf32>
    %809 = arith.addf %795, %808 : vector<16x32xf32>
    %c1_434 = arith.constant 1 : index
    %c0_435 = arith.constant 0 : index
    %c1792_436 = arith.constant 1792 : index
    %810 = vector.load %arg19[%c1_434, %c0_435, %c1792_436] : memref<2x32x2048xbf16, #tpu.memory_space<vmem>>, vector<1x32x256xbf16>
    %811 = vector.shape_cast %810 : vector<1x32x256xbf16> to vector<32x256xbf16>
    %cst_437 = arith.constant dense<0.000000e+00> : vector<16x256xf32>
    %812 = tpu.matmul %710, %811, %cst_437 {dimension_numbers = #tpu.dot_dimension_numbers<[1], [0], [0], [1], [0, 0, 1, 1], [], []>} : vector<16x32xbf16>, vector<32x256xbf16>, vector<16x256xf32> -> vector<16x256xf32>
    %c1_438 = arith.constant 1 : index
    %c0_439 = arith.constant 0 : index
    %c1792_440 = arith.constant 1792 : index
    %813 = vector.load %arg20[%c1_438, %c0_439, %c1792_440] : memref<2x1x2048xf32, #tpu.memory_space<vmem>>, vector<1x1x256xf32>
    %814 = vector.shape_cast %813 : vector<1x1x256xf32> to vector<1x256xf32>
    %815 = vector.broadcast %814 : vector<1x256xf32> to vector<16x256xf32>
    %816 = arith.addf %812, %815 : vector<16x256xf32>
    %cst_441 = arith.constant 0.000000e+00 : f32
    %817 = vector.broadcast %cst_441 : f32 to vector<16x256xf32>
    %818 = arith.maximumf %816, %817 : vector<16x256xf32>
    %819 = arith.truncf %818 : vector<16x256xf32> to vector<16x256xbf16>
    %c1_442 = arith.constant 1 : index
    %c1792_443 = arith.constant 1792 : index
    %c0_444 = arith.constant 0 : index
    %820 = vector.load %arg21[%c1_442, %c1792_443, %c0_444] : memref<2x2048x32xbf16, #tpu.memory_space<vmem>>, vector<1x256x32xbf16>
    %821 = vector.shape_cast %820 : vector<1x256x32xbf16> to vector<256x32xbf16>
    %cst_445 = arith.constant dense<0.000000e+00> : vector<16x32xf32>
    %822 = tpu.matmul %819, %821, %cst_445 {dimension_numbers = #tpu.dot_dimension_numbers<[1], [0], [0], [1], [0, 0, 1, 1], [], []>} : vector<16x256xbf16>, vector<256x32xbf16>, vector<16x32xf32> -> vector<16x32xf32>
    %823 = arith.addf %809, %822 : vector<16x32xf32>
    %c1_446 = arith.constant 1 : index
    %c0_447 = arith.constant 0 : index
    %c0_448 = arith.constant 0 : index
    %824 = vector.load %arg22[%c1_446, %c0_447, %c0_448] : memref<2x1x32xf32, #tpu.memory_space<vmem>>, vector<1x1x32xf32>
    %825 = vector.shape_cast %824 : vector<1x1x32xf32> to vector<1x32xf32>
    %826 = vector.broadcast %825 : vector<1x32xf32> to vector<16x32xf32>
    %827 = arith.addf %823, %826 : vector<16x32xf32>
    %828 = arith.addf %709, %827 : vector<16x32xf32>
    %c1_449 = arith.constant 1 : index
    %c0_450 = arith.constant 0 : index
    %c0_451 = arith.constant 0 : index
    %829 = vector.load %arg17[%c1_449, %c0_450, %c0_451] : memref<2x1x32xf32, #tpu.memory_space<vmem>>, vector<1x1x32xf32>
    %830 = vector.shape_cast %829 : vector<1x1x32xf32> to vector<1x32xf32>
    %c1_452 = arith.constant 1 : index
    %c0_453 = arith.constant 0 : index
    %c0_454 = arith.constant 0 : index
    %831 = vector.load %arg18[%c1_452, %c0_453, %c0_454] : memref<2x1x32xf32, #tpu.memory_space<vmem>>, vector<1x1x32xf32>
    %832 = vector.shape_cast %831 : vector<1x1x32xf32> to vector<1x32xf32>
    %cst_455 = arith.constant dense<0.000000e+00> : vector<16xf32>
    %833 = vector.multi_reduction <add>, %828, %cst_455 [1] : vector<16x32xf32> to vector<16xf32>
    %834 = vector.shape_cast %833 : vector<16xf32> to vector<16x1xf32>
    %cst_456 = arith.constant 3.200000e+01 : f32
    %835 = vector.broadcast %cst_456 : f32 to vector<16x1xf32>
    %836 = arith.divf %834, %835 : vector<16x1xf32>
    %837 = vector.broadcast %836 : vector<16x1xf32> to vector<16x32xf32>
    %838 = arith.subf %828, %837 : vector<16x32xf32>
    %839 = arith.mulf %838, %838 : vector<16x32xf32>
    %cst_457 = arith.constant dense<0.000000e+00> : vector<16xf32>
    %840 = vector.multi_reduction <add>, %839, %cst_457 [1] : vector<16x32xf32> to vector<16xf32>
    %841 = vector.shape_cast %840 : vector<16xf32> to vector<16x1xf32>
    %cst_458 = arith.constant 3.200000e+01 : f32
    %842 = vector.broadcast %cst_458 : f32 to vector<16x1xf32>
    %843 = arith.divf %841, %842 : vector<16x1xf32>
    %cst_459 = arith.constant 9.99999974E-6 : f32
    %844 = vector.broadcast %cst_459 : f32 to vector<16x1xf32>
    %845 = arith.addf %843, %844 : vector<16x1xf32>
    %846 = math.rsqrt %845 : vector<16x1xf32>
    %847 = vector.broadcast %846 : vector<16x1xf32> to vector<16x32xf32>
    %848 = arith.mulf %838, %847 : vector<16x32xf32>
    %849 = vector.broadcast %830 : vector<1x32xf32> to vector<16x32xf32>
    %850 = arith.mulf %848, %849 : vector<16x32xf32>
    %851 = vector.broadcast %832 : vector<1x32xf32> to vector<16x32xf32>
    %852 = arith.addf %850, %851 : vector<16x32xf32>
    %c0_460 = arith.constant 0 : index
    %c0_461 = arith.constant 0 : index
    %853 = vector.load %arg23[%c0_460, %c0_461] : memref<32x128xf32, #tpu.memory_space<vmem>>, vector<32x128xf32>
    %cst_462 = arith.constant dense<0.000000e+00> : vector<16x128xf32>
    %854 = tpu.matmul %852, %853, %cst_462 {dimension_numbers = #tpu.dot_dimension_numbers<[1], [0], [0], [1], [0, 0, 1, 1], [], []>} : vector<16x32xf32>, vector<32x128xf32>, vector<16x128xf32> -> vector<16x128xf32>
    %c0_463 = arith.constant 0 : index
    %c0_464 = arith.constant 0 : index
    %855 = vector.load %arg24[%c0_463, %c0_464] : memref<1x128xf32, #tpu.memory_space<vmem>>, vector<1x128xf32>
    %856 = vector.broadcast %855 : vector<1x128xf32> to vector<16x128xf32>
    %857 = arith.addf %854, %856 : vector<16x128xf32>
    %c0_465 = arith.constant 0 : index
    %c0_466 = arith.constant 0 : index
    %858 = vector.load %arg3[%c0_465, %c0_466] : memref<16x1xf32, #tpu.memory_space<vmem>>, vector<16x1xf32>
    %859 = vector.broadcast %858 : vector<16x1xf32> to vector<16x128xf32>
    %860 = arith.mulf %857, %859 : vector<16x128xf32>
    %c0_467 = arith.constant 0 : index
    %c0_468 = arith.constant 0 : index
    %861 = vector.load %arg25[%c0_467, %c0_468] : memref<16x128xf32, #tpu.memory_space<vmem>>, vector<16x128xf32>
    tpu.vector_store %arg25[%c0_467, %c0_468], %860 {strides = array<i32>} : memref<16x128xf32, #tpu.memory_space<vmem>>, vector<16x128xf32>,
    return
  }
}

</mosaic_0001>

<bundles_post_ra>
// kernel: tile.0
= control target key start
LH: loop header
LB: loop body
LE: loop exit
PB: predicated region body
PF: predicated region fallthrough
CT: control target
= control target key end

     0   :  { %s67_s8 = smov 125   ;;  %vm8_vm0 = vcmask 7168   ;;  %s68_s11 = smov 126   ;;  %s118_s0 = inlined_call_operand.vmem [shape: s32[2,8], index: 0, kind: input, shape index: {}]   ;;  %s119_s1 = inlined_call_operand.vmem [shape: s32[16,1], index: 1, kind: output, shape index: {}]  }
   0x1   :  { %v5_v0 = vld [vmem:[%s118_s0] sm:$0x3]  ;;  %s66_s0 = smov 127   ;;  %s69_s12 = smov 124  }
   0x2   :  { %6 = vst [vmem:[#allocation0] sm:$0x3] %v5_v0  ;;  %s70_s13 = smov 123   ;;  %s71_s14 = smov 122  }
   0x3   :  { %s72_s15 = smov 121  }
   0x9   :  { %v10_v1 = vld [vmem:[#allocation0] sm:$0x3]  }
   0xa   :  { %v22_v2 = vld [vmem:[#allocation0] sm:$0x3]   ;;  %11 = vrot.lane.b32.xlu0 %v10_v1, %s66_s0 }
   0xb   :  { %23 = vrot.lane.b32.xlu1 %v22_v2, %s67_s8  ;;  %v16_v3 = vld [vmem:[#allocation0] sm:$0x3]  }
   0xc   :  { %v28_v4 = vld [vmem:[#allocation0] sm:$0x3]  }
   0xd   :  { %v7_v5 = vld [vmem:[#allocation0] sm:$0x3]  }
   0xe   :  { %9 = vst.msk [vmem:[%s119_s1] ss:$8 sm:$0x3] %vm8_vm0, %v7_v5   ;;  %17 = vrot.lane.b32.xlu0 %v16_v3, %s68_s11  ;;  %v34_v6 = vld [vmem:[#allocation0] sm:$0x3]  }
   0xf   :  { %29 = vrot.lane.b32.xlu1 %v28_v4, %s69_s12  ;;  %v40_v7 = vld [vmem:[#allocation0] sm:$0x3]  }
  0x10   :  { %v46_v8 = vld [vmem:[#allocation0] sm:$0x3]  }
  0x12   :  { %35 = vrot.lane.b32.xlu0 %v34_v6, %s70_s13 }
  0x13   :  { %41 = vrot.lane.b32.xlu1 %v40_v7, %s71_s14 }
  0x16   :  { %47 = vrot.lane.b32.xlu0 %v46_v8, %s72_s15 }
  0x7c   :  { %v12_v9 = vpop.permute.xlu0 %11  }
  0x7d   :  { %v24_v10 = vpop.permute.xlu1 %23   ;;  %52 = vst.msk [vmem:[%s119_s1 + $0x1] ss:$8 sm:$0x3] %vm8_vm0, %v12_v9  }
  0x7e   :  { %54 = vst.msk [vmem:[%s119_s1 + $0x3] ss:$8 sm:$0x3] %vm8_vm0, %v24_v10  }
  0x80   :  { %v18_v11 = vpop.permute.xlu0 %17  }
  0x81   :  { %v30_v12 = vpop.permute.xlu1 %29   ;;  %53 = vst.msk [vmem:[%s119_s1 + $0x2] ss:$8 sm:$0x3] %vm8_vm0, %v18_v11  }
  0x82   :  { %55 = vst.msk [vmem:[%s119_s1 + $0x4] ss:$8 sm:$0x3] %vm8_vm0, %v30_v12  }
  0x84   :  { %v36_v13 = vpop.permute.xlu0 %35  }
  0x85   :  { %v42_v14 = vpop.permute.xlu1 %41   ;;  %56 = vst.msk [vmem:[%s119_s1 + $0x5] ss:$8 sm:$0x3] %vm8_vm0, %v36_v13  }
  0x86   :  { %57 = vst.msk [vmem:[%s119_s1 + $0x6] ss:$8 sm:$0x3] %vm8_vm0, %v42_v14  }
  0x88   :  { %v48_v15 = vpop.permute.xlu0 %47  }
  0x89   :  { %58 = vst.msk [vmem:[%s119_s1 + $0x7] ss:$8 sm:$0x3] %vm8_vm0, %v48_v15  }

// kernel: protein_denoiser_forward.1
= control target key start
LH: loop header
LB: loop body
LE: loop exit
PB: predicated region body
PF: predicated region fallthrough
CT: control target
= control target key end

     0   :  { %s13439_s0 = inlined_call_operand.vmem [shape: f32[2,8,32], index: 0, kind: input, shape index: {}]   ;;  %s13440_s1 = inlined_call_operand.vmem [shape: f32[2,32], index: 1, kind: input, shape index: {}]   ;;  %s13441_s2 = inlined_call_operand.vmem [shape: f32[2,8], index: 2, kind: input, shape index: {}]   ;;  %s13442_s3 = inlined_call_operand.vmem [shape: f32[16,1], index: 3, kind: input, shape index: {}]   ;;  %s13443_s4 = inlined_call_operand.vmem [shape: s32[16,1], index: 4, kind: input, shape index: {}]   ;;  %s13444_s5 = inlined_call_operand.vmem [shape: f32[32,32], index: 5, kind: input, shape index: {}]   ;;  %s13445_s6 = inlined_call_operand.vmem [shape: f32[1,32], index: 6, kind: input, shape index: {}]   ;;  %s13446_s7 = inlined_call_operand.vmem [shape: f32[32,32], index: 7, kind: input, shape index: {}]   ;;  %s13447_s8 = inlined_call_operand.vmem [shape: f32[1,32], index: 8, kind: input, shape index: {}]   ;;  %s13448_s9 = inlined_call_operand.vmem [shape: f32[5,32,64], index: 9, kind: input, shape index: {}]   ;;  %s13449_s10 = inlined_call_operand.vmem [shape: f32[1,64], index: 10, kind: input, shape index: {}]   ;;  %s13450_s11 = inlined_call_operand.vmem [shape: f32[2,32,96], index: 11, kind: input, shape index: {}]   ;;  %s13451_s12 = inlined_call_operand.vmem [shape: f32[2,1,96], index: 12, kind: input, shape index: {}]   ;;  %s13452_s13 = inlined_call_operand.vmem [shape: f32[2,32,32], index: 13, kind: input, shape index: {}]   ;;  %s13453_s14 = inlined_call_operand.vmem [shape: f32[2,1,32], index: 14, kind: input, shape index: {}]   ;;  %s13454_s15 = inlined_call_operand.vmem [shape: f32[2,1,32], index: 15, kind: input, shape index: {}]   ;;  %s13455_s16 = inlined_call_operand.vmem [shape: f32[2,1,32], index: 16, kind: input, shape index: {}]   ;;  %s13456_s17 = inlined_call_operand.vmem [shape: f32[2,1,32], index: 17, kind: input, shape index: {}]   ;;  %s13457_s18 = inlined_call_operand.vmem [shape: f32[2,1,32], index: 18, kind: input, shape index: {}]   ;;  %s13458_s19 = inlined_call_operand.vmem [shape: bf16[2,32,2048], index: 19, kind: input, shape index: {}]   ;;  %s13459_s20 = inlined_call_operand.vmem [shape: f32[2,1,2048], index: 20, kind: input, shape index: {}]   ;;  %s13460_s21 = inlined_call_operand.vmem [shape: bf16[2,2048,32], index: 21, kind: input, shape index: {}]   ;;  %s13461_s22 = inlined_call_operand.vmem [shape: f32[2,1,32], index: 22, kind: input, shape index: {}]   ;;  %s13462_s23 = inlined_call_operand.vmem [shape: f32[32,128], index: 23, kind: input, shape index: {}]   ;;  %s13463_s24 = inlined_call_operand.vmem [shape: f32[1,128], index: 24, kind: input, shape index: {}]   ;;  %s13464_s25 = inlined_call_operand.hbm [shape: f32[16,128], index: 25, kind: output, shape index: {}]  }
   0x1   :  { %13484 = sst [smem:[#allocation5_spill]] %s13439_s0 }
   0x2   :  { %13485 = sst [smem:[#allocation6_spill]] %s13440_s1 }
   0x3   :  { %13486 = sst [smem:[#allocation7_spill]] %s13441_s2 }
   0x4   :  { %13487 = sst [smem:[#allocation8_spill]] %s13442_s3 }
   0x5   :  { %13488 = sst [smem:[#allocation9_spill]] %s13443_s4 }
   0x6   :  { %13489 = sst [smem:[#allocation10_spill]] %s13444_s5 }
   0x7   :  { %13490 = sst [smem:[#allocation11_spill]] %s13445_s6 }
   0x8   :  { %13491 = sst [smem:[#allocation12_spill]] %s13446_s7 }
   0x9   :  { %13492 = sst [smem:[#allocation13_spill]] %s13447_s8 }
   0xa   :  { %13493 = sst [smem:[#allocation14_spill]] %s13448_s9 }
   0xb   :  { %s13494_s6 = sld [smem:[#allocation10_spill]]  ;;  %v11310_v1 = vmov 0.0   ;;  %vm13471_vm0 = vmmov 0   ;;  %vm13473_vm1 = vcmask 261120   ;;  %v11312_v12 = vmov 0  }
   0xc   :  { %10583 = vmatprep.subr.mxu0 %v11310_v1  ;;  %10591 = vmatprep.mubr.msk.f32.mxu0 %vm13471_vm0, %v11310_v1  ;;  %s13495_s1 = sld [smem:[#allocation12_spill]] }
   0xd   :  { %10594 = vmatprep.subr.mxu1 %v11310_v1  ;;  %s13496_s0 = sld [smem:[#allocation6_spill]]  ;;  %10602 = vmatprep.mubr.msk.f32.mxu1 %vm13471_vm0, %v11310_v1 }
   0xe   :  { %s13497_s27 = sld [smem:[#allocation9_spill]]  ;;  %10950 = vset.pattern.permute.xlu0 %v11312_v12  ;;  %10951 = vset.pattern.permute.xlu1 %v11312_v12 }
  0x11   :  { %v86_v0 = vld [vmem:[%s13494_s6 + $0x18] sm:$0xff]  ;;  %v85_v2 = vld [vmem:[%s13494_s6 + $0x10] sm:$0xff]  ;;  %v84_v4 = vld [vmem:[%s13494_s6 + $0x8] sm:$0xff] }
  0x12   :  { %v172_v3 = vld [vmem:[%s13495_s1 + $0x18] sm:$0xff]  ;;  %10584 = vmatpush3.msra.mxu0 %v86_v0  ;;  %v83_v5 = vld [vmem:[%s13494_s6] sm:$0xff]  ;;  %v171_v7 = vld [vmem:[%s13495_s1 + $0x10] sm:$0xff] }
  0x13   :  { %10585 = vmatprep.subr.mxu0 %v11310_v1  ;;  %10595 = vmatpush3.msra.mxu1 %v172_v3  ;;  %v82_v6 = vld [vmem:[%s13496_s0] sm:$0x3]  ;;  %v170_v8 = vld [vmem:[%s13495_s1 + $0x8] sm:$0xff] }
  0x14   :  { %10586 = vmatpush3.msra.mxu0 %v85_v2  ;;  %10596 = vmatprep.subr.mxu1 %v11310_v1  ;;  %v169_v9 = vld [vmem:[%s13495_s1] sm:$0xff]  ;;  %v267_v11 = vld [vmem:[%s13497_s27 + $0x8] sm:$0xff] }
  0x15   :  { %10587 = vmatprep.subr.mxu0 %v11310_v1  ;;  %10597 = vmatpush3.msra.mxu1 %v171_v7  ;;  %v266_v10 = vld [vmem:[%s13497_s27] sm:$0xff]  ;;  %v305_v15 = vadd.s32 4294967295, %v267_v11  ;;  %v276_v16 = vadd.s32 4294967294, %v267_v11  ;;  %v585_v18 = vadd.s32 1, %v267_v11  ;;  %v698_v20 = vadd.s32 2, %v267_v11 }
  0x16   :  { %10588 = vmatpush3.msra.mxu0 %v84_v4  ;;  %10598 = vmatprep.subr.mxu1 %v11310_v1  ;;  %v304_v13 = vadd.s32 4294967295, %v266_v10  ;;  %v275_v14 = vadd.s32 4294967294, %v266_v10  ;;  %v584_v17 = vadd.s32 1, %v266_v10  ;;  %v697_v19 = vadd.s32 2, %v266_v10 }
  0x17   :  { %10589 = vmatprep.subr.mxu0 %v11310_v1  ;;  %10599 = vmatpush3.msra.mxu1 %v170_v8  ;;  %vm307_vm7 = vcmp.ge.s32.totalorder %v305_v15, 0  ;;  %vm309_vm8 = vcmp.lt.s32.totalorder %v305_v15, 8  ;;  %vm278_vm9 = vcmp.ge.s32.totalorder %v276_v16, 0  ;;  %vm280_vm10 = vcmp.lt.s32.totalorder %v276_v16, 8 }
  0x18   :  { %10590 = vmatpush3.msra.mxu0 %v83_v5  ;;  %10600 = vmatprep.subr.mxu1 %v11310_v1  ;;  %vm306_vm2 = vcmp.ge.s32.totalorder %v304_v13, 0  ;;  %vm308_vm3 = vcmp.lt.s32.totalorder %v304_v13, 8  ;;  %vm277_vm4 = vcmp.ge.s32.totalorder %v275_v14, 0  ;;  %vm279_vm5 = vcmp.lt.s32.totalorder %v275_v14, 8  ;;  %vm311_vm14 = vmand %vm307_vm7, %vm309_vm8 }
  0x19   :  { %10592 = vmatmul.mubr.msk.f32.vlgmr.msra.gmra.mxu0 %vm13473_vm1, %v82_v6  ;;  %10601 = vmatpush3.msra.mxu1 %v169_v9  ;;  %vm310_vm6 = vmand %vm306_vm2, %vm308_vm3  ;;  %vm586_vm12 = vcmp.ge.s32.totalorder %v584_v17, 0  ;;  %vm588_vm13 = vcmp.lt.s32.totalorder %v584_v17, 8  ;;  %vm587_vm15 = vcmp.ge.s32.totalorder %v585_v18, 0  ;;  %vm589_vm0 = vcmp.lt.s32.totalorder %v585_v18, 8 }
  0x1a   :  { %v312_v21 = vsel %vm310_vm6, 1, %v11312_v12  ;;  %vm281_vm11 = vmand %vm277_vm4, %vm279_vm5  ;;  %v313_v23 = vsel %vm311_vm14, 1, %v11312_v12  ;;  %vm699_vm2 = vcmp.ge.s32.totalorder %v697_v19, 0  ;;  %vm701_vm3 = vcmp.lt.s32.totalorder %v697_v19, 8 }
  0x1b   :  { %315 = vperm.xlu0 %10950, %v312_v21   ;;  %v283_v22 = vsel %vm281_vm11, 1, %v11312_v12  ;;  %vm282_vm1 = vmand %vm278_vm9, %vm280_vm10  ;;  %vm700_vm6 = vcmp.ge.s32.totalorder %v698_v20, 0  ;;  %vm702_vm5 = vcmp.lt.s32.totalorder %v698_v20, 8 }
  0x1c   :  { %286 = vperm.xlu1 %10951, %v283_v22   ;;  %v284_v24 = vsel %vm282_vm1, 1, %v11312_v12  ;;  %vm590_vm4 = vmand %vm586_vm12, %vm588_vm13 }
  0x1d   :  { %vm591_vm11 = vmand %vm587_vm15, %vm589_vm0  ;;  %v592_v25 = vsel %vm590_vm4, 1, %v11312_v12 }
  0x1e   :  { %vm703_vm7 = vmand %vm699_vm2, %vm701_vm3  ;;  %v593_v26 = vsel %vm591_vm11, 1, %v11312_v12 }
  0x1f   :  { %318 = vperm.xlu0 %10950, %v313_v23   ;;  %vm704_vm8 = vmand %vm700_vm6, %vm702_vm5  ;;  %v705_v27 = vsel %vm703_vm7, 1, %v11312_v12 }
  0x20   :  { %289 = vperm.xlu1 %10951, %v284_v24   ;;  %v706_v28 = vsel %vm704_vm8, 1, %v11312_v12 }
  0x23   :  { %595 = vperm.xlu0 %10950, %v592_v25  }
  0x24   :  { %598 = vperm.xlu1 %10951, %v593_v26  }
  0x27   :  { %708 = vperm.xlu0 %10950, %v705_v27  }
  0x28   :  { %711 = vperm.xlu1 %10951, %v706_v28  }
  0x29   :  { %30 = vsyncpa [#allocation3], 0  ;;  %s13498_s5 = sld [smem:[#allocation11_spill]]  ;;  %vm13499_vm0 = vcmask 261120   ;;  %v254_v44 = vlaneseq  ;;  %s11313_s29 = smov 96  }
  0x2a   :  { %s13500_s2 = sld [smem:[#allocation14_spill]]  ;;  %vm13503_vm2 = vmmov %vm13499_vm0  ;;  %s11314_s26 = smov 88  }
  0x2b   :  { %v11547_v45 = vshrl.u32 %v254_v44, 7  ;;  %s13501_s27 = sld [smem:[#allocation13_spill]]  ;;  %vm13504_vm3 = vmmov %vm13499_vm0  ;;  %s11315_s8 = smov 120  }
  0x2c   :  { %s13502_s1 = sld [smem:[#allocation5_spill]]  ;;  %vm13505_vm6 = vmmov %vm13499_vm0  ;;  %s11318_s4 = smov 112  }
  0x2d   :  { %v11553_v47 = vsub.s32 0, %v11547_v45  ;;  %v11556_v48 = vsub.s32 1, %v11547_v45  ;;  %vm301_vm1 = vcmp.lt.s32.totalorder %v11547_v45, 1  ;;  %vm272_vm9 = vcmp.lt.s32.totalorder %v11547_v45, 2  ;;  %vm13506_vm4 = vmmov %vm13499_vm0  ;;  %s13515_s3 = sld [smem:[#allocation7_spill]]  ;;  %s13482_s28 = smov 80  }
  0x2e   :  { %vm581_vm15 = vcmp.lt.s32.totalorder %v11547_v45, 7  ;;  %vm13507_vm11 = vmmov %vm13499_vm0  ;;  %vm694_vm7 = vcmp.lt.s32.totalorder %v11547_v45, 6  ;;  %s13478_s6 = smov 104   ;;  %s13480_s30 = smov 48  }
  0x2f   :  { %v9309_v29 = vld [vmem:[%s13498_s5] ss:$0 sm:$0xff]  ;;  %vm13508_vm8 = vmmov %vm13499_vm0  ;;  %s13538_s9 = smov 40  }
  0x30   :  { %v9317_v34 = vld [vmem:[%s13500_s2 + $0x38] sm:$0xff]  ;;  %v9316_v36 = vld [vmem:[%s13500_s2 + $0x30] sm:$0xff]  ;;  %v9315_v38 = vld [vmem:[%s13500_s2 + $0x28] sm:$0xff] }
  0x31   :  { %v298_v35 = vld [vmem:[%s13500_s2 + $0x18] sm:$0xff]  ;;  %10605 = vmatprep.subr.mxu0 %v9317_v34  ;;  %v297_v37 = vld [vmem:[%s13500_s2 + $0x10] sm:$0xff]  ;;  %v296_v39 = vld [vmem:[%s13500_s2 + $0x8] sm:$0xff] }
  0x32   :  { %10616 = vmatprep.subr.mxu1 %v298_v35  ;;  %10606 = vmatpush3.msra.mxu0 %v9317_v34  ;;  %v9314_v40 = vld [vmem:[%s13500_s2 + $0x20] sm:$0xff]  ;;  %v9325_v42 = vld [vmem:[%s13500_s2 + $0x58] sm:$0xff]  ;;  %v9313_v54 = vld [vmem:[%s13502_s1 + $0x8] sm:$0xff] }
  0x33   :  { %10607 = vmatprep.subr.mxu0 %v9316_v36  ;;  %v295_v41 = vld [vmem:[%s13500_s2] sm:$0xff]  ;;  %v9331_v43 = vld [vmem:[%s13500_s2 + $0x78] sm:$0xff]  ;;  %v9324_v16 = vld [vmem:[%s13500_s2 + $0x50] sm:$0xff] }
  0x34   :  { %10608 = vmatpush3.msra.mxu0 %v9316_v36  ;;  %v9311_v46 = vld [vmem:[%s13501_s27] ss:$0 sm:$0xff]  ;;  %v9330_v17 = vld [vmem:[%s13500_s2 + $0x70] sm:$0xff]  ;;  %v9323_v21 = vld [vmem:[%s13500_s2 + $0x48] sm:$0xff]  ;;  %s11317_s27 = smov 56  }
  0x35   :  { %10609 = vmatprep.subr.mxu0 %v9315_v38  ;;  %v253_v53 = vld [vmem:[%s13502_s1] sm:$0xff]  ;;  %v9329_v22 = vld [vmem:[%s13500_s2 + $0x68] sm:$0xff]  ;;  %s13474_s1 = smov 40  }
  0x36   :  { %10610 = vmatpush3.msra.mxu0 %v9315_v38  ;;  %v9322_v24 = vld [vmem:[%s13500_s2 + $0x40] sm:$0xff]  ;;  %v9335_v34 = vld [vmem:[%s13500_s2 + $0x88] sm:$0xff]  ;;  %v830_v38 = vld [vmem:[%s13450_s11 + $0x18] sm:$0xff] }
  0x37   :  { %10611 = vmatprep.subr.mxu0 %v9314_v40  ;;  %v9328_v25 = vld [vmem:[%s13500_s2 + $0x60] sm:$0xff] }
  0x38   :  { %10612 = vmatpush3.msra.mxu0 %v9314_v40 }
  0x39   :  { %10627 = vmatprep.subr.mxu0 %v9325_v42 }
  0x96   :  { %v316_v50 = vpop.permute.xlu0 %315 }
  0x97   :  { %v287_v52 = vpop.permute.xlu1 %286  ;;  %vm320_vm13 = vcmp.eq.s32.totalorder %v316_v50, 1 }
  0x98   :  { %vm291_vm10 = vcmp.eq.s32.totalorder %v287_v52, 1 }
  0x9a   :  { %v319_v60 = vpop.permute.xlu0 %318 }
  0x9b   :  { %v290_v61 = vpop.permute.xlu1 %289  ;;  %vm321_vm14 = vcmp.eq.s32.totalorder %v319_v60, 1 }
  0x9c   :  { %vm292_vm12 = vcmp.eq.s32.totalorder %v290_v61, 1 }
  0x9e   :  { %v596_v14 = vpop.permute.xlu0 %595 }
  0x9f   :  { %vm600_vm5 = vcmp.eq.s32.totalorder %v596_v14, 1  ;;  %v599_v23 = vpop.permute.xlu1 %598 }
  0xa2   :  { %v709_v27 = vpop.permute.xlu0 %708 }
  0xd9   :  { %v164_v30 = vpop.f32.mrf.mxu0 }
  0xda   :  { %v165_v31 = vadd.f32 %v9309_v29, %v164_v30  ;;  %v9337_v29 = vld [vmem:[%s13500_s2 + $0x98] sm:$0xff] }
  0xdb   :  { %v10593_v32 = vpop.f32.mrf.mxu0 }
  0xdc   :  { %v168_v33 = vmax.f32 %v165_v31, 0.0  ;;  %v9336_v32 = vld [vmem:[%s13500_s2 + $0x90] sm:$0xff] }
  0xde   :  { %10603 = vmatmul.mubr.msk.f32.vlgmr.msra.gmra.mxu1 %vm13499_vm0, %v168_v33  ;;  %vm601_vm0 = vcmp.eq.s32.totalorder %v599_v23, 1  ;;  %v712_v33 = vpop.permute.xlu1 %711 }
  0xdf   :  { %10617 = vmatpush3.msra.mxu1 %v298_v35  ;;  %v9334_v35 = vld [vmem:[%s13500_s2 + $0x80] sm:$0xff]  ;;  %s11316_s2 = smov 64  }
  0xe0   :  { %10618 = vmatprep.subr.mxu1 %v297_v37 }
  0xe1   :  { %10619 = vmatpush3.msra.mxu1 %v297_v37 }
  0xe2   :  { %10620 = vmatprep.subr.mxu1 %v296_v39 }
  0xe3   :  { %10621 = vmatpush3.msra.mxu1 %v296_v39  ;;  %v829_v39 = vld [vmem:[%s13450_s11 + $0x10] sm:$0xff] }
  0xe4   :  { %10622 = vmatprep.subr.mxu1 %v295_v41 }
  0xe5   :  { %10623 = vmatpush3.msra.mxu1 %v295_v41 }
  0xe6   :  { %10638 = vmatprep.subr.mxu1 %v9331_v43 }
 0x19e   :  { %v249_v49 = vpop.f32.mrf.mxu1 }
 0x19f   :  { %v250_v51 = vadd.f32 %v9311_v46, %v249_v49  ;;  %v828_v49 = vld [vmem:[%s13450_s11 + $0x8] sm:$0xff] }
 0x1a0   :  { %v10604_v55 = vpop.f32.mrf.mxu1 }
 0x1a1   :  { %v257_v56 = vrot.slane %v250_v51, %v11553_v47  ;;  %v264_v57 = vrot.slane %v250_v51, %v11556_v48 }
 0x1a3   :  { %v11566_v58 = vadd.f32 %v257_v56, %v253_v53  ;;  %v11568_v59 = vadd.f32 %v9313_v54, %v264_v57  ;;  %v827_v53 = vld [vmem:[%s13450_s11] sm:$0xff] }
 0x1a5   :  { %v299_v62 = vrot.slane %v11566_v58, 7  ;;  %v300_v63 = vrot.slane %v11568_v59, 7  ;;  %v268_v0 = vrot.slane %v11566_v58, 6  ;;  %v269_v2 = vrot.slane %v11568_v59, 6 }
 0x1a6   :  { %v579_v3 = vrot.slane %v11566_v58, 1  ;;  %v580_v4 = vrot.slane %v11568_v59, 1  ;;  %v692_v19 = vrot.slane %v11566_v58, 2  ;;  %v693_v20 = vrot.slane %v11568_v59, 2 }
 0x1a7   :  { %v303_v5 = vsel %vm301_vm1, %v300_v63, %v299_v62  ;;  %v274_v6 = vsel %vm272_vm9, %v269_v2, %v268_v0  ;;  %v302_v7 = vsel %vm301_vm1, %v299_v62, %v300_v63  ;;  %v273_v8 = vsel %vm272_vm9, %v268_v0, %v269_v2  ;;  %vm13509_vm9 = vmmov %vm13503_vm2 }
 0x1a8   :  { %v322_v9 = vsel %vm320_vm13, %v303_v5, 0.0  ;;  %v293_v10 = vsel %vm291_vm10, %v274_v6, 0.0  ;;  %v323_v11 = vsel %vm321_vm14, %v302_v7, 0.0  ;;  %v294_v13 = vsel %vm292_vm12, %v273_v8, 0.0  ;;  %vm13510_vm10 = vmmov %vm13503_vm2  ;;  %v9341_v8 = vld [vmem:[%s13451_s12] ss:$0 sm:$0xff] }
 0x1a9   :  { %v582_v15 = vsel %vm581_vm15, %v579_v3, %v580_v4  ;;  %10613 = vmatprep.mubr.msk.f32.mxu0 %vm13503_vm2, %v322_v9  ;;  %10624 = vmatprep.mubr.msk.f32.mxu1 %vm13504_vm3, %v293_v10  ;;  %v583_v26 = vsel %vm581_vm15, %v580_v4, %v579_v3  ;;  %v695_v28 = vsel %vm694_vm7, %v692_v19, %v693_v20  ;;  %vm713_vm1 = vcmp.eq.s32.totalorder %v709_v27, 1  ;;  %vm13511_vm12 = vmmov %vm13503_vm2 }
 0x1aa   :  { %10614 = vmatmul.mubr.msk.f32.vlgmr.msra.gmra.mxu0 %vm13505_vm6, %v323_v11  ;;  %10625 = vmatmul.mubr.msk.f32.vlgmr.msra.gmra.mxu1 %vm13506_vm4, %v294_v13  ;;  %v602_v18 = vsel %vm600_vm5, %v582_v15, 0.0  ;;  %v603_v30 = vsel %vm601_vm0, %v583_v26, 0.0  ;;  %v715_v31 = vsel %vm713_vm1, %v695_v28, 0.0  ;;  %v696_v36 = vsel %vm694_vm7, %v693_v20, %v692_v19  ;;  %vm13512_vm14 = vmmov %vm13503_vm2 }
 0x1ab   :  { %10628 = vmatpush3.msra.mxu0 %v9325_v42  ;;  %10639 = vmatpush3.msra.mxu1 %v9331_v43  ;;  %vm714_vm13 = vcmp.eq.s32.totalorder %v712_v33, 1  ;;  %vm13513_vm15 = vmmov 0   ;;  %vm13514_vm3 = vmmov %vm13503_vm2  ;;  %vm927_vm6 = vcmask 64512  }
 0x1ac   :  { %10629 = vmatprep.subr.mxu0 %v9324_v16  ;;  %10635 = vmatprep.mubr.msk.f32.mxu0 %vm13507_vm11, %v11566_v58  ;;  %v716_v37 = vsel %vm714_vm13, %v696_v36, 0.0  ;;  %v9340_v58 = vld [vmem:[%s13449_s10] ss:$0 sm:$0xff]  ;;  %s13476_s10 = smov 72   ;;  %vm13516_vm4 = vmmov %vm13503_vm2 }
 0x1ad   :  { %10640 = vmatprep.subr.mxu1 %v9330_v17  ;;  %10646 = vmatprep.mubr.msk.f32.mxu1 %vm13508_vm8, %v602_v18  ;;  %vm13517_vm5 = vmmov %vm13503_vm2 }
 0x1ae   :  { %10630 = vmatpush3.msra.mxu0 %v9324_v16  ;;  %10641 = vmatpush3.msra.mxu1 %v9330_v17  ;;  %v11692_v16 = vld [vmem:[%s13515_s3] sm:$0x3]  ;;  %vm13518_vm11 = vmmov %vm13503_vm2 }
 0x1af   :  { %10631 = vmatprep.subr.mxu0 %v9323_v21  ;;  %10642 = vmatprep.subr.mxu1 %v9329_v22  ;;  %v11696_v17 = vrot.slane %v11692_v16, %v11553_v47  ;;  %vm13519_vm7 = vmmov %vm13503_vm2 }
 0x1b0   :  { %10632 = vmatpush3.msra.mxu0 %v9323_v21  ;;  %10643 = vmatpush3.msra.mxu1 %v9329_v22  ;;  %vm13520_vm8 = vmmov %vm13503_vm2 }
 0x1b1   :  { %10633 = vmatprep.subr.mxu0 %v9322_v24  ;;  %10644 = vmatprep.subr.mxu1 %v9328_v25  ;;  %vm13521_vm0 = vmmov %vm13503_vm2 }
 0x1b2   :  { %10634 = vmatpush3.msra.mxu0 %v9322_v24  ;;  %10645 = vmatpush3.msra.mxu1 %v9328_v25  ;;  %vm13522_vm1 = vmmov %vm13521_vm0 }
 0x1b3   :  { %10636 = vmatmul.mubr.msk.f32.vlgmr.msra.gmra.mxu0 %vm13509_vm9, %v11568_v59  ;;  %10647 = vmatmul.mubr.msk.f32.vlgmr.msra.gmra.mxu1 %vm13510_vm10, %v603_v30  ;;  %vm13523_vm9 = vmmov %vm13521_vm0 }
 0x1b4   :  { %10649 = vmatprep.subr.mxu0 %v9337_v29  ;;  %10657 = vmatprep.mubr.msk.f32.mxu0 %vm13511_vm12, %v715_v31  ;;  %vm13524_vm10 = vmmov %vm13521_vm0 }
 0x1b5   :  { %10650 = vmatpush3.msra.mxu0 %v9337_v29  ;;  %10660 = vmatprep.subr.mxu1 %v830_v38  ;;  %vm13525_vm12 = vmmov %vm13521_vm0 }
 0x1b6   :  { %10651 = vmatprep.subr.mxu0 %v9336_v32  ;;  %10661 = vmatpush3.msra.mxu1 %v830_v38  ;;  %vm13526_vm13 = vmmov %vm13521_vm0 }
 0x1b7   :  { %10652 = vmatpush3.msra.mxu0 %v9336_v32  ;;  %10662 = vmatprep.subr.mxu1 %v829_v39 }
 0x1b8   :  { %10653 = vmatprep.subr.mxu0 %v9335_v34  ;;  %10663 = vmatpush3.msra.mxu1 %v829_v39 }
 0x1b9   :  { %10654 = vmatpush3.msra.mxu0 %v9335_v34  ;;  %10664 = vmatprep.subr.mxu1 %v828_v49 }
 0x1ba   :  { %10655 = vmatprep.subr.mxu0 %v9334_v35  ;;  %10665 = vmatpush3.msra.mxu1 %v828_v49 }
 0x1bb   :  { %10656 = vmatpush3.msra.mxu0 %v9334_v35  ;;  %10666 = vmatprep.subr.mxu1 %v827_v53 }
 0x1bc   :  { %10658 = vmatmul.mubr.msk.f32.vlgmr.msra.gmra.mxu0 %vm13512_vm14, %v716_v37  ;;  %10671 = vmatprep.subr.mxu0 %v11310_v1  ;;  %vm13527_vm14 = vmmov %vm13521_vm0 }
 0x1bd   :  { %10673 = vmatprep.mubr.msk.f32.mxu0 %vm13513_vm15, %v11310_v1  ;;  %10667 = vmatpush3.msra.mxu1 %v827_v53 }
 0x1be   :  { %10686 = vmatprep.subr.mxu1 %v11310_v1 }
 0x26a   :  { %v10615_v40 = vpop.f32.mrf.mxu0  ;;  %v10626_v41 = vpop.f32.mrf.mxu1 }
 0x26b   :  { %v488_v45 = vadd.f32 %v10626_v41, %v10615_v40 }
 0x26c   :  { %v401_v42 = vpop.f32.mrf.mxu0  ;;  %v482_v44 = vpop.f32.mrf.mxu1 }
 0x26d   :  { %v483_v50 = vadd.f32 %v482_v44, %v401_v42 }
 0x273   :  { %v10637_v43 = vpop.f32.mrf.mxu0  ;;  %v10648_v52 = vpop.f32.mrf.mxu1 }
 0x274   :  { %v578_v51 = vadd.f32 %v10637_v43, %v488_v45  ;;  %v11729_v45 = vld [vmem:[%s13452_s13 + $0x8] sm:$0xff] }
 0x275   :  { %v568_v46 = vpop.f32.mrf.mxu0  ;;  %v681_v56 = vpop.f32.mrf.mxu1 }
 0x276   :  { %v577_v54 = vadd.f32 %v568_v46, %v483_v50  ;;  %v691_v55 = vadd.f32 %v10648_v52, %v578_v51  ;;  %v11736_v51 = vld [vmem:[%s13452_s13] sm:$0xff] }
 0x278   :  { %v690_v59 = vadd.f32 %v681_v56, %v577_v54 }
 0x27c   :  { %v10659_v57 = vpop.f32.mrf.mxu0 }
 0x27d   :  { %v804_v60 = vadd.f32 %v10659_v57, %v691_v55 }
 0x27e   :  { %v794_v61 = vpop.f32.mrf.mxu0 }
 0x27f   :  { %v813_v62 = vadd.f32 %v9340_v58, %v804_v60  ;;  %v803_v63 = vadd.f32 %v794_v61, %v690_v59 }
 0x281   :  { %v815_v0 = vmax.f32 %v813_v62, 0.0  ;;  %v812_v2 = vadd.f32 %v9340_v58, %v803_v63 }
 0x283   :  { %820 = vrot.lane.b32.xlu1 %v815_v0, %s11313_s29  ;;  %v814_v3 = vmax.f32 %v812_v2, 0.0 }
 0x285   :  { %818 = vrot.lane.b32.xlu0 %v814_v3, %s11313_s29 }
 0x2f5   :  { %v821_v4 = vpop.permute.xlu1 %820 }
 0x2f6   :  { %v11663_v7 = vadd.f32 %v821_v4, %v815_v0 }
 0x2f7   :  { %v819_v5 = vpop.permute.xlu0 %818 }
 0x2f8   :  { %v11661_v6 = vadd.f32 %v819_v5, %v814_v3 }
 0x2fa   :  { %10668 = vmatprep.mubr.msk.f32.mxu1 %vm13503_vm2, %v11661_v6  ;;  %vm13528_vm2 = vmmov %vm13521_vm0 }
 0x2fb   :  { %10669 = vmatmul.mubr.msk.f32.vlgmr.msra.gmra.mxu1 %vm13514_vm3, %v11663_v7  ;;  %vm13529_vm3 = vmmov %vm13521_vm0 }
 0x2fc   :  { %10688 = vmatprep.mubr.msk.f32.mxu1 %vm13513_vm15, %v11310_v1 }
 0x3bb   :  { %v10670_v9 = vpop.f32.mrf.mxu1 }
 0x3bc   :  { %v11674_v10 = vadd.f32 %v10670_v9, %v9341_v8 }
 0x3bd   :  { %v910_v11 = vpop.f32.mrf.mxu1 }
 0x3be   :  { %v11676_v13 = vadd.f32 %v9341_v8, %v910_v11 }
 0x3c0   :  { %925 = vrot.lane.b32.xlu0 %v11676_v13, %s11313_s29  ;;  %v11682_v15 = vmul.f32 0.35355338, %v11676_v13 }
 0x432   :  { %v926_v14 = vpop.permute.xlu0 %925 }
 0x433   :  { %10672 = vmatpush3.xpose.msk.msra.mxu0 %vm927_vm6, %v926_v14 }
 0x434   :  { %10676 = vmatprep.subr.mxu0 %v11310_v1 }
 0x436   :  { %10674 = vmatmul.mubr.msk.f32.vlgmr.msra.gmra.mxu0 %vm927_vm6, %v11682_v15 }
 0x437   :  { %10678 = vmatprep.mubr.msk.f32.mxu0 %vm13513_vm15, %v11310_v1 }
 0x4f6   :  { %v999_v18 = vpop.f32.mrf.mxu0 }
 0x4f7   :  { %v1000_v19 = vadd.f32 %v999_v18, %v11696_v17 }
 0x4f8   :  { %v10675_v20 = vpop.f32.mrf.mxu0 }
 0x4f9   :  { %v1003_v21 = vsel %vm927_vm6, %v1000_v19, -inf }
 0x4fa   :  { %1004 = vmax.xlane.f32.xlu1 %v1003_v21 }
 0x50b   :  { %1093 = vrot.lane.b32.xlu1 %v11676_v13, %s11314_s26 }
 0x50f   :  { %1091 = vrot.lane.b32.xlu1 %v11682_v15, %s11315_s8 }
 0x583   :  { %v1005_v22 = vpop.xlane.xlu1 %1004 }
 0x584   :  { %v1006_v23 = vsub.f32 %v1000_v19, %v1005_v22  ;;  %v11781_v19 = vld [vmem:[%s13452_s13 + $0x10] sm:$0xff] }
 0x586   :  { %v1007_v24 = vmul.f32 1.442695, %v1006_v23 }
 0x587   :  { %v1094_v30 = vpop.permute.xlu1 %1093 }
 0x588   :  { %11208 = vpow2.f32 %v1007_v24 }
 0x58b   :  { %v1092_v32 = vpop.permute.xlu1 %1091 }
 0x595   :  { %v11209_v25 = vpop.eup %11208 }
 0x596   :  { %v1009_v26 = vsel %vm927_vm6, %v11209_v25, 0.0 }
 0x597   :  { %1010 = vadd.xlane.f32.xlu0 %v1009_v26 }
 0x5ad   :  { %1014 = vrot.lane.b32.xlu0 %v11676_v13, %s11316_s2 }
 0x620   :  { %v1011_v27 = vpop.xlane.xlu0 %1010 }
 0x621   :  { %11210 = vrcp.f32 %v1011_v27 }
 0x624   :  { %v1015_v28 = vpop.permute.xlu0 %1014 }
 0x625   :  { %10677 = vmatpush3.msra.mxu0 %v1015_v28 }
 0x626   :  { %10681 = vmatprep.subr.mxu0 %v11310_v1 }
 0x62e   :  { %v11211_v29 = vpop.eup %11210 }
 0x62f   :  { %v1013_v31 = vmul.f32 %v11211_v29, %v11209_v25 }
 0x631   :  { %10679 = vmatmul.mubr.msk.f32.vlgmr.msra.gmra.mxu0 %vm927_vm6, %v1013_v31 }
 0x632   :  { %10682 = vmatpush3.xpose.msk.msra.mxu0 %vm927_vm6, %v1094_v30  ;;  %10683 = vmatprep.mubr.msk.f32.mxu0 %vm13513_vm15, %v11310_v1 }
 0x633   :  { %10691 = vmatprep.subr.mxu0 %v11310_v1 }
 0x635   :  { %10684 = vmatmul.mubr.msk.f32.vlgmr.msra.gmra.mxu0 %vm927_vm6, %v1092_v32  ;;  %v11797_v32 = vmul.f32 0.35355338, %v11674_v10 }
 0x636   :  { %10693 = vmatprep.mubr.msk.f32.mxu0 %vm13513_vm15, %v11310_v1  ;;  %10692 = vmatpush3.msra.mxu0 %v11729_v45 }
 0x637   :  { %10701 = vmatprep.subr.mxu0 %v11310_v1 }
 0x6f1   :  { %v1086_v33 = vpop.f32.mrf.mxu0 }
 0x6f3   :  { %v10680_v34 = vpop.f32.mrf.mxu0 }
 0x6f5   :  { %v1165_v35 = vpop.f32.mrf.mxu0 }
 0x6f6   :  { %v1166_v36 = vadd.f32 %v1165_v35, %v11696_v17 }
 0x6f7   :  { %v10685_v37 = vpop.f32.mrf.mxu0 }
 0x6f8   :  { %v1169_v38 = vsel %vm927_vm6, %v1166_v36, -inf }
 0x6f9   :  { %1170 = vmax.xlane.f32.xlu0 %v1169_v38 }
 0x70f   :  { %1180 = vrot.lane.b32.xlu0 %v11676_v13, %s11317_s27 }
 0x713   :  { %1403 = vrot.lane.b32.xlu0 %v11682_v15, %s11318_s4 }
 0x782   :  { %v1171_v39 = vpop.xlane.xlu0 %1170 }
 0x783   :  { %v1172_v40 = vsub.f32 %v1166_v36, %v1171_v39 }
 0x785   :  { %v1173_v41 = vmul.f32 1.442695, %v1172_v40 }
 0x786   :  { %v1181_v42 = vpop.permute.xlu0 %1180 }
 0x787   :  { %11212 = vpow2.f32 %v1173_v41  ;;  %10687 = vmatpush3.msra.mxu1 %v1181_v42  ;;  %v11822_v42 = vld [vmem:[%s13452_s13 + $0x18] sm:$0xff] }
 0x788   :  { %10696 = vmatprep.subr.mxu1 %v11310_v1 }
 0x78a   :  { %v1404_v55 = vpop.permute.xlu0 %1403 }
 0x794   :  { %v11213_v43 = vpop.eup %11212 }
 0x795   :  { %v1175_v44 = vsel %vm927_vm6, %v11213_v43, 0.0 }
 0x796   :  { %1176 = vadd.xlane.f32.xlu1 %v1175_v44  ;;  %v11829_v44 = vrot.slane %v11692_v16, %v11556_v48 }
 0x7a7   :  { %1405 = vrot.lane.b32.xlu1 %v11676_v13, %s13482_s28 }
 0x81f   :  { %v1177_v46 = vpop.xlane.xlu1 %1176 }
 0x820   :  { %11214 = vrcp.f32 %v1177_v46 }
 0x823   :  { %v1406_v53 = vpop.permute.xlu1 %1405 }
 0x82d   :  { %v11215_v49 = vpop.eup %11214 }
 0x82e   :  { %v1179_v50 = vmul.f32 %v11215_v49, %v11213_v43 }
 0x830   :  { %10689 = vmatmul.mubr.msk.f32.vlgmr.msra.gmra.mxu1 %vm927_vm6, %v1179_v50 }
 0x831   :  { %10697 = vmatpush3.msra.mxu1 %v11736_v51  ;;  %10698 = vmatprep.mubr.msk.f32.mxu1 %vm13513_vm15, %v11310_v1 }
 0x832   :  { %10706 = vmatprep.subr.mxu1 %v11310_v1 }
 0x834   :  { %10699 = vmatmul.mubr.msk.f32.vlgmr.msra.gmra.mxu1 %vm927_vm6, %v1086_v33 }
 0x835   :  { %10708 = vmatprep.mubr.msk.f32.mxu1 %vm13513_vm15, %v11310_v1 }
 0x8f0   :  { %v1252_v52 = vpop.f32.mrf.mxu1 }
 0x8f1   :  { %10694 = vmatmul.mubr.msk.f32.vlgmr.msra.gmra.mxu0 %vm927_vm6, %v1252_v52 }
 0x8f2   :  { %10702 = vmatpush3.xpose.msk.msra.mxu0 %vm927_vm6, %v1406_v53  ;;  %v10690_v54 = vpop.f32.mrf.mxu1  ;;  %10703 = vmatprep.mubr.msk.f32.mxu0 %vm13513_vm15, %v11310_v1 }
 0x8f3   :  { %10711 = vmatprep.subr.mxu0 %v11310_v1 }
 0x8f4   :  { %v11751_v56 = vpop.f32.mrf.mxu1 }
 0x8f5   :  { %10704 = vmatmul.mubr.msk.f32.vlgmr.msra.gmra.mxu0 %vm927_vm6, %v1404_v55 }
 0x8f6   :  { %v10700_v57 = vpop.f32.mrf.mxu1  ;;  %10713 = vmatprep.mubr.msk.f32.mxu0 %vm13513_vm15, %v11310_v1  ;;  %10712 = vmatpush3.msra.mxu0 %v11781_v19 }
 0x8f7   :  { %10721 = vmatprep.subr.mxu0 %v11310_v1 }
 0x9b1   :  { %v11756_v58 = vpop.f32.mrf.mxu0 }
 0x9b3   :  { %v10695_v59 = vpop.f32.mrf.mxu0 }
 0x9b5   :  { %v1477_v60 = vpop.f32.mrf.mxu0 }
 0x9b6   :  { %v1478_v61 = vadd.f32 %v1477_v60, %v11696_v17 }
 0x9b7   :  { %v10705_v62 = vpop.f32.mrf.mxu0 }
 0x9b8   :  { %v1481_v63 = vsel %vm927_vm6, %v1478_v61, -inf }
 0x9b9   :  { %1482 = vmax.xlane.f32.xlu1 %v1481_v63 }
 0x9ca   :  { %1645 = vrot.lane.b32.xlu1 %v11676_v13, %s13476_s10 }
 0x9ce   :  { %1643 = vrot.lane.b32.xlu1 %v11682_v15, %s13478_s6 }
 0x9d2   :  { %1889 = vrot.lane.b32.xlu1 %v11674_v10, %s11313_s29 }
 0xa42   :  { %v1483_v0 = vpop.xlane.xlu1 %1482 }
 0xa43   :  { %v1484_v2 = vsub.f32 %v1478_v61, %v1483_v0 }
 0xa45   :  { %v1485_v3 = vmul.f32 1.442695, %v1484_v2 }
 0xa46   :  { %v1646_v14 = vpop.permute.xlu1 %1645 }
 0xa47   :  { %11216 = vpow2.f32 %v1485_v3 }
 0xa4a   :  { %v1644_v18 = vpop.permute.xlu1 %1643 }
 0xa4e   :  { %v1890_v36 = vpop.permute.xlu1 %1889 }
 0xa54   :  { %v11217_v4 = vpop.eup %11216 }
 0xa55   :  { %v1487_v5 = vsel %vm927_vm6, %v11217_v4, 0.0 }
 0xa56   :  { %1488 = vadd.xlane.f32.xlu0 %v1487_v5 }
 0xa6c   :  { %1492 = vrot.lane.b32.xlu0 %v11676_v13, %s13480_s30 }
 0xadf   :  { %v1489_v8 = vpop.xlane.xlu0 %1488 }
 0xae0   :  { %11218 = vrcp.f32 %v1489_v8 }
 0xae3   :  { %v1493_v9 = vpop.permute.xlu0 %1492 }
 0xae4   :  { %10707 = vmatpush3.msra.mxu1 %v1493_v9 }
 0xae5   :  { %10716 = vmatprep.subr.mxu1 %v11310_v1 }
 0xaed   :  { %v11219_v11 = vpop.eup %11218 }
 0xaee   :  { %v1491_v15 = vmul.f32 %v11219_v11, %v11217_v4 }
 0xaf0   :  { %10709 = vmatmul.mubr.msk.f32.vlgmr.msra.gmra.mxu1 %vm927_vm6, %v1491_v15 }
 0xaf1   :  { %10717 = vmatpush3.xpose.msk.msra.mxu1 %vm927_vm6, %v1646_v14  ;;  %10718 = vmatprep.mubr.msk.f32.mxu1 %vm13513_vm15, %v11310_v1 }
 0xaf2   :  { %10726 = vmatprep.subr.mxu1 %v11310_v1 }
 0xaf4   :  { %10719 = vmatmul.mubr.msk.f32.vlgmr.msra.gmra.mxu1 %vm927_vm6, %v1644_v18 }
 0xaf5   :  { %10728 = vmatprep.mubr.msk.f32.mxu1 %vm13513_vm15, %v11310_v1  ;;  %10727 = vmatpush3.msra.mxu1 %v11822_v42 }
 0xaf6   :  { %10736 = vmatprep.subr.mxu1 %v11310_v1 }
 0xbb0   :  { %v1564_v20 = vpop.f32.mrf.mxu1 }
 0xbb1   :  { %10714 = vmatmul.mubr.msk.f32.vlgmr.msra.gmra.mxu0 %vm927_vm6, %v1564_v20 }
 0xbb2   :  { %v10710_v21 = vpop.f32.mrf.mxu1  ;;  %10723 = vmatprep.mubr.msk.f32.mxu0 %vm13513_vm15, %v11310_v1 }
 0xbb4   :  { %v1717_v22 = vpop.f32.mrf.mxu1 }
 0xbb5   :  { %v1718_v23 = vadd.f32 %v1717_v22, %v11696_v17 }
 0xbb6   :  { %v10720_v24 = vpop.f32.mrf.mxu1 }
 0xbb7   :  { %v1721_v25 = vsel %vm927_vm6, %v1718_v23, -inf }
 0xbb8   :  { %1722 = vmax.xlane.f32.xlu0 %v1721_v25 }
 0xbce   :  { %1732 = vrot.lane.b32.xlu0 %v11676_v13, %s13474_s1  ;;  %v1400_v13 = vadd.f32 %v11751_v56, %v11756_v58 }
 0xbd2   :  { %2056 = vrot.lane.b32.xlu0 %v11674_v10, %s11314_s26 }
 0xc41   :  { %v1723_v26 = vpop.xlane.xlu0 %1722 }
 0xc42   :  { %v1724_v27 = vsub.f32 %v1718_v23, %v1723_v26 }
 0xc44   :  { %v1725_v28 = vmul.f32 1.442695, %v1724_v27 }
 0xc45   :  { %v1733_v29 = vpop.permute.xlu0 %1732 }
 0xc46   :  { %11220 = vpow2.f32 %v1725_v28  ;;  %10722 = vmatpush3.msra.mxu0 %v1733_v29 }
 0xc47   :  { %10731 = vmatprep.subr.mxu0 %v11310_v1 }
 0xc49   :  { %v2057_v40 = vpop.permute.xlu0 %2056 }
 0xc53   :  { %v11221_v30 = vpop.eup %11220 }
 0xc54   :  { %v1727_v31 = vsel %vm927_vm6, %v11221_v30, 0.0 }
 0xc55   :  { %1728 = vadd.xlane.f32.xlu1 %v1727_v31 }
 0xc66   :  { %2054 = vrot.lane.b32.xlu1 %v11797_v32, %s11315_s8 }
 0xc71   :  { %v1638_v33 = vpop.f32.mrf.mxu0 }
 0xc72   :  { %v1642_v34 = vadd.f32 %v1638_v33, %v1400_v13 }
 0xc73   :  { %v10715_v35 = vpop.f32.mrf.mxu0 }
 0xcde   :  { %v1729_v37 = vpop.xlane.xlu1 %1728 }
 0xcdf   :  { %11222 = vrcp.f32 %v1729_v37 }
 0xce2   :  { %v2055_v41 = vpop.permute.xlu1 %2054 }
 0xcec   :  { %v11223_v38 = vpop.eup %11222 }
 0xced   :  { %v1731_v39 = vmul.f32 %v11223_v38, %v11221_v30 }
 0xcef   :  { %10724 = vmatmul.mubr.msk.f32.vlgmr.msra.gmra.mxu0 %vm927_vm6, %v1731_v39 }
 0xcf0   :  { %10732 = vmatpush3.xpose.msk.msra.mxu0 %vm927_vm6, %v1890_v36  ;;  %10733 = vmatprep.mubr.msk.f32.mxu0 %vm13513_vm15, %v11310_v1 }
 0xcf1   :  { %10741 = vmatprep.subr.mxu0 %v11310_v1 }
 0xcf3   :  { %10734 = vmatmul.mubr.msk.f32.vlgmr.msra.gmra.mxu0 %vm927_vm6, %v11797_v32 }
 0xcf4   :  { %10742 = vmatpush3.xpose.msk.msra.mxu0 %vm927_vm6, %v2057_v40  ;;  %10743 = vmatprep.mubr.msk.f32.mxu0 %vm13513_vm15, %v11310_v1 }
 0xcf5   :  { %10751 = vmatprep.subr.mxu0 %v11310_v1 }
 0xcf7   :  { %10744 = vmatmul.mubr.msk.f32.vlgmr.msra.gmra.mxu0 %vm927_vm6, %v2055_v41 }
 0xcf8   :  { %10752 = vmatpush3.msra.mxu0 %v11729_v45  ;;  %10753 = vmatprep.mubr.msk.f32.mxu0 %vm13513_vm15, %v11310_v1 }
 0xcf9   :  { %10761 = vmatprep.subr.mxu0 %v11310_v1 }
 0xdaf   :  { %v1804_v43 = vpop.f32.mrf.mxu0 }
 0xdb0   :  { %10729 = vmatmul.mubr.msk.f32.vlgmr.msra.gmra.mxu1 %vm927_vm6, %v1804_v43 }
 0xdb1   :  { %v10725_v45 = vpop.f32.mrf.mxu0  ;;  %10738 = vmatprep.mubr.msk.f32.mxu1 %vm13513_vm15, %v11310_v1 }
 0xdb3   :  { %v1962_v46 = vpop.f32.mrf.mxu0 }
 0xdb4   :  { %v1963_v49 = vadd.f32 %v1962_v46, %v11829_v44 }
 0xdb5   :  { %v10735_v50 = vpop.f32.mrf.mxu0 }
 0xdb6   :  { %v1966_v52 = vsel %vm927_vm6, %v1963_v49, -inf }
 0xdb7   :  { %1967 = vmax.xlane.f32.xlu0 %v1966_v52  ;;  %v2128_v53 = vpop.f32.mrf.mxu0 }
 0xdb8   :  { %v2129_v54 = vadd.f32 %v2128_v53, %v11829_v44 }
 0xdb9   :  { %v10745_v55 = vpop.f32.mrf.mxu0 }
 0xdba   :  { %v2132_v56 = vsel %vm927_vm6, %v2129_v54, -inf }
 0xdbb   :  { %2133 = vmax.xlane.f32.xlu1 %v2132_v56 }
 0xdcc   :  { %1977 = vrot.lane.b32.xlu1 %v11674_v10, %s11316_s2 }
 0xdd0   :  { %2368 = vrot.lane.b32.xlu1 %v11674_v10, %s13482_s28  ;;  %s13536_s28 = smov 104  }
 0xdd4   :  { %2366 = vrot.lane.b32.xlu1 %v11797_v32, %s11318_s4 }
 0xe40   :  { %v1968_v16 = vpop.xlane.xlu0 %1967 }
 0xe41   :  { %v1969_v57 = vsub.f32 %v1963_v49, %v1968_v16  ;;  %v9376_v49 = vld [vmem:[%s13453_s14] ss:$0 sm:$0xff] }
 0xe43   :  { %v1970_v58 = vmul.f32 1.442695, %v1969_v57 }
 0xe44   :  { %v2134_v59 = vpop.xlane.xlu1 %2133 }
 0xe45   :  { %11224 = vpow2.f32 %v1970_v58  ;;  %v2135_v60 = vsub.f32 %v2129_v54, %v2134_v59 }
 0xe47   :  { %v2136_v61 = vmul.f32 1.442695, %v2135_v60 }
 0xe48   :  { %v1978_v62 = vpop.permute.xlu1 %1977 }
 0xe49   :  { %11226 = vpow2.f32 %v2136_v61  ;;  %10737 = vmatpush3.msra.mxu1 %v1978_v62 }
 0xe4a   :  { %10746 = vmatprep.subr.mxu1 %v11310_v1 }
 0xe4c   :  { %v2369_v23 = vpop.permute.xlu1 %2368 }
 0xe52   :  { %v11225_v63 = vpop.eup %11224 }
 0xe53   :  { %v1972_v0 = vsel %vm927_vm6, %v11225_v63, 0.0 }
 0xe54   :  { %1973 = vadd.xlane.f32.xlu0 %v1972_v0 }
 0xe56   :  { %v11227_v2 = vpop.eup %11226 }
 0xe57   :  { %v2138_v3 = vsel %vm927_vm6, %v11227_v2, 0.0 }
 0xe58   :  { %2139 = vadd.xlane.f32.xlu0 %v2138_v3 }
 0xe6e   :  { %2143 = vrot.lane.b32.xlu0 %v11674_v10, %s11317_s27 }
 0xe70   :  { %v1878_v4 = vpop.f32.mrf.mxu1 }
 0xe71   :  { %v11848_v5 = vadd.f32 %v1878_v4, %v1642_v34 }
 0xe72   :  { %v10730_v8 = vpop.f32.mrf.mxu1 }
 0xe73   :  { %v2853_v53 = vadd.f32 %v9376_v49, %v11848_v5 }
 0xe75   :  { %v2855_v16 = vadd.f32 %v2853_v53, %v11661_v6 }
 0xe77   :  { %v2859_v57 = vsel %vm13516_vm4, %v2855_v16, 0.0  ;;  %vm13530_vm4 = vmmov %vm13521_vm0 }
 0xedd   :  { %v1974_v9 = vpop.xlane.xlu0 %1973 }
 0xede   :  { %11228 = vrcp.f32 %v1974_v9 }
 0xee1   :  { %v2140_v11 = vpop.xlane.xlu0 %2139 }
 0xee2   :  { %11230 = vrcp.f32 %v2140_v11 }
 0xee5   :  { %v2144_v18 = vpop.permute.xlu0 %2143 }
 0xeeb   :  { %v11229_v14 = vpop.eup %11228 }
 0xeec   :  { %v1976_v15 = vmul.f32 %v11229_v14, %v11225_v63 }
 0xeee   :  { %10739 = vmatmul.mubr.msk.f32.vlgmr.msra.gmra.mxu1 %vm927_vm6, %v1976_v15 }
 0xeef   :  { %v11231_v20 = vpop.eup %11230  ;;  %10747 = vmatpush3.msra.mxu1 %v2144_v18  ;;  %10748 = vmatprep.mubr.msk.f32.mxu1 %vm13513_vm15, %v11310_v1 }
 0xef0   :  { %v2142_v21 = vmul.f32 %v11231_v20, %v11227_v2  ;;  %10756 = vmatprep.subr.mxu1 %v11310_v1 }
 0xef2   :  { %10749 = vmatmul.mubr.msk.f32.vlgmr.msra.gmra.mxu1 %vm927_vm6, %v2142_v21 }
 0xef3   :  { %10757 = vmatpush3.msra.mxu1 %v11736_v51  ;;  %10758 = vmatprep.mubr.msk.f32.mxu1 %vm13513_vm15, %v11310_v1  ;;  %v2367_v51 = vpop.permute.xlu1 %2366 }
 0xef4   :  { %10766 = vmatprep.subr.mxu1 %v11310_v1 }
 0xfae   :  { %v2049_v22 = vpop.f32.mrf.mxu1 }
 0xfaf   :  { %10759 = vmatmul.mubr.msk.f32.vlgmr.msra.gmra.mxu1 %vm927_vm6, %v2049_v22 }
 0xfb0   :  { %v10740_v24 = vpop.f32.mrf.mxu1  ;;  %10768 = vmatprep.mubr.msk.f32.mxu1 %vm13513_vm15, %v11310_v1 }
 0xfb2   :  { %v2215_v25 = vpop.f32.mrf.mxu1 }
 0xfb3   :  { %10754 = vmatmul.mubr.msk.f32.vlgmr.msra.gmra.mxu0 %vm927_vm6, %v2215_v25 }
 0xfb4   :  { %10762 = vmatpush3.xpose.msk.msra.mxu0 %vm927_vm6, %v2369_v23  ;;  %v10750_v26 = vpop.f32.mrf.mxu1  ;;  %10763 = vmatprep.mubr.msk.f32.mxu0 %vm13513_vm15, %v11310_v1 }
 0xfb5   :  { %10771 = vmatprep.subr.mxu0 %v11310_v1 }
 0xfb7   :  { %10764 = vmatmul.mubr.msk.f32.vlgmr.msra.gmra.mxu0 %vm927_vm6, %v2367_v51 }
 0xfb8   :  { %10772 = vmatpush3.msra.mxu0 %v11781_v19  ;;  %10773 = vmatprep.mubr.msk.f32.mxu0 %vm13513_vm15, %v11310_v1 }
 0xfb9   :  { %10781 = vmatprep.subr.mxu0 %v11310_v1 }
0x106f   :  { %v2362_v27 = vpop.f32.mrf.mxu1 }
0x1071   :  { %v10760_v28 = vpop.f32.mrf.mxu1 }
0x1073   :  { %v2289_v29 = vpop.f32.mrf.mxu0 }
0x1074   :  { %v2363_v30 = vadd.f32 %v2362_v27, %v2289_v29 }
0x1075   :  { %v10755_v31 = vpop.f32.mrf.mxu0 }
0x1076   :  { %v3025_v31 = vld [vmem:[%s13458_s19 + $0x88] sm:$0xff] }
0x1077   :  { %v2440_v13 = vpop.f32.mrf.mxu0 }
0x1078   :  { %v2441_v33 = vadd.f32 %v2440_v13, %v11829_v44 }
0x1079   :  { %v10765_v34 = vpop.f32.mrf.mxu0 }
0x107a   :  { %v2444_v35 = vsel %vm927_vm6, %v2441_v33, -inf }
0x107b   :  { %2445 = vmax.xlane.f32.xlu0 %v2444_v35 }
0x1091   :  { %2455 = vrot.lane.b32.xlu0 %v11674_v10, %s13480_s30  ;;  %s13537_s30 = smov 72  }
0x1095   :  { %2606 = vrot.lane.b32.xlu0 %v11797_v32, %s13478_s6  ;;  %s13535_s6 = smov 48  }
0x1104   :  { %v2446_v19 = vpop.xlane.xlu0 %2445 }
0x1105   :  { %v2447_v36 = vsub.f32 %v2441_v33, %v2446_v19  ;;  %v3026_v33 = vld [vmem:[%s13458_s19 + $0xc8] sm:$0xff] }
0x1106   :  { %v9386_v35 = vcombine.low %v3025_v31, %v3026_v33  ;;  %v9387_v19 = vcombine.high %v3025_v31, %v3026_v33  ;;  %v10979_v31 = vld [vmem:[%s13460_s21 + $0x8] sm:$0xff]   ;;  %v10981_v33 = vld [vmem:[%s13460_s21 + $0x40] sm:$0xff]  }
0x1107   :  { %v2448_v37 = vmul.f32 1.442695, %v2447_v36  ;;  %v2903_v36 = vld [vmem:[%s13458_s19] sm:$0xff] }
0x1108   :  { %v2456_v38 = vpop.permute.xlu0 %2455 }
0x1109   :  { %11232 = vpow2.f32 %v2448_v37  ;;  %10767 = vmatpush3.msra.mxu1 %v2456_v38  ;;  %v2904_v37 = vld [vmem:[%s13458_s19 + $0x40] sm:$0xff]  ;;  %v3023_v38 = vld [vmem:[%s13458_s19 + $0x8] sm:$0xff] }
0x110a   :  { %10776 = vmatprep.subr.mxu1 %v11310_v1 }
0x110c   :  { %v2607_v46 = vpop.permute.xlu0 %2606 }
0x1116   :  { %v11233_v39 = vpop.eup %11232 }
0x1117   :  { %v2450_v40 = vsel %vm927_vm6, %v11233_v39, 0.0 }
0x1118   :  { %2451 = vadd.xlane.f32.xlu1 %v2450_v40  ;;  %v3024_v40 = vld [vmem:[%s13458_s19 + $0x48] sm:$0xff] }
0x1129   :  { %2608 = vrot.lane.b32.xlu1 %v11674_v10, %s13476_s10 }
0x11a1   :  { %v2452_v41 = vpop.xlane.xlu1 %2451 }
0x11a2   :  { %11234 = vrcp.f32 %v2452_v41  ;;  %v9379_v41 = vcombine.low %v2903_v36, %v2904_v37 }
0x11a5   :  { %v2609_v32 = vpop.permute.xlu1 %2608 }
0x11af   :  { %v11235_v43 = vpop.eup %11234 }
0x11b0   :  { %v2454_v45 = vmul.f32 %v11235_v43, %v11233_v39  ;;  %v9380_v39 = vcombine.high %v2903_v36, %v2904_v37  ;;  %v9384_v43 = vcombine.low %v3023_v38, %v3024_v40  ;;  %v3417_v36 = vld [vmem:[%s13458_s19 + $0xd0] sm:$0xff] }
0x11b2   :  { %10769 = vmatmul.mubr.msk.f32.vlgmr.msra.gmra.mxu1 %vm927_vm6, %v2454_v45  ;;  %v9385_v45 = vcombine.high %v3023_v38, %v3024_v40  ;;  %v2907_v40 = vld [vmem:[%s13459_s20] sm:$0x3] }
0x11b3   :  { %10777 = vmatpush3.xpose.msk.msra.mxu1 %vm927_vm6, %v2609_v32  ;;  %10778 = vmatprep.mubr.msk.f32.mxu1 %vm13513_vm15, %v11310_v1  ;;  %v10952_v32 = vld [vmem:[%s13460_s21 + $0xf8] sm:$0xff]  }
0x11b4   :  { %10786 = vmatprep.subr.mxu1 %v11310_v1 }
0x11b6   :  { %10779 = vmatmul.mubr.msk.f32.vlgmr.msra.gmra.mxu1 %vm927_vm6, %v2607_v46  ;;  %v10953_v46 = vld [vmem:[%s13460_s21 + $0x78] sm:$0xff]  }
0x11b7   :  { %10787 = vmatpush3.msra.mxu1 %v11822_v42  ;;  %10788 = vmatprep.mubr.msk.f32.mxu1 %vm13513_vm15, %v11310_v1 }
0x11b8   :  { %3071 = vmatprep.subr.bf16.mxu1 %v9387_v19  ;;  %v3416_v19 = vld [vmem:[%s13458_s19 + $0x90] sm:$0xff] }
0x11b9   :  { %v9424_v37 = vcombine.high %v3416_v19, %v3417_v36  ;;  %v9423_v38 = vcombine.low %v3416_v19, %v3417_v36  ;;  %v10989_v36 = vld [vmem:[%s13460_s21 + $0x1f8] sm:$0xff]  }
0x1272   :  { %v2527_v50 = vpop.f32.mrf.mxu1 }
0x1273   :  { %10774 = vmatmul.mubr.msk.f32.vlgmr.msra.gmra.mxu0 %vm927_vm6, %v2527_v50 }
0x1274   :  { %v10770_v52 = vpop.f32.mrf.mxu1  ;;  %10783 = vmatprep.mubr.msk.f32.mxu0 %vm13513_vm15, %v11310_v1 }
0x1276   :  { %v2680_v54 = vpop.f32.mrf.mxu1 }
0x1277   :  { %v2681_v55 = vadd.f32 %v2680_v54, %v11829_v44 }
0x1278   :  { %v10780_v42 = vpop.f32.mrf.mxu1 }
0x1279   :  { %v2684_v56 = vsel %vm927_vm6, %v2681_v55, -inf }
0x127a   :  { %2685 = vmax.xlane.f32.xlu1 %v2684_v56 }
0x127e   :  { %2860 = vadd.xlane.f32.xlu1 %v2859_v57 }
0x1303   :  { %v2686_v58 = vpop.xlane.xlu1 %2685 }
0x1304   :  { %v2687_v59 = vsub.f32 %v2681_v55, %v2686_v58 }
0x1306   :  { %v2688_v60 = vmul.f32 1.442695, %v2687_v59 }
0x1308   :  { %11236 = vpow2.f32 %v2688_v60  ;;  %v9378_v60 = vld [vmem:[%s13455_s16] ss:$0 sm:$0xff] }
0x1315   :  { %v11237_v61 = vpop.eup %11236 }
0x1316   :  { %v2690_v62 = vsel %vm927_vm6, %v11237_v61, 0.0 }
0x1317   :  { %2691 = vadd.xlane.f32.xlu0 %v2690_v62 }
0x132d   :  { %2695 = vrot.lane.b32.xlu0 %v11674_v10, %s13474_s1  ;;  %v2861_v10 = vpop.xlane.xlu1 %2860 }
0x132e   :  { %v2866_v11 = vmul.f32 0.03125, %v2861_v10  ;;  %v10961_v10 = vld [vmem:[%s13460_s21 + $0x68] sm:$0xff]  }
0x1330   :  { %v2868_v20 = vsub.f32 %v2855_v16, %v2866_v11  ;;  %v9377_v16 = vld [vmem:[%s13454_s15] ss:$0 sm:$0xff]  ;;  %v10962_v11 = vld [vmem:[%s13460_s21 + $0xa8] sm:$0xff]  }
0x1332   :  { %v2870_v24 = vmul.f32 %v2868_v20, %v2868_v20 }
0x1333   :  { %v2601_v63 = vpop.f32.mrf.mxu0 }
0x1334   :  { %v2605_v0 = vadd.f32 %v2601_v63, %v2363_v30  ;;  %v2872_v25 = vsel %vm13518_vm11, %v2870_v24, 0.0  ;;  %v2905_v30 = vld [vmem:[%s13458_s19 + $0x80] sm:$0xff]  ;;  %v10970_v24 = vld [vmem:[%s13460_s21 + $0x98] sm:$0xff]   ;;  %vm13532_vm11 = vmmov %vm13521_vm0 }
0x1335   :  { %v10775_v2 = vpop.f32.mrf.mxu0 }
0x1336   :  { %v10955_v2 = vld [vmem:[%s13460_s21 + $0x38] sm:$0xff]  }
0x13a0   :  { %v2692_v3 = vpop.xlane.xlu0 %2691 }
0x13a1   :  { %11238 = vrcp.f32 %v2692_v3 }
0x13a4   :  { %v2696_v6 = vpop.permute.xlu0 %2695 }
0x13a5   :  { %10782 = vmatpush3.msra.mxu0 %v2696_v6  ;;  %v10956_v6 = vld [vmem:[%s13460_s21 + $0xf0] sm:$0xff]  }
0x13ae   :  { %v11239_v4 = vpop.eup %11238 }
0x13af   :  { %v2694_v5 = vmul.f32 %v11239_v4, %v11237_v61  ;;  %v10957_v4 = vld [vmem:[%s13460_s21 + $0x70] sm:$0xff]  }
0x13b1   :  { %10784 = vmatmul.mubr.msk.f32.vlgmr.msra.gmra.mxu0 %vm927_vm6, %v2694_v5  ;;  %v10958_v5 = vld [vmem:[%s13460_s21 + $0xb0] sm:$0xff]  }
0x13b2   :  { %2974 = vmatprep.mubr.bf16.mxu0 %v11312_v12 }
0x1471   :  { %v2767_v8 = vpop.f32.mrf.mxu0 }
0x1472   :  { %10789 = vmatmul.mubr.msk.f32.vlgmr.msra.gmra.mxu1 %vm927_vm6, %v2767_v8  ;;  %v10959_v8 = vld [vmem:[%s13460_s21 + $0x30] sm:$0xff]  }
0x1473   :  { %v10785_v9 = vpop.f32.mrf.mxu0  ;;  %3091 = vmatprep.mubr.bf16.mxu1 %v11312_v12  ;;  %3072 = vmatpush1.bf16.msra.mxu1 %v9386_v35  ;;  %v10983_v35 = vld [vmem:[%s13460_s21] sm:$0xff]  }
0x1474   :  { %3073 = vmatprep.subr.bf16.mxu1 %v9385_v45  ;;  %v10960_v9 = vld [vmem:[%s13460_s21 + $0xe8] sm:$0xff]  }
0x1477   :  { %3074 = vmatpush1.bf16.msra.mxu1 %v9384_v43 }
0x1478   :  { %10193 = vmatprep.subr.bf16.mxu1 %v10953_v46 }
0x1532   :  { %v2841_v14 = vpop.f32.mrf.mxu1 }
0x1533   :  { %v2845_v15 = vadd.f32 %v2841_v14, %v2605_v0  ;;  %v10954_v0 = vld [vmem:[%s13460_s21 + $0xb8] sm:$0xff]   ;;  %v10963_v14 = vld [vmem:[%s13460_s21 + $0x28] sm:$0xff]  }
0x1534   :  { %v10790_v18 = vpop.f32.mrf.mxu1 }
0x1535   :  { %v2854_v21 = vadd.f32 %v9376_v49, %v2845_v15  ;;  %v10964_v15 = vld [vmem:[%s13460_s21 + $0xe0] sm:$0xff]  }
0x1536   :  { %v10965_v18 = vld [vmem:[%s13460_s21 + $0x60] sm:$0xff]  }
0x1537   :  { %v2856_v22 = vadd.f32 %v2854_v21, %v11663_v7  ;;  %v2906_v7 = vld [vmem:[%s13458_s19 + $0xc0] sm:$0xff] }
0x1538   :  { %v9382_v13 = vcombine.high %v2905_v30, %v2906_v7  ;;  %v9381_v34 = vcombine.low %v2905_v30, %v2906_v7  ;;  %v10967_v21 = vld [vmem:[%s13460_s21 + $0x20] sm:$0xff]   ;;  %v10977_v30 = vld [vmem:[%s13460_s21 + $0x48] sm:$0xff]  }
0x1539   :  { %v2862_v23 = vsel %vm13517_vm5, %v2856_v22, 0.0  ;;  %v10978_v7 = vld [vmem:[%s13460_s21 + $0x88] sm:$0xff]   ;;  %vm13531_vm5 = vmmov %vm13521_vm0 }
0x153a   :  { %2863 = vadd.xlane.f32.xlu1 %v2862_v23  ;;  %2954 = vmatprep.subr.bf16.mxu0 %v9382_v13  ;;  %v10969_v23 = vld [vmem:[%s13460_s21 + $0x58] sm:$0xff]   ;;  %v10980_v13 = vld [vmem:[%s13460_s21 + $0xc0] sm:$0xff]  }
0x153b   :  { %2955 = vmatpush1.bf16.msra.mxu0 %v9381_v34  ;;  %v10982_v34 = vld [vmem:[%s13460_s21 + $0x80] sm:$0xff]  }
0x153c   :  { %2956 = vmatprep.subr.bf16.mxu0 %v9380_v39  ;;  %v10984_v39 = vld [vmem:[%s13460_s21 + $0x178] sm:$0xff]  }
0x153e   :  { %2873 = vadd.xlane.f32.xlu1 %v2872_v25  ;;  %v10971_v25 = vld [vmem:[%s13460_s21 + $0x18] sm:$0xff]  }
0x153f   :  { %2957 = vmatpush1.bf16.msra.mxu0 %v9379_v41  ;;  %v3027_v41 = vld [vmem:[%s13459_s20 + $0x2] sm:$0x3] }
0x1540   :  { %10171 = vmatprep.subr.bf16.mxu0 %v10952_v32  ;;  %v2916_v32 = vrot.slane %v2907_v40, %v11556_v48  ;;  %v3036_v46 = vrot.slane %v3027_v41, %v11556_v48 }
0x15c3   :  { %v2864_v26 = vpop.xlane.xlu1 %2863 }
0x15c4   :  { %v2867_v51 = vmul.f32 0.03125, %v2864_v26  ;;  %v10972_v26 = vld [vmem:[%s13460_s21 + $0xd0] sm:$0xff]  }
0x15c6   :  { %v2869_v27 = vsub.f32 %v2856_v22, %v2867_v51  ;;  %v10968_v22 = vld [vmem:[%s13460_s21 + $0xd8] sm:$0xff]   ;;  %v10973_v51 = vld [vmem:[%s13460_s21 + $0x50] sm:$0xff]  }
0x15c7   :  { %v2874_v49 = vpop.xlane.xlu1 %2873 }
0x15c8   :  { %v2871_v28 = vmul.f32 %v2869_v27, %v2869_v27  ;;  %v2878_v50 = vmul.f32 0.03125, %v2874_v49  ;;  %v2912_v49 = vrot.slane %v2907_v40, %v11553_v47  ;;  %v10994_v40 = vld [vmem:[%s13460_s21 + $0x120] sm:$0xff]  }
0x15ca   :  { %v2875_v29 = vsel %vm13519_vm7, %v2871_v28, 0.0  ;;  %v2880_v52 = vadd.f32 1e-05, %v2878_v50  ;;  %v10975_v28 = vld [vmem:[%s13460_s21 + $0x10] sm:$0xff]   ;;  %v3032_v50 = vrot.slane %v3027_v41, %v11553_v47  ;;  %vm13533_vm7 = vmmov %vm13521_vm0 }
0x15cb   :  { %2876 = vadd.xlane.f32.xlu1 %v2875_v29  ;;  %v10976_v29 = vld [vmem:[%s13460_s21 + $0xc8] sm:$0xff]   ;;  %v10995_v41 = vld [vmem:[%s13460_s21 + $0x1b0] sm:$0xff]  }
0x15cc   :  { %11240 = vrsqrt.f32 %v2880_v52 }
0x15d9   :  { %v11241_v42 = vpop.eup %11240 }
0x15da   :  { %v2884_v56 = vmul.f32 %v11241_v42, %v2868_v20  ;;  %v10966_v20 = vld [vmem:[%s13460_s21 + $0xa0] sm:$0xff]  }
0x15dc   :  { %v2892_v58 = vmul.f32 %v9377_v16, %v2884_v56 }
0x15de   :  { %v11949_v62 = vadd.f32 %v9378_v60, %v2892_v58 }
0x1654   :  { %v2877_v53 = vpop.xlane.xlu1 %2876 }
0x1655   :  { %v2879_v54 = vmul.f32 0.03125, %v2877_v53 }
0x1657   :  { %v2881_v55 = vadd.f32 1e-05, %v2879_v54 }
0x1659   :  { %11242 = vrsqrt.f32 %v2881_v55 }
0x1666   :  { %v11243_v57 = vpop.eup %11242 }
0x1667   :  { %v2885_v59 = vmul.f32 %v11243_v57, %v2869_v27  ;;  %v10974_v27 = vld [vmem:[%s13460_s21 + $0x90] sm:$0xff]  }
0x1669   :  { %v2893_v61 = vmul.f32 %v9377_v16, %v2885_v59 }
0x166b   :  { %v11951_v63 = vadd.f32 %v9378_v60, %v2893_v61 }
0x166d   :  { %v11961_v3 = vpack.c.bf16 %v11951_v63, %v11949_v62 }
0x166f   :  { %9383 = vmatmul.mubr.msk.bf16.vlgmr.msra.gmra.mxu0 %vm13520_vm8, %v11961_v3  ;;  %9388 = vmatmul.mubr.msk.bf16.vlgmr.msra.gmra.mxu1 %vm13521_vm0, %v11961_v3  ;;  %vm13539_vm8 = vmmov %vm13521_vm0 }
0x1670   :  { %10172 = vmatpush3.bf16.msra.mxu0 %v10954_v0  ;;  %10194 = vmatpush3.bf16.msra.mxu1 %v10955_v2 }
0x1671   :  { %10173 = vmatprep.subr.bf16.mxu0 %v10956_v6  ;;  %10195 = vmatprep.subr.bf16.mxu1 %v10957_v4 }
0x1674   :  { %10174 = vmatpush3.bf16.msra.mxu0 %v10958_v5  ;;  %10196 = vmatpush3.bf16.msra.mxu1 %v10959_v8 }
0x1675   :  { %10175 = vmatprep.subr.bf16.mxu0 %v10960_v9  ;;  %10197 = vmatprep.subr.bf16.mxu1 %v10961_v10 }
0x1678   :  { %10176 = vmatpush3.bf16.msra.mxu0 %v10962_v11  ;;  %10198 = vmatpush3.bf16.msra.mxu1 %v10963_v14  ;;  %v3414_v11 = vld [vmem:[%s13458_s19 + $0x10] sm:$0xff] }
0x1679   :  { %10177 = vmatprep.subr.bf16.mxu0 %v10964_v15  ;;  %10199 = vmatprep.subr.bf16.mxu1 %v10965_v18  ;;  %v3415_v14 = vld [vmem:[%s13458_s19 + $0x50] sm:$0xff] }
0x167c   :  { %10178 = vmatpush3.bf16.msra.mxu0 %v10966_v20  ;;  %10200 = vmatpush3.bf16.msra.mxu1 %v10967_v21 }
0x167d   :  { %10179 = vmatprep.subr.bf16.mxu0 %v10968_v22  ;;  %10201 = vmatprep.subr.bf16.mxu1 %v10969_v23 }
0x1680   :  { %10180 = vmatpush3.bf16.msra.mxu0 %v10970_v24  ;;  %10202 = vmatpush3.bf16.msra.mxu1 %v10971_v25  ;;  %v9422_v24 = vcombine.high %v3414_v11, %v3415_v14  ;;  %v10985_v25 = vld [vmem:[%s13460_s21 + $0x138] sm:$0xff]  }
0x1681   :  { %10181 = vmatprep.subr.bf16.mxu0 %v10972_v26  ;;  %10203 = vmatprep.subr.bf16.mxu1 %v10973_v51  ;;  %v3672_v26 = vld [vmem:[%s13458_s19 + $0x98] sm:$0xff] }
0x1682   :  { %v3673_v51 = vld [vmem:[%s13458_s19 + $0xd8] sm:$0xff] }
0x1684   :  { %10182 = vmatpush3.bf16.msra.mxu0 %v10974_v27  ;;  %10204 = vmatpush3.bf16.msra.mxu1 %v10975_v28  ;;  %v10986_v27 = vld [vmem:[%s13460_s21 + $0x170] sm:$0xff]   ;;  %v9421_v28 = vcombine.low %v3414_v11, %v3415_v14 }
0x1685   :  { %10183 = vmatprep.subr.bf16.mxu0 %v10976_v29  ;;  %10205 = vmatprep.subr.bf16.mxu1 %v10977_v30  ;;  %v9445_v29 = vcombine.high %v3672_v26, %v3673_v51  ;;  %v10987_v30 = vld [vmem:[%s13460_s21 + $0x130] sm:$0xff]  }
0x1688   :  { %10184 = vmatpush3.bf16.msra.mxu0 %v10978_v7  ;;  %10206 = vmatpush3.bf16.msra.mxu1 %v10979_v31  ;;  %v3670_v7 = vld [vmem:[%s13458_s19 + $0x18] sm:$0xff] }
0x1689   :  { %10185 = vmatprep.subr.bf16.mxu0 %v10980_v13  ;;  %10207 = vmatprep.subr.bf16.mxu1 %v10981_v33  ;;  %v3671_v31 = vld [vmem:[%s13458_s19 + $0x58] sm:$0xff]  ;;  %v10988_v13 = vld [vmem:[%s13460_s21 + $0x168] sm:$0xff]   ;;  %v9444_v33 = vcombine.low %v3672_v26, %v3673_v51 }
0x168a   :  { %v9442_v19 = vcombine.low %v3670_v7, %v3671_v31 }
0x168c   :  { %10186 = vmatpush3.bf16.msra.mxu0 %v10982_v34  ;;  %10208 = vmatpush3.bf16.msra.mxu1 %v10983_v35  ;;  %v9443_v34 = vcombine.high %v3670_v7, %v3671_v31  ;;  %v10990_v35 = vld [vmem:[%s13460_s21 + $0x128] sm:$0xff]  }
0x168d   :  { %3462 = vmatprep.subr.bf16.mxu0 %v9424_v37  ;;  %10215 = vmatprep.subr.bf16.mxu1 %v10984_v39  ;;  %v10991_v37 = vld [vmem:[%s13460_s21 + $0x1b8] sm:$0xff]   ;;  %v10993_v39 = vld [vmem:[%s13460_s21 + $0x1f0] sm:$0xff]  }
0x172f   :  { %v2976_v43 = vpop.f32.mrf.mxu0  ;;  %v3093_v45 = vpop.f32.mrf.mxu1 }
0x1730   :  { %v2977_v58 = vadd.f32 %v2976_v43, %v2912_v49  ;;  %v3094_v59 = vadd.f32 %v3093_v45, %v3032_v50  ;;  %v10996_v43 = vld [vmem:[%s13460_s21 + $0x158] sm:$0xff]   ;;  %v10997_v45 = vld [vmem:[%s13460_s21 + $0x1e8] sm:$0xff]  }
0x1731   :  { %v2978_v52 = vpop.f32.mrf.mxu0  ;;  %v3095_v53 = vpop.f32.mrf.mxu1 }
0x1732   :  { %v2979_v42 = vadd.f32 %v2978_v52, %v2916_v32  ;;  %v3096_v56 = vadd.f32 %v3095_v53, %v3036_v46  ;;  %v2985_v15 = vmax.f32 %v2977_v58, 0.0  ;;  %v3102_v18 = vmax.f32 %v3094_v59, 0.0  ;;  %v11002_v52 = vld [vmem:[%s13460_s21 + $0x110] sm:$0xff]   ;;  %v11003_v53 = vld [vmem:[%s13460_s21 + $0x1a0] sm:$0xff]  }
0x1733   :  { %v2980_v54 = vpop.f32.mrf.mxu0  ;;  %v3097_v55 = vpop.f32.mrf.mxu1  ;;  %v11010_v58 = vld [vmem:[%s13460_s21 + $0x100] sm:$0xff]   ;;  %v11011_v59 = vld [vmem:[%s13460_s21 + $0x190] sm:$0xff]  }
0x1734   :  { %v2981_v16 = vadd.f32 %v2980_v54, %v2912_v49  ;;  %v3098_v57 = vadd.f32 %v3097_v55, %v3032_v50  ;;  %v2986_v5 = vmax.f32 %v2979_v42, 0.0  ;;  %v3103_v8 = vmax.f32 %v3096_v56, 0.0  ;;  %v11000_v49 = vld [vmem:[%s13460_s21 + $0x150] sm:$0xff]   ;;  %v11001_v50 = vld [vmem:[%s13460_s21 + $0x1e0] sm:$0xff]   ;;  %v11004_v54 = vld [vmem:[%s13460_s21 + $0x148] sm:$0xff]  }
0x1735   :  { %v2982_v60 = vpop.f32.mrf.mxu0  ;;  %v3099_v61 = vpop.f32.mrf.mxu1  ;;  %v11005_v55 = vld [vmem:[%s13460_s21 + $0x1d8] sm:$0xff]   ;;  %v11006_v42 = vld [vmem:[%s13460_s21 + $0x108] sm:$0xff]  }
0x1736   :  { %v2983_v0 = vadd.f32 %v2982_v60, %v2916_v32  ;;  %v3100_v2 = vadd.f32 %v3099_v61, %v3036_v46  ;;  %v2987_v6 = vmax.f32 %v2981_v16, 0.0  ;;  %v3104_v4 = vmax.f32 %v3098_v57, 0.0  ;;  %v10998_v32 = vld [vmem:[%s13460_s21 + $0x118] sm:$0xff]   ;;  %v10999_v46 = vld [vmem:[%s13460_s21 + $0x1a8] sm:$0xff]   ;;  %v11008_v16 = vld [vmem:[%s13460_s21 + $0x140] sm:$0xff]  }
0x1737   :  { %v11007_v56 = vld [vmem:[%s13460_s21 + $0x198] sm:$0xff]   ;;  %v11009_v57 = vld [vmem:[%s13460_s21 + $0x1d0] sm:$0xff]   ;;  %v12178_v60 = vld [vmem:[%s13458_s19 + $0xa0] sm:$0xff] }
0x1738   :  { %v2988_v9 = vmax.f32 %v2983_v0, 0.0  ;;  %v3105_v10 = vmax.f32 %v3100_v2, 0.0  ;;  %v2989_v22 = vpack.c.bf16 %v2987_v6, %v2985_v15  ;;  %v3106_v23 = vpack.c.bf16 %v3104_v4, %v3102_v18  ;;  %v12183_v61 = vld [vmem:[%s13458_s19 + $0xe0] sm:$0xff]  ;;  %v11012_v0 = vld [vmem:[%s13460_s21 + $0x1c8] sm:$0xff]  }
0x1739   :  { %v9466_v2 = vcombine.high %v12178_v60, %v12183_v61  ;;  %v9465_v6 = vcombine.low %v12178_v60, %v12183_v61  ;;  %v11013_v4 = vld [vmem:[%s13460_s21 + $0x188] sm:$0xff]  }
0x173a   :  { %v2990_v20 = vpack.c.bf16 %v2988_v9, %v2986_v5  ;;  %v3107_v21 = vpack.c.bf16 %v3105_v10, %v3103_v8  ;;  %v11014_v5 = vld [vmem:[%s13460_s21 + $0x1c0] sm:$0xff]   ;;  %v12204_v9 = vld [vmem:[%s13458_s19 + $0xa8] sm:$0xff] }
0x173b   :  { %v11015_v8 = vld [vmem:[%s13460_s21 + $0x180] sm:$0xff]   ;;  %v12209_v10 = vld [vmem:[%s13458_s19 + $0xe8] sm:$0xff] }
0x173c   :  { %3268 = vmatprep.mubr.bf16.mxu0 %v3107_v21  ;;  %3405 = vmatprep.mubr.bf16.mxu1 %v2990_v20  ;;  %v9487_v11 = vcombine.high %v12204_v9, %v12209_v10  ;;  %v9486_v14 = vcombine.low %v12204_v9, %v12209_v10  ;;  %v11023_v9 = vld [vmem:[%s13460_s21 + $0x2b8] sm:$0xff]   ;;  %v11022_v10 = vld [vmem:[%s13460_s21 + $0x228] sm:$0xff]  }
0x173d   :  { %3269 = vmatmul.mubr.bf16.vlgmr.msra.gmra.mxu0 %v3106_v23  ;;  %3406 = vmatmul.mubr.bf16.vlgmr.msra.gmra.mxu1 %v2989_v22 }
0x173e   :  { %3463 = vmatpush1.bf16.msra.mxu0 %v9423_v38  ;;  %3482 = vmatprep.mubr.bf16.mxu0 %v11312_v12  ;;  %v10992_v38 = vld [vmem:[%s13460_s21 + $0x160] sm:$0xff]  }
0x173f   :  { %3464 = vmatprep.subr.bf16.mxu0 %v9422_v24  ;;  %10216 = vmatpush3.bf16.msra.mxu1 %v10985_v25 }
0x1740   :  { %10217 = vmatprep.subr.bf16.mxu1 %v10986_v27 }
0x1742   :  { %3465 = vmatpush1.bf16.msra.mxu0 %v9421_v28 }
0x1743   :  { %3718 = vmatprep.subr.bf16.mxu0 %v9445_v29  ;;  %10218 = vmatpush3.bf16.msra.mxu1 %v10987_v30  ;;  %v3418_v30 = vld [vmem:[%s13459_s20 + $0x4] sm:$0x3] }
0x1744   :  { %10219 = vmatprep.subr.bf16.mxu1 %v10988_v13  ;;  %v3427_v13 = vrot.slane %v3418_v30, %v11556_v48 }
0x1745   :  { %9425 = vmatmul.mubr.msk.bf16.vlgmr.msra.gmra.mxu0 %vm13522_vm1, %v11961_v3  ;;  %vm13542_vm1 = vmmov %vm13521_vm0 }
0x1746   :  { %3719 = vmatpush1.bf16.msra.mxu0 %v9444_v33  ;;  %3738 = vmatprep.mubr.bf16.mxu0 %v11312_v12  ;;  %v3423_v33 = vrot.slane %v3418_v30, %v11553_v47  ;;  %v11027_v30 = vld [vmem:[%s13460_s21 + $0x2b0] sm:$0xff]  }
0x1747   :  { %3720 = vmatprep.subr.bf16.mxu0 %v9443_v34  ;;  %10220 = vmatpush3.bf16.msra.mxu1 %v10990_v35 }
0x1748   :  { %10221 = vmatprep.subr.bf16.mxu1 %v10992_v38 }
0x174a   :  { %3721 = vmatpush1.bf16.msra.mxu0 %v9442_v19 }
0x174b   :  { %10237 = vmatprep.subr.bf16.mxu0 %v10989_v36  ;;  %10222 = vmatpush3.bf16.msra.mxu1 %v10994_v40  ;;  %v3674_v40 = vld [vmem:[%s13459_s20 + $0x6] sm:$0x3] }
0x174c   :  { %10223 = vmatprep.subr.bf16.mxu1 %v10996_v43 }
0x174d   :  { %9446 = vmatmul.mubr.msk.bf16.vlgmr.msra.gmra.mxu0 %vm13523_vm9, %v11961_v3  ;;  %vm13543_vm9 = vmmov %vm13521_vm0 }
0x174e   :  { %10238 = vmatpush3.bf16.msra.mxu0 %v10991_v37 }
0x174f   :  { %10239 = vmatprep.subr.bf16.mxu0 %v10993_v39  ;;  %10224 = vmatpush3.bf16.msra.mxu1 %v10998_v32 }
0x1750   :  { %10225 = vmatprep.subr.bf16.mxu1 %v11000_v49  ;;  %v3926_v49 = vld [vmem:[%s13458_s19 + $0x20] sm:$0xff] }
0x1752   :  { %10240 = vmatpush3.bf16.msra.mxu0 %v10995_v41 }
0x1753   :  { %10241 = vmatprep.subr.bf16.mxu0 %v10997_v45  ;;  %10226 = vmatpush3.bf16.msra.mxu1 %v11002_v52 }
0x1754   :  { %10227 = vmatprep.subr.bf16.mxu1 %v11004_v54 }
0x1756   :  { %10242 = vmatpush3.bf16.msra.mxu0 %v10999_v46  ;;  %v3683_v46 = vrot.slane %v3674_v40, %v11556_v48 }
0x1757   :  { %10243 = vmatprep.subr.bf16.mxu0 %v11001_v50  ;;  %10228 = vmatpush3.bf16.msra.mxu1 %v11006_v42  ;;  %v3927_v50 = vld [vmem:[%s13458_s19 + $0x60] sm:$0xff] }
0x1758   :  { %10229 = vmatprep.subr.bf16.mxu1 %v11008_v16  ;;  %v9464_v16 = vcombine.high %v3926_v49, %v3927_v50 }
0x175a   :  { %10244 = vmatpush3.bf16.msra.mxu0 %v11003_v53  ;;  %v3679_v53 = vrot.slane %v3674_v40, %v11553_v47  ;;  %v11038_v40 = vld [vmem:[%s13460_s21 + $0x208] sm:$0xff]  }
0x175b   :  { %10245 = vmatprep.subr.bf16.mxu0 %v11005_v55  ;;  %10230 = vmatpush3.bf16.msra.mxu1 %v11010_v58 }
0x175c   :  { %3974 = vmatprep.subr.bf16.mxu1 %v9466_v2 }
0x175e   :  { %10246 = vmatpush3.bf16.msra.mxu0 %v11007_v56 }
0x175f   :  { %10247 = vmatprep.subr.bf16.mxu0 %v11009_v57 }
0x1762   :  { %10248 = vmatpush3.bf16.msra.mxu0 %v11011_v59 }
0x1763   :  { %10249 = vmatprep.subr.bf16.mxu0 %v11012_v0  ;;  %v9463_v0 = vcombine.low %v3926_v49, %v3927_v50  ;;  %v12337_v49 = vld [vmem:[%s13458_s19 + $0xb0] sm:$0xff] }
0x1764   :  { %v12342_v50 = vld [vmem:[%s13458_s19 + $0xf0] sm:$0xff] }
0x1766   :  { %10250 = vmatpush3.bf16.msra.mxu0 %v11013_v4  ;;  %v11016_v4 = vld [vmem:[%s13460_s21 + $0x278] sm:$0xff]  }
0x1767   :  { %10251 = vmatprep.subr.bf16.mxu0 %v11014_v5 }
0x176a   :  { %10252 = vmatpush3.bf16.msra.mxu0 %v11015_v8 }
0x176b   :  { %4230 = vmatprep.subr.bf16.mxu0 %v9487_v11  ;;  %v4182_v11 = vld [vmem:[%s13458_s19 + $0x28] sm:$0xff] }
0x17fd   :  { %v10187_v15 = vpop.f32.mrf.mxu0  ;;  %v10209_v18 = vpop.f32.mrf.mxu1 }
0x17ff   :  { %v10188_v20 = vpop.f32.mrf.mxu0  ;;  %v10210_v21 = vpop.f32.mrf.mxu1 }
0x1800   :  { %v10189_v22 = vadd.f32 %v10188_v20, %v10187_v15  ;;  %v10211_v23 = vadd.f32 %v10210_v21, %v10209_v18  ;;  %v4183_v15 = vld [vmem:[%s13458_s19 + $0x68] sm:$0xff] }
0x1801   :  { %v10190_v24 = vpop.f32.mrf.mxu0  ;;  %v10212_v25 = vpop.f32.mrf.mxu1  ;;  %v9485_v21 = vcombine.high %v4182_v11, %v4183_v15 }
0x1802   :  { %v12215_v26 = vadd.f32 %v10211_v23, %v10189_v22  ;;  %v11017_v22 = vld [vmem:[%s13460_s21 + $0x238] sm:$0xff]   ;;  %v11018_v23 = vld [vmem:[%s13460_s21 + $0x270] sm:$0xff]  }
0x1803   :  { %v10191_v51 = vpop.f32.mrf.mxu0  ;;  %v10213_v27 = vpop.f32.mrf.mxu1 }
0x1804   :  { %v10192_v28 = vadd.f32 %v10191_v51, %v10190_v24  ;;  %v10214_v29 = vadd.f32 %v10213_v27, %v10212_v25  ;;  %v9484_v24 = vcombine.low %v4182_v11, %v4183_v15  ;;  %v11019_v25 = vld [vmem:[%s13460_s21 + $0x230] sm:$0xff]   ;;  %v11021_v51 = vld [vmem:[%s13460_s21 + $0x2f8] sm:$0xff]   ;;  %v11020_v27 = vld [vmem:[%s13460_s21 + $0x268] sm:$0xff]  }
0x1805   :  { %v3484_v7 = vpop.f32.mrf.mxu0  ;;  %v3930_v11 = vld [vmem:[%s13459_s20 + $0x8] sm:$0x3] }
0x1806   :  { %v12220_v31 = vadd.f32 %v10214_v29, %v10192_v28  ;;  %v3485_v37 = vadd.f32 %v3484_v7, %v3423_v33  ;;  %v11025_v28 = vld [vmem:[%s13460_s21 + $0x2f0] sm:$0xff]   ;;  %v11026_v29 = vld [vmem:[%s13460_s21 + $0x220] sm:$0xff]   ;;  %v11028_v7 = vld [vmem:[%s13460_s21 + $0x258] sm:$0xff]  }
0x1807   :  { %v3486_v34 = vpop.f32.mrf.mxu0 }
0x1808   :  { %v3487_v19 = vadd.f32 %v3486_v34, %v3427_v13  ;;  %v3493_v52 = vmax.f32 %v3485_v37, 0.0  ;;  %v11031_v34 = vld [vmem:[%s13460_s21 + $0x2a8] sm:$0xff]   ;;  %v11035_v37 = vld [vmem:[%s13460_s21 + $0x2a0] sm:$0xff]  }
0x1809   :  { %v3488_v35 = vpop.f32.mrf.mxu0 }
0x180a   :  { %v3489_v36 = vadd.f32 %v3488_v35, %v3423_v33  ;;  %v3494_v45 = vmax.f32 %v3487_v19, 0.0  ;;  %v11030_v33 = vld [vmem:[%s13460_s21 + $0x218] sm:$0xff]   ;;  %v11032_v35 = vld [vmem:[%s13460_s21 + $0x250] sm:$0xff]   ;;  %v11033_v19 = vld [vmem:[%s13460_s21 + $0x2e0] sm:$0xff]  }
0x180b   :  { %v3490_v38 = vpop.f32.mrf.mxu0 }
0x180c   :  { %v3491_v39 = vadd.f32 %v3490_v38, %v3427_v13  ;;  %v3495_v41 = vmax.f32 %v3489_v36, 0.0  ;;  %v11029_v13 = vld [vmem:[%s13460_s21 + $0x2e8] sm:$0xff]   ;;  %v11034_v36 = vld [vmem:[%s13460_s21 + $0x210] sm:$0xff]  }
0x180d   :  { %v3740_v43 = vpop.f32.mrf.mxu0  ;;  %v11036_v38 = vld [vmem:[%s13460_s21 + $0x248] sm:$0xff]  }
0x180e   :  { %v3496_v32 = vmax.f32 %v3491_v39, 0.0  ;;  %v3497_v42 = vpack.c.bf16 %v3495_v41, %v3493_v52  ;;  %v3741_v59 = vadd.f32 %v3740_v43, %v3679_v53  ;;  %v11037_v39 = vld [vmem:[%s13460_s21 + $0x2d8] sm:$0xff]   ;;  %v11040_v43 = vld [vmem:[%s13460_s21 + $0x240] sm:$0xff]   ;;  %v11044_v52 = vld [vmem:[%s13460_s21 + $0x2c8] sm:$0xff]  }
0x180f   :  { %v3742_v54 = vpop.f32.mrf.mxu0  ;;  %v11039_v41 = vld [vmem:[%s13460_s21 + $0x298] sm:$0xff]  }
0x1810   :  { %v3498_v55 = vpack.c.bf16 %v3496_v32, %v3494_v45  ;;  %v3743_v57 = vadd.f32 %v3742_v54, %v3683_v46  ;;  %v11041_v45 = vld [vmem:[%s13460_s21 + $0x2d0] sm:$0xff]   ;;  %v11042_v32 = vld [vmem:[%s13460_s21 + $0x200] sm:$0xff]   ;;  %v9507_v54 = vcombine.low %v12337_v49, %v12342_v50 }
0x1811   :  { %v3744_v56 = vpop.f32.mrf.mxu0 }
0x1812   :  { %v3745_v58 = vadd.f32 %v3744_v56, %v3679_v53  ;;  %3659 = vmatprep.mubr.bf16.mxu1 %v3498_v55  ;;  %v3750_v5 = vmax.f32 %v3743_v57, 0.0  ;;  %v9508_v53 = vcombine.high %v12337_v49, %v12342_v50  ;;  %v11045_v55 = vld [vmem:[%s13460_s21 + $0x288] sm:$0xff]   ;;  %v11047_v56 = vld [vmem:[%s13460_s21 + $0x280] sm:$0xff]   ;;  %v12368_v57 = vld [vmem:[%s13458_s19 + $0xf8] sm:$0xff] }
0x1813   :  { %3660 = vmatmul.mubr.bf16.vlgmr.msra.gmra.mxu1 %v3497_v42  ;;  %v3746_v60 = vpop.f32.mrf.mxu0  ;;  %v11046_v42 = vld [vmem:[%s13460_s21 + $0x2c0] sm:$0xff]   ;;  %v4695_v49 = vld [vmem:[%s13458_s19 + $0x78] sm:$0xff] }
0x1814   :  { %v3747_v61 = vadd.f32 %v3746_v60, %v3683_v46  ;;  %3975 = vmatpush1.bf16.msra.mxu1 %v9465_v6  ;;  %3994 = vmatprep.mubr.bf16.mxu1 %v11312_v12  ;;  %v3751_v2 = vmax.f32 %v3745_v58, 0.0  ;;  %v3749_v6 = vmax.f32 %v3741_v59, 0.0  ;;  %v11043_v46 = vld [vmem:[%s13460_s21 + $0x290] sm:$0xff]  }
0x1815   :  { %3976 = vmatprep.subr.bf16.mxu1 %v9464_v16  ;;  %v12363_v16 = vld [vmem:[%s13458_s19 + $0xb8] sm:$0xff] }
0x1816   :  { %v3752_v8 = vmax.f32 %v3747_v61, 0.0  ;;  %v3753_v20 = vpack.c.bf16 %v3751_v2, %v3749_v6  ;;  %v9529_v58 = vcombine.high %v12363_v16, %v12368_v57  ;;  %v9528_v59 = vcombine.low %v12363_v16, %v12368_v57  ;;  %v11055_v16 = vld [vmem:[%s13460_s21 + $0x3b8] sm:$0xff]   ;;  %v11054_v57 = vld [vmem:[%s13460_s21 + $0x328] sm:$0xff]  }
0x1818   :  { %v3754_v18 = vpack.c.bf16 %v3752_v8, %v3750_v5  ;;  %3977 = vmatpush1.bf16.msra.mxu1 %v9463_v0 }
0x1819   :  { %10259 = vmatprep.subr.bf16.mxu1 %v11016_v4 }
0x181a   :  { %3915 = vmatprep.mubr.bf16.mxu0 %v3754_v18 }
0x181b   :  { %3916 = vmatmul.mubr.bf16.vlgmr.msra.gmra.mxu0 %v3753_v20  ;;  %9467 = vmatmul.mubr.msk.bf16.vlgmr.msra.gmra.mxu1 %vm13524_vm10, %v11961_v3  ;;  %v3939_v20 = vrot.slane %v3930_v11, %v11556_v48  ;;  %vm13544_vm10 = vmmov %vm13521_vm0 }
0x181c   :  { %4231 = vmatpush1.bf16.msra.mxu0 %v9486_v14  ;;  %4250 = vmatprep.mubr.bf16.mxu0 %v11312_v12  ;;  %v11024_v14 = vld [vmem:[%s13460_s21 + $0x260] sm:$0xff]  }
0x181d   :  { %4232 = vmatprep.subr.bf16.mxu0 %v9485_v21  ;;  %10260 = vmatpush3.bf16.msra.mxu1 %v11017_v22  ;;  %v3935_v21 = vrot.slane %v3930_v11, %v11553_v47  ;;  %v11050_v11 = vld [vmem:[%s13460_s21 + $0x370] sm:$0xff]  }
0x181e   :  { %10261 = vmatprep.subr.bf16.mxu1 %v11018_v23 }
0x1820   :  { %4233 = vmatpush1.bf16.msra.mxu0 %v9484_v24 }
0x1821   :  { %10262 = vmatpush3.bf16.msra.mxu1 %v11019_v25  ;;  %10281 = vmatprep.subr.bf16.mxu0 %v11021_v51 }
0x1822   :  { %10263 = vmatprep.subr.bf16.mxu1 %v11020_v27 }
0x1823   :  { %9488 = vmatmul.mubr.msk.bf16.vlgmr.msra.gmra.mxu0 %vm13525_vm12, %v11961_v3  ;;  %vm13545_vm12 = vmmov %vm13521_vm0 }
0x1824   :  { %10282 = vmatpush3.bf16.msra.mxu0 %v11023_v9 }
0x1825   :  { %10264 = vmatpush3.bf16.msra.mxu1 %v11022_v10  ;;  %10283 = vmatprep.subr.bf16.mxu0 %v11025_v28 }
0x1826   :  { %10265 = vmatprep.subr.bf16.mxu1 %v11024_v14 }
0x1828   :  { %10284 = vmatpush3.bf16.msra.mxu0 %v11027_v30 }
0x1829   :  { %10266 = vmatpush3.bf16.msra.mxu1 %v11026_v29  ;;  %10285 = vmatprep.subr.bf16.mxu0 %v11029_v13 }
0x182a   :  { %10267 = vmatprep.subr.bf16.mxu1 %v11028_v7 }
0x182c   :  { %10286 = vmatpush3.bf16.msra.mxu0 %v11031_v34 }
0x182d   :  { %10268 = vmatpush3.bf16.msra.mxu1 %v11030_v33  ;;  %10287 = vmatprep.subr.bf16.mxu0 %v11033_v19 }
0x182e   :  { %10269 = vmatprep.subr.bf16.mxu1 %v11032_v35 }
0x1830   :  { %10288 = vmatpush3.bf16.msra.mxu0 %v11035_v37  ;;  %v4439_v37 = vld [vmem:[%s13458_s19 + $0x70] sm:$0xff] }
0x1831   :  { %10270 = vmatpush3.bf16.msra.mxu1 %v11034_v36  ;;  %10289 = vmatprep.subr.bf16.mxu0 %v11037_v39  ;;  %v4438_v36 = vld [vmem:[%s13458_s19 + $0x30] sm:$0xff] }
0x1832   :  { %10271 = vmatprep.subr.bf16.mxu1 %v11036_v38 }
0x1834   :  { %10290 = vmatpush3.bf16.msra.mxu0 %v11039_v41 }
0x1835   :  { %10272 = vmatpush3.bf16.msra.mxu1 %v11038_v40  ;;  %10291 = vmatprep.subr.bf16.mxu0 %v11041_v45 }
0x1836   :  { %10273 = vmatprep.subr.bf16.mxu1 %v11040_v43 }
0x1838   :  { %10292 = vmatpush3.bf16.msra.mxu0 %v11043_v46 }
0x1839   :  { %10274 = vmatpush3.bf16.msra.mxu1 %v11042_v32  ;;  %10293 = vmatprep.subr.bf16.mxu0 %v11044_v52  ;;  %v9506_v32 = vcombine.high %v4438_v36, %v4439_v37 }
0x183a   :  { %4486 = vmatprep.subr.bf16.mxu1 %v9508_v53 }
0x183c   :  { %10294 = vmatpush3.bf16.msra.mxu0 %v11045_v55 }
0x183d   :  { %10295 = vmatprep.subr.bf16.mxu0 %v11046_v42 }
0x1840   :  { %10296 = vmatpush3.bf16.msra.mxu0 %v11047_v56  ;;  %v9505_v56 = vcombine.low %v4438_v36, %v4439_v37  ;;  %v11077_v36 = vld [vmem:[%s13460_s21 + $0x388] sm:$0xff]   ;;  %v11078_v37 = vld [vmem:[%s13460_s21 + $0x3c0] sm:$0xff]  }
0x1841   :  { %4742 = vmatprep.subr.bf16.mxu0 %v9529_v58 }
0x18d3   :  { %v10231_v60 = vpop.f32.mrf.mxu1 }
0x18d5   :  { %v10232_v61 = vpop.f32.mrf.mxu1 }
0x18d6   :  { %v10233_v0 = vadd.f32 %v10232_v61, %v10231_v60  ;;  %v11048_v60 = vld [vmem:[%s13460_s21 + $0x378] sm:$0xff]  }
0x18d7   :  { %v10234_v2 = vpop.f32.mrf.mxu1 }
0x18d8   :  { %v3668_v4 = vadd.f32 %v10233_v0, %v12215_v26 }
0x18d9   :  { %v10235_v5 = vpop.f32.mrf.mxu1 }
0x18da   :  { %v10236_v8 = vadd.f32 %v10235_v5, %v10234_v2  ;;  %v4694_v2 = vld [vmem:[%s13458_s19 + $0x38] sm:$0xff] }
0x18db   :  { %v10253_v15 = vpop.f32.mrf.mxu0  ;;  %v3996_v6 = vpop.f32.mrf.mxu1  ;;  %v9527_v5 = vcombine.high %v4694_v2, %v4695_v49 }
0x18dc   :  { %v3669_v18 = vadd.f32 %v10236_v8, %v12220_v31  ;;  %v3997_v10 = vadd.f32 %v3996_v6, %v3935_v21  ;;  %v4186_v31 = vld [vmem:[%s13459_s20 + $0xa] sm:$0x3]  ;;  %v11049_v8 = vld [vmem:[%s13460_s21 + $0x338] sm:$0xff]   ;;  %v11051_v6 = vld [vmem:[%s13460_s21 + $0x330] sm:$0xff]  }
0x18dd   :  { %v10254_v22 = vpop.f32.mrf.mxu0  ;;  %v3998_v23 = vpop.f32.mrf.mxu1  ;;  %v4195_v19 = vrot.slane %v4186_v31, %v11556_v48  ;;  %v4191_v39 = vrot.slane %v4186_v31, %v11553_v47  ;;  %v11071_v31 = vld [vmem:[%s13460_s21 + $0x398] sm:$0xff]  }
0x18de   :  { %v10255_v24 = vadd.f32 %v10254_v22, %v10253_v15  ;;  %v3999_v27 = vadd.f32 %v3998_v23, %v3939_v20  ;;  %v4005_v38 = vmax.f32 %v3997_v10, 0.0  ;;  %v9526_v15 = vcombine.low %v4694_v2, %v4695_v49  ;;  %v11058_v22 = vld [vmem:[%s13460_s21 + $0x320] sm:$0xff]   ;;  %v11059_v23 = vld [vmem:[%s13460_s21 + $0x3b0] sm:$0xff]  }
0x18df   :  { %v10256_v25 = vpop.f32.mrf.mxu0  ;;  %v4000_v51 = vpop.f32.mrf.mxu1  ;;  %v11066_v10 = vld [vmem:[%s13460_s21 + $0x310] sm:$0xff]  }
0x18e0   :  { %v12381_v26 = vadd.f32 %v10255_v24, %v3668_v4  ;;  %v4001_v9 = vadd.f32 %v4000_v51, %v3935_v21  ;;  %v4006_v33 = vmax.f32 %v3999_v27, 0.0  ;;  %v11057_v21 = vld [vmem:[%s13460_s21 + $0x3f0] sm:$0xff]   ;;  %v11061_v24 = vld [vmem:[%s13460_s21 + $0x3e8] sm:$0xff]  }
0x18e1   :  { %v10257_v14 = vpop.f32.mrf.mxu0  ;;  %v4002_v28 = vpop.f32.mrf.mxu1  ;;  %v11063_v51 = vld [vmem:[%s13460_s21 + $0x3a8] sm:$0xff]   ;;  %v11064_v27 = vld [vmem:[%s13460_s21 + $0x350] sm:$0xff]  }
0x18e2   :  { %v10258_v29 = vadd.f32 %v10257_v14, %v10256_v25  ;;  %v4003_v30 = vadd.f32 %v4002_v28, %v3939_v20  ;;  %v4007_v7 = vmax.f32 %v4001_v9, 0.0  ;;  %v11052_v20 = vld [vmem:[%s13460_s21 + $0x368] sm:$0xff]   ;;  %v11062_v25 = vld [vmem:[%s13460_s21 + $0x318] sm:$0xff]   ;;  %v11065_v9 = vld [vmem:[%s13460_s21 + $0x3e0] sm:$0xff]  }
0x18e3   :  { %v4252_v13 = vpop.f32.mrf.mxu0  ;;  %v11067_v14 = vld [vmem:[%s13460_s21 + $0x3a0] sm:$0xff]   ;;  %v11068_v28 = vld [vmem:[%s13460_s21 + $0x348] sm:$0xff]  }
0x18e4   :  { %v12386_v34 = vadd.f32 %v10258_v29, %v3669_v18  ;;  %v4008_v35 = vmax.f32 %v4003_v30, 0.0  ;;  %v4009_v43 = vpack.c.bf16 %v4007_v7, %v4005_v38  ;;  %v4253_v53 = vadd.f32 %v4252_v13, %v4191_v39  ;;  %v11053_v18 = vld [vmem:[%s13460_s21 + $0x3f8] sm:$0xff]   ;;  %v11070_v30 = vld [vmem:[%s13460_s21 + $0x308] sm:$0xff]   ;;  %v11072_v7 = vld [vmem:[%s13460_s21 + $0x340] sm:$0xff]  }
0x18e5   :  { %v4254_v40 = vpop.f32.mrf.mxu0  ;;  %v11069_v29 = vld [vmem:[%s13460_s21 + $0x3d8] sm:$0xff]   ;;  %v11073_v13 = vld [vmem:[%s13460_s21 + $0x3d0] sm:$0xff]   ;;  %v11079_v38 = vld [vmem:[%s13460_s21 + $0x380] sm:$0xff]  }
0x18e6   :  { %v4010_v41 = vpack.c.bf16 %v4008_v35, %v4006_v33  ;;  %v4255_v46 = vadd.f32 %v4254_v40, %v4195_v19  ;;  %v4261_v50 = vmax.f32 %v4253_v53, 0.0  ;;  %v11074_v33 = vld [vmem:[%s13460_s21 + $0x300] sm:$0xff]   ;;  %v11075_v35 = vld [vmem:[%s13460_s21 + $0x390] sm:$0xff]  }
0x18e7   :  { %v4256_v45 = vpop.f32.mrf.mxu0 }
0x18e8   :  { %v4257_v52 = vadd.f32 %v4256_v45, %v4191_v39  ;;  %4171 = vmatprep.mubr.bf16.mxu1 %v4010_v41  ;;  %v4262_v61 = vmax.f32 %v4255_v46, 0.0 }
0x18e9   :  { %4172 = vmatmul.mubr.bf16.vlgmr.msra.gmra.mxu1 %v4009_v43  ;;  %v4258_v55 = vpop.f32.mrf.mxu0 }
0x18ea   :  { %v4259_v42 = vadd.f32 %v4258_v55, %v4195_v19  ;;  %4487 = vmatpush1.bf16.msra.mxu1 %v9507_v54  ;;  %4506 = vmatprep.mubr.bf16.mxu1 %v11312_v12  ;;  %v4263_v58 = vmax.f32 %v4257_v52, 0.0  ;;  %v11076_v19 = vld [vmem:[%s13460_s21 + $0x3c8] sm:$0xff]  }
0x18eb   :  { %4488 = vmatprep.subr.bf16.mxu1 %v9506_v32  ;;  %v4442_v52 = vld [vmem:[%s13459_s20 + $0xc] sm:$0x3] }
0x18ec   :  { %v4264_v0 = vmax.f32 %v4259_v42, 0.0  ;;  %v4265_v4 = vpack.c.bf16 %v4263_v58, %v4261_v50  ;;  %v4447_v58 = vrot.slane %v4442_v52, %v11553_v47 }
0x18ee   :  { %v4266_v54 = vpack.c.bf16 %v4264_v0, %v4262_v61  ;;  %4489 = vmatpush1.bf16.msra.mxu1 %v9505_v56  ;;  %v4451_v56 = vrot.slane %v4442_v52, %v11556_v48 }
0x18ef   :  { %10303 = vmatprep.subr.bf16.mxu1 %v11048_v60 }
0x18f0   :  { %4427 = vmatprep.mubr.bf16.mxu0 %v4266_v54 }
0x18f1   :  { %4428 = vmatmul.mubr.bf16.vlgmr.msra.gmra.mxu0 %v4265_v4  ;;  %9509 = vmatmul.mubr.msk.bf16.vlgmr.msra.gmra.mxu1 %vm13526_vm13, %v11961_v3  ;;  %vm13546_vm13 = vmmov %vm13521_vm0 }
0x18f2   :  { %4743 = vmatpush1.bf16.msra.mxu0 %v9528_v59  ;;  %4762 = vmatprep.mubr.bf16.mxu0 %v11312_v12  ;;  %v11056_v59 = vld [vmem:[%s13460_s21 + $0x360] sm:$0xff]  }
0x18f3   :  { %4744 = vmatprep.subr.bf16.mxu0 %v9527_v5  ;;  %10304 = vmatpush3.bf16.msra.mxu1 %v11049_v8 }
0x18f4   :  { %10305 = vmatprep.subr.bf16.mxu1 %v11050_v11 }
0x18f6   :  { %4745 = vmatpush1.bf16.msra.mxu0 %v9526_v15 }
0x18f7   :  { %10306 = vmatpush3.bf16.msra.mxu1 %v11051_v6  ;;  %10325 = vmatprep.subr.bf16.mxu0 %v11053_v18 }
0x18f8   :  { %10307 = vmatprep.subr.bf16.mxu1 %v11052_v20 }
0x18f9   :  { %9530 = vmatmul.mubr.msk.bf16.vlgmr.msra.gmra.mxu0 %vm13527_vm14, %v11961_v3  ;;  %v11060_v3 = vld [vmem:[%s13460_s21 + $0x358] sm:$0xff]   ;;  %vm13547_vm14 = vmmov %vm13521_vm0 }
0x18fa   :  { %10326 = vmatpush3.bf16.msra.mxu0 %v11055_v16 }
0x18fb   :  { %10308 = vmatpush3.bf16.msra.mxu1 %v11054_v57  ;;  %10327 = vmatprep.subr.bf16.mxu0 %v11057_v21 }
0x18fc   :  { %10309 = vmatprep.subr.bf16.mxu1 %v11056_v59 }
0x18fe   :  { %10328 = vmatpush3.bf16.msra.mxu0 %v11059_v23 }
0x18ff   :  { %10310 = vmatpush3.bf16.msra.mxu1 %v11058_v22  ;;  %10329 = vmatprep.subr.bf16.mxu0 %v11061_v24 }
0x1900   :  { %10311 = vmatprep.subr.bf16.mxu1 %v11060_v3 }
0x1902   :  { %10330 = vmatpush3.bf16.msra.mxu0 %v11063_v51 }
0x1903   :  { %10312 = vmatpush3.bf16.msra.mxu1 %v11062_v25  ;;  %10331 = vmatprep.subr.bf16.mxu0 %v11065_v9 }
0x1904   :  { %10313 = vmatprep.subr.bf16.mxu1 %v11064_v27 }
0x1906   :  { %10332 = vmatpush3.bf16.msra.mxu0 %v11067_v14 }
0x1907   :  { %10314 = vmatpush3.bf16.msra.mxu1 %v11066_v10  ;;  %10333 = vmatprep.subr.bf16.mxu0 %v11069_v29 }
0x1908   :  { %10315 = vmatprep.subr.bf16.mxu1 %v11068_v28 }
0x190a   :  { %10334 = vmatpush3.bf16.msra.mxu0 %v11071_v31 }
0x190b   :  { %10316 = vmatpush3.bf16.msra.mxu1 %v11070_v30  ;;  %10335 = vmatprep.subr.bf16.mxu0 %v11073_v13 }
0x190c   :  { %10317 = vmatprep.subr.bf16.mxu1 %v11072_v7 }
0x190e   :  { %10336 = vmatpush3.bf16.msra.mxu0 %v11075_v35 }
0x190f   :  { %10318 = vmatpush3.bf16.msra.mxu1 %v11074_v33  ;;  %10337 = vmatprep.subr.bf16.mxu0 %v11076_v19 }
0x1912   :  { %10338 = vmatpush3.bf16.msra.mxu0 %v11077_v36 }
0x1913   :  { %10339 = vmatprep.subr.bf16.mxu0 %v11078_v37 }
0x1916   :  { %10340 = vmatpush3.bf16.msra.mxu0 %v11079_v38 }
0x1917   :  { %10817 = vmatprep.subr.mxu0 %v11310_v1 }
0x19a9   :  { %v10275_v39 = vpop.f32.mrf.mxu1 }
0x19ab   :  { %v10276_v40 = vpop.f32.mrf.mxu1 }
0x19ac   :  { %v10277_v41 = vadd.f32 %v10276_v40, %v10275_v39 }
0x19ad   :  { %v10278_v43 = vpop.f32.mrf.mxu1 }
0x19ae   :  { %v4180_v45 = vadd.f32 %v10277_v41, %v12381_v26 }
0x19af   :  { %v10279_v32 = vpop.f32.mrf.mxu1 }
0x19b0   :  { %v10280_v46 = vadd.f32 %v10279_v32, %v10278_v43  ;;  %v9547_v32 = vld [vmem:[%s13461_s22] ss:$0 sm:$0xff] }
0x19b1   :  { %v10297_v53 = vpop.f32.mrf.mxu0  ;;  %v4508_v55 = vpop.f32.mrf.mxu1 }
0x19b2   :  { %v4181_v42 = vadd.f32 %v10280_v46, %v12386_v34  ;;  %v4509_v4 = vadd.f32 %v4508_v55, %v4447_v58  ;;  %v4698_v34 = vld [vmem:[%s13459_s20 + $0xe] sm:$0x3] }
0x19b3   :  { %v10298_v60 = vpop.f32.mrf.mxu0  ;;  %v4510_v61 = vpop.f32.mrf.mxu1  ;;  %v4707_v59 = vrot.slane %v4698_v34, %v11556_v48  ;;  %v4703_v22 = vrot.slane %v4698_v34, %v11553_v47  ;;  %v9552_v34 = vld [vmem:[%s13450_s11 + $0x30] sm:$0xff] }
0x19b4   :  { %v10299_v0 = vadd.f32 %v10298_v60, %v10297_v53  ;;  %v4511_v50 = vadd.f32 %v4510_v61, %v4451_v56  ;;  %v4517_v21 = vmax.f32 %v4509_v4, 0.0 }
0x19b5   :  { %v10300_v2 = vpop.f32.mrf.mxu0  ;;  %v4512_v49 = vpop.f32.mrf.mxu1 }
0x19b6   :  { %v4436_v26 = vadd.f32 %v10299_v0, %v4180_v45  ;;  %v4513_v54 = vadd.f32 %v4512_v49, %v4447_v58  ;;  %v4518_v20 = vmax.f32 %v4511_v50, 0.0 }
0x19b7   :  { %v10301_v5 = vpop.f32.mrf.mxu0  ;;  %v4514_v8 = vpop.f32.mrf.mxu1 }
0x19b8   :  { %v10302_v11 = vadd.f32 %v10301_v5, %v10300_v2  ;;  %v4515_v15 = vadd.f32 %v4514_v8, %v4451_v56  ;;  %v4519_v6 = vmax.f32 %v4513_v54, 0.0 }
0x19b9   :  { %v4764_v18 = vpop.f32.mrf.mxu0 }
0x19ba   :  { %v4437_v16 = vadd.f32 %v10302_v11, %v4181_v42  ;;  %v4520_v57 = vmax.f32 %v4515_v15, 0.0  ;;  %v4521_v24 = vpack.c.bf16 %v4519_v6, %v4517_v21  ;;  %v4765_v9 = vadd.f32 %v4764_v18, %v4703_v22  ;;  %v9551_v6 = vld [vmem:[%s13450_s11 + $0x28] sm:$0xff]  ;;  %v9550_v18 = vld [vmem:[%s13450_s11 + $0x20] sm:$0xff] }
0x19bb   :  { %v4766_v23 = vpop.f32.mrf.mxu0 }
0x19bc   :  { %v4522_v3 = vpack.c.bf16 %v4520_v57, %v4518_v20  ;;  %v4767_v51 = vadd.f32 %v4766_v23, %v4707_v59  ;;  %v4773_v31 = vmax.f32 %v4765_v9, 0.0 }
0x19bd   :  { %v4768_v25 = vpop.f32.mrf.mxu0 }
0x19be   :  { %v4769_v27 = vadd.f32 %v4768_v25, %v4703_v22  ;;  %4683 = vmatprep.mubr.bf16.mxu1 %v4522_v3  ;;  %v4774_v29 = vmax.f32 %v4767_v51, 0.0  ;;  %v9548_v3 = vld [vmem:[%s13456_s17] ss:$0 sm:$0xff] }
0x19bf   :  { %4684 = vmatmul.mubr.bf16.vlgmr.msra.gmra.mxu1 %v4521_v24  ;;  %v4770_v10 = vpop.f32.mrf.mxu0  ;;  %v9549_v25 = vld [vmem:[%s13457_s18] ss:$0 sm:$0xff] }
0x19c0   :  { %v4771_v14 = vadd.f32 %v4770_v10, %v4707_v59  ;;  %v4775_v28 = vmax.f32 %v4769_v27, 0.0 }
0x19c2   :  { %v4776_v30 = vmax.f32 %v4771_v14, 0.0  ;;  %v4777_v13 = vpack.c.bf16 %v4775_v28, %v4773_v31 }
0x19c4   :  { %v4778_v7 = vpack.c.bf16 %v4776_v30, %v4774_v29  ;;  %v9555_v29 = vld [vmem:[%s13451_s12 + $0x1] ss:$0 sm:$0xff]  ;;  %s13534_s12 = smov 80  }
0x19c6   :  { %4939 = vmatprep.mubr.bf16.mxu0 %v4778_v7 }
0x19c7   :  { %4940 = vmatmul.mubr.bf16.vlgmr.msra.gmra.mxu0 %v4777_v13 }
0x19c8   :  { %10819 = vmatprep.mubr.msk.f32.mxu0 %vm13513_vm15, %v11310_v1 }
0x1a7f   :  { %v10319_v33 = vpop.f32.mrf.mxu1 }
0x1a81   :  { %v10320_v35 = vpop.f32.mrf.mxu1 }
0x1a82   :  { %v10321_v36 = vadd.f32 %v10320_v35, %v10319_v33 }
0x1a83   :  { %v10322_v19 = vpop.f32.mrf.mxu1 }
0x1a84   :  { %v4692_v40 = vadd.f32 %v10321_v36, %v4436_v26 }
0x1a85   :  { %v10323_v37 = vpop.f32.mrf.mxu1 }
0x1a86   :  { %v10324_v41 = vadd.f32 %v10323_v37, %v10322_v19 }
0x1a87   :  { %v10341_v38 = vpop.f32.mrf.mxu0 }
0x1a88   :  { %v4693_v53 = vadd.f32 %v10324_v41, %v4437_v16 }
0x1a89   :  { %v10342_v39 = vpop.f32.mrf.mxu0 }
0x1a8a   :  { %v10343_v43 = vadd.f32 %v10342_v39, %v10341_v38 }
0x1a8b   :  { %v10344_v45 = vpop.f32.mrf.mxu0 }
0x1a8c   :  { %v4948_v46 = vadd.f32 %v10343_v43, %v4692_v40 }
0x1a8d   :  { %v10345_v52 = vpop.f32.mrf.mxu0 }
0x1a8e   :  { %v10346_v55 = vadd.f32 %v10345_v52, %v10344_v45  ;;  %v4957_v42 = vadd.f32 %v9547_v32, %v4948_v46 }
0x1a90   :  { %v4949_v56 = vadd.f32 %v10346_v55, %v4693_v53  ;;  %v4959_v58 = vadd.f32 %v4957_v42, %v11949_v62 }
0x1a92   :  { %v4963_v60 = vsel %vm13528_vm2, %v4959_v58, 0.0  ;;  %v4958_v61 = vadd.f32 %v9547_v32, %v4949_v56  ;;  %vm13548_vm2 = vmmov %vm13521_vm0 }
0x1a93   :  { %4964 = vadd.xlane.f32.xlu1 %v4963_v60 }
0x1a94   :  { %v4960_v0 = vadd.f32 %v4958_v61, %v11951_v63  ;;  %v9553_v63 = vld [vmem:[%s13450_s11 + $0x38] sm:$0xff] }
0x1a95   :  { %10791 = vmatprep.subr.mxu1 %v9553_v63 }
0x1a96   :  { %v4966_v2 = vsel %vm13529_vm3, %v4960_v0, 0.0  ;;  %10792 = vmatpush3.msra.mxu1 %v9553_v63  ;;  %v12619_v63 = vld [vmem:[%s13452_s13 + $0x20] sm:$0xff]  ;;  %vm13549_vm3 = vmmov %vm13521_vm0 }
0x1a97   :  { %4967 = vadd.xlane.f32.xlu1 %v4966_v2  ;;  %10793 = vmatprep.subr.mxu1 %v9552_v34 }
0x1a98   :  { %10794 = vmatpush3.msra.mxu1 %v9552_v34 }
0x1a99   :  { %10795 = vmatprep.subr.mxu1 %v9551_v6 }
0x1a9a   :  { %10796 = vmatpush3.msra.mxu1 %v9551_v6 }
0x1a9b   :  { %10797 = vmatprep.subr.mxu1 %v9550_v18 }
0x1a9c   :  { %10798 = vmatpush3.msra.mxu1 %v9550_v18 }
0x1a9d   :  { %10802 = vmatprep.subr.mxu1 %v11310_v1 }
0x1b1c   :  { %v4965_v49 = vpop.xlane.xlu1 %4964 }
0x1b1d   :  { %v4969_v26 = vmul.f32 0.03125, %v4965_v49 }
0x1b1f   :  { %v4971_v50 = vsub.f32 %v4959_v58, %v4969_v26 }
0x1b20   :  { %v4968_v54 = vpop.xlane.xlu1 %4967 }
0x1b21   :  { %v4970_v4 = vmul.f32 0.03125, %v4968_v54  ;;  %v4973_v5 = vmul.f32 %v4971_v50, %v4971_v50 }
0x1b23   :  { %v4972_v8 = vsub.f32 %v4960_v0, %v4970_v4  ;;  %v4975_v11 = vsel %vm13530_vm4, %v4973_v5, 0.0  ;;  %vm13550_vm4 = vmmov %vm13521_vm0 }
0x1b24   :  { %4976 = vadd.xlane.f32.xlu0 %v4975_v11 }
0x1b25   :  { %v4974_v62 = vmul.f32 %v4972_v8, %v4972_v8 }
0x1b27   :  { %v4978_v15 = vsel %vm13531_vm5, %v4974_v62, 0.0  ;;  %vm13551_vm5 = vmmov %vm13521_vm0 }
0x1b28   :  { %4979 = vadd.xlane.f32.xlu1 %v4978_v15 }
0x1bad   :  { %v4977_v20 = vpop.xlane.xlu0 %4976 }
0x1bae   :  { %v4981_v16 = vmul.f32 0.03125, %v4977_v20 }
0x1bb0   :  { %v4983_v57 = vadd.f32 1e-05, %v4981_v16 }
0x1bb1   :  { %v4980_v59 = vpop.xlane.xlu1 %4979 }
0x1bb2   :  { %11244 = vrsqrt.f32 %v4983_v57  ;;  %v4982_v21 = vmul.f32 0.03125, %v4980_v59 }
0x1bb4   :  { %v4984_v22 = vadd.f32 1e-05, %v4982_v21 }
0x1bb6   :  { %11246 = vrsqrt.f32 %v4984_v22 }
0x1bbf   :  { %v11245_v23 = vpop.eup %11244 }
0x1bc0   :  { %v4987_v24 = vmul.f32 %v11245_v23, %v4971_v50 }
0x1bc2   :  { %v4995_v51 = vmul.f32 %v9548_v3, %v4987_v24 }
0x1bc3   :  { %v11247_v27 = vpop.eup %11246 }
0x1bc4   :  { %v4988_v9 = vmul.f32 %v11247_v27, %v4972_v8  ;;  %v12553_v10 = vadd.f32 %v9549_v25, %v4995_v51  ;;  %v12612_v8 = vld [vmem:[%s13452_s13 + $0x28] sm:$0xff] }
0x1bc6   :  { %v4996_v14 = vmul.f32 %v9548_v3, %v4988_v9  ;;  %10799 = vmatprep.mubr.msk.f32.mxu1 %vm13532_vm11, %v12553_v10  ;;  %vm13552_vm11 = vmmov %vm13521_vm0 }
0x1bc8   :  { %v12557_v28 = vadd.f32 %v9549_v25, %v4996_v14 }
0x1bca   :  { %10800 = vmatmul.mubr.msk.f32.vlgmr.msra.gmra.mxu1 %vm13533_vm7, %v12557_v28  ;;  %vm13553_vm7 = vmmov %vm13521_vm0 }
0x1bcb   :  { %10804 = vmatprep.mubr.msk.f32.mxu1 %vm13513_vm15, %v11310_v1 }
0x1c8a   :  { %v10801_v30 = vpop.f32.mrf.mxu1 }
0x1c8b   :  { %v12566_v31 = vadd.f32 %v10801_v30, %v9555_v29 }
0x1c8c   :  { %v5090_v7 = vpop.f32.mrf.mxu1 }
0x1c8d   :  { %v12568_v13 = vadd.f32 %v9555_v29, %v5090_v7 }
0x1c8f   :  { %5189 = vrot.lane.b32.xlu0 %v12568_v13, %s11316_s2  ;;  %5101 = vrot.lane.b32.xlu1 %v12568_v13, %s11313_s29  ;;  %v12576_v35 = vmul.f32 0.35355338, %v12568_v13 }
0x1d01   :  { %v5102_v33 = vpop.permute.xlu1 %5101  ;;  %v5190_v19 = vpop.permute.xlu0 %5189 }
0x1d02   :  { %10803 = vmatpush3.xpose.msk.msra.mxu1 %vm927_vm6, %v5102_v33 }
0x1d03   :  { %10807 = vmatprep.subr.mxu1 %v11310_v1 }
0x1d05   :  { %10805 = vmatmul.mubr.msk.f32.vlgmr.msra.gmra.mxu1 %vm927_vm6, %v12576_v35 }
0x1d06   :  { %10808 = vmatpush3.msra.mxu1 %v5190_v19  ;;  %10809 = vmatprep.mubr.msk.f32.mxu1 %vm13513_vm15, %v11310_v1 }
0x1d07   :  { %10812 = vmatprep.subr.mxu1 %v11310_v1 }
0x1dc5   :  { %v5174_v36 = vpop.f32.mrf.mxu1 }
0x1dc6   :  { %v5175_v37 = vadd.f32 %v5174_v36, %v11696_v17  ;;  %v12660_v36 = vld [vmem:[%s13452_s13 + $0x30] sm:$0xff] }
0x1dc7   :  { %v10806_v38 = vpop.f32.mrf.mxu1 }
0x1dc8   :  { %v5178_v39 = vsel %vm927_vm6, %v5175_v37, -inf }
0x1dc9   :  { %5179 = vmax.xlane.f32.xlu1 %v5178_v39 }
0x1dda   :  { %5267 = vrot.lane.b32.xlu1 %v12576_v35, %s11315_s8 }
0x1e52   :  { %v5180_v40 = vpop.xlane.xlu1 %5179 }
0x1e53   :  { %v5181_v41 = vsub.f32 %v5175_v37, %v5180_v40 }
0x1e55   :  { %v5182_v43 = vmul.f32 1.442695, %v5181_v41 }
0x1e56   :  { %v5268_v42 = vpop.permute.xlu1 %5267 }
0x1e57   :  { %11248 = vpow2.f32 %v5182_v43 }
0x1e64   :  { %v11249_v45 = vpop.eup %11248 }
0x1e65   :  { %v5184_v32 = vsel %vm927_vm6, %v11249_v45, 0.0 }
0x1e66   :  { %5185 = vadd.xlane.f32.xlu0 %v5184_v32 }
0x1e7c   :  { %5269 = vrot.lane.b32.xlu0 %v12568_v13, %s11314_s26 }
0x1eef   :  { %v5186_v46 = vpop.xlane.xlu0 %5185 }
0x1ef0   :  { %11250 = vrcp.f32 %v5186_v46 }
0x1ef3   :  { %v5270_v55 = vpop.permute.xlu0 %5269 }
0x1efd   :  { %v11251_v52 = vpop.eup %11250 }
0x1efe   :  { %v5188_v53 = vmul.f32 %v11251_v52, %v11249_v45  ;;  %v12674_v45 = vmul.f32 0.35355338, %v12566_v31 }
0x1f00   :  { %10810 = vmatmul.mubr.msk.f32.vlgmr.msra.gmra.mxu1 %vm927_vm6, %v5188_v53 }
0x1f01   :  { %10813 = vmatpush3.xpose.msk.msra.mxu1 %vm927_vm6, %v5270_v55  ;;  %10814 = vmatprep.mubr.msk.f32.mxu1 %vm13513_vm15, %v11310_v1 }
0x1f02   :  { %10822 = vmatprep.subr.mxu1 %v11310_v1 }
0x1f04   :  { %10815 = vmatmul.mubr.msk.f32.vlgmr.msra.gmra.mxu1 %vm927_vm6, %v5268_v42 }
0x1f05   :  { %10824 = vmatprep.mubr.msk.f32.mxu1 %vm13513_vm15, %v11310_v1  ;;  %10823 = vmatpush3.msra.mxu1 %v12612_v8 }
0x1f06   :  { %10832 = vmatprep.subr.mxu1 %v11310_v1 }
0x1fc0   :  { %v5261_v56 = vpop.f32.mrf.mxu1 }
0x1fc2   :  { %v10811_v58 = vpop.f32.mrf.mxu1 }
0x1fc4   :  { %v5341_v60 = vpop.f32.mrf.mxu1 }
0x1fc5   :  { %v5342_v61 = vadd.f32 %v5341_v60, %v11696_v17 }
0x1fc6   :  { %v10816_v0 = vpop.f32.mrf.mxu1 }
0x1fc7   :  { %v5345_v2 = vsel %vm927_vm6, %v5342_v61, -inf }
0x1fc8   :  { %5346 = vmax.xlane.f32.xlu0 %v5345_v2 }
0x1fde   :  { %5356 = vrot.lane.b32.xlu0 %v12568_v13, %s11317_s27 }
0x1fe2   :  { %5579 = vrot.lane.b32.xlu0 %v12576_v35, %s11318_s4 }
0x2051   :  { %v5347_v49 = vpop.xlane.xlu0 %5346 }
0x2052   :  { %v5348_v26 = vsub.f32 %v5342_v61, %v5347_v49 }
0x2054   :  { %v5349_v50 = vmul.f32 1.442695, %v5348_v26 }
0x2055   :  { %v5357_v54 = vpop.permute.xlu0 %5356 }
0x2056   :  { %11252 = vpow2.f32 %v5349_v50  ;;  %10818 = vmatpush3.msra.mxu0 %v5357_v54  ;;  %v12702_v50 = vld [vmem:[%s13452_s13 + $0x38] sm:$0xff] }
0x2057   :  { %10827 = vmatprep.subr.mxu0 %v11310_v1 }
0x2059   :  { %v5580_v20 = vpop.permute.xlu0 %5579 }
0x2063   :  { %v11253_v4 = vpop.eup %11252 }
0x2064   :  { %v5351_v5 = vsel %vm927_vm6, %v11253_v4, 0.0 }
0x2065   :  { %5352 = vadd.xlane.f32.xlu1 %v5351_v5 }
0x2076   :  { %5581 = vrot.lane.b32.xlu1 %v12568_v13, %s13534_s12 }
0x20ee   :  { %v5353_v11 = vpop.xlane.xlu1 %5352 }
0x20ef   :  { %11254 = vrcp.f32 %v5353_v11 }
0x20f2   :  { %v5582_v6 = vpop.permute.xlu1 %5581 }
0x20fc   :  { %v11255_v62 = vpop.eup %11254 }
0x20fd   :  { %v5355_v15 = vmul.f32 %v11255_v62, %v11253_v4 }
0x20ff   :  { %10820 = vmatmul.mubr.msk.f32.vlgmr.msra.gmra.mxu0 %vm927_vm6, %v5355_v15 }
0x2100   :  { %10828 = vmatpush3.msra.mxu0 %v12619_v63  ;;  %10829 = vmatprep.mubr.msk.f32.mxu0 %vm13513_vm15, %v11310_v1 }
0x2101   :  { %10837 = vmatprep.subr.mxu0 %v11310_v1 }
0x2103   :  { %10830 = vmatmul.mubr.msk.f32.vlgmr.msra.gmra.mxu0 %vm927_vm6, %v5261_v56 }
0x2104   :  { %10839 = vmatprep.mubr.msk.f32.mxu0 %vm13513_vm15, %v11310_v1 }
0x21bf   :  { %v5428_v34 = vpop.f32.mrf.mxu0 }
0x21c0   :  { %10825 = vmatmul.mubr.msk.f32.vlgmr.msra.gmra.mxu1 %vm927_vm6, %v5428_v34 }
0x21c1   :  { %10833 = vmatpush3.xpose.msk.msra.mxu1 %vm927_vm6, %v5582_v6  ;;  %v10821_v18 = vpop.f32.mrf.mxu0  ;;  %10834 = vmatprep.mubr.msk.f32.mxu1 %vm13513_vm15, %v11310_v1 }
0x21c2   :  { %10842 = vmatprep.subr.mxu1 %v11310_v1 }
0x21c3   :  { %v12634_v16 = vpop.f32.mrf.mxu0 }
0x21c4   :  { %10835 = vmatmul.mubr.msk.f32.vlgmr.msra.gmra.mxu1 %vm927_vm6, %v5580_v20 }
0x21c5   :  { %v10831_v57 = vpop.f32.mrf.mxu0  ;;  %10844 = vmatprep.mubr.msk.f32.mxu1 %vm13513_vm15, %v11310_v1  ;;  %10843 = vmatpush3.msra.mxu1 %v12660_v36 }
0x21c6   :  { %10852 = vmatprep.subr.mxu1 %v11310_v1 }
0x2280   :  { %v5502_v59 = vpop.f32.mrf.mxu1 }
0x2281   :  { %v5576_v55 = vadd.f32 %v12634_v16, %v5502_v59 }
0x2282   :  { %v10826_v21 = vpop.f32.mrf.mxu1 }
0x2284   :  { %v5653_v22 = vpop.f32.mrf.mxu1 }
0x2285   :  { %v5654_v23 = vadd.f32 %v5653_v22, %v11696_v17 }
0x2286   :  { %v10836_v3 = vpop.f32.mrf.mxu1 }
0x2287   :  { %v5657_v24 = vsel %vm927_vm6, %v5654_v23, -inf }
0x2288   :  { %5658 = vmax.xlane.f32.xlu0 %v5657_v24 }
0x229e   :  { %5668 = vrot.lane.b32.xlu0 %v12568_v13, %s13535_s6 }
0x22a2   :  { %5819 = vrot.lane.b32.xlu0 %v12576_v35, %s13536_s28 }
0x2311   :  { %v5659_v25 = vpop.xlane.xlu0 %5658 }
0x2312   :  { %v5660_v51 = vsub.f32 %v5654_v23, %v5659_v25 }
0x2314   :  { %v5661_v27 = vmul.f32 1.442695, %v5660_v51 }
0x2315   :  { %v5669_v9 = vpop.permute.xlu0 %5668 }
0x2316   :  { %11256 = vpow2.f32 %v5661_v27  ;;  %10838 = vmatpush3.msra.mxu0 %v5669_v9 }
0x2317   :  { %10847 = vmatprep.subr.mxu0 %v11310_v1 }
0x2319   :  { %v5820_v19 = vpop.permute.xlu0 %5819 }
0x2323   :  { %v11257_v14 = vpop.eup %11256 }
0x2324   :  { %v5663_v29 = vsel %vm927_vm6, %v11257_v14, 0.0 }
0x2325   :  { %5664 = vadd.xlane.f32.xlu1 %v5663_v29 }
0x2336   :  { %5821 = vrot.lane.b32.xlu1 %v12568_v13, %s13537_s30 }
0x23ae   :  { %v5665_v30 = vpop.xlane.xlu1 %5664 }
0x23af   :  { %11258 = vrcp.f32 %v5665_v30 }
0x23b2   :  { %v5822_v35 = vpop.permute.xlu1 %5821 }
0x23bc   :  { %v11259_v7 = vpop.eup %11258 }
0x23bd   :  { %v5667_v33 = vmul.f32 %v11259_v7, %v11257_v14 }
0x23bf   :  { %10840 = vmatmul.mubr.msk.f32.vlgmr.msra.gmra.mxu0 %vm927_vm6, %v5667_v33 }
0x23c0   :  { %10848 = vmatpush3.xpose.msk.msra.mxu0 %vm927_vm6, %v5822_v35  ;;  %10849 = vmatprep.mubr.msk.f32.mxu0 %vm13513_vm15, %v11310_v1 }
0x23c1   :  { %10857 = vmatprep.subr.mxu0 %v11310_v1 }
0x23c3   :  { %10850 = vmatmul.mubr.msk.f32.vlgmr.msra.gmra.mxu0 %vm927_vm6, %v5820_v19 }
0x23c4   :  { %10859 = vmatprep.mubr.msk.f32.mxu0 %vm13513_vm15, %v11310_v1  ;;  %10858 = vmatpush3.msra.mxu0 %v12702_v50 }
0x23c5   :  { %10867 = vmatprep.subr.mxu0 %v11310_v1 }
0x247f   :  { %v5740_v37 = vpop.f32.mrf.mxu0 }
0x2480   :  { %10845 = vmatmul.mubr.msk.f32.vlgmr.msra.gmra.mxu1 %vm927_vm6, %v5740_v37 }
0x2481   :  { %v10841_v38 = vpop.f32.mrf.mxu0  ;;  %10854 = vmatprep.mubr.msk.f32.mxu1 %vm13513_vm15, %v11310_v1 }
0x2483   :  { %v5893_v39 = vpop.f32.mrf.mxu0 }
0x2484   :  { %v5894_v40 = vadd.f32 %v5893_v39, %v11696_v17 }
0x2485   :  { %v10851_v41 = vpop.f32.mrf.mxu0 }
0x2486   :  { %v5897_v43 = vsel %vm927_vm6, %v5894_v40, -inf }
0x2487   :  { %5898 = vmax.xlane.f32.xlu0 %v5897_v43 }
0x249d   :  { %5908 = vrot.lane.b32.xlu0 %v12568_v13, %s13538_s9 }
0x24a1   :  { %6228 = vrot.lane.b32.xlu0 %v12566_v31, %s11314_s26 }
0x24a5   :  { %6226 = vrot.lane.b32.xlu0 %v12674_v45, %s11315_s8 }
0x2510   :  { %v5899_v32 = vpop.xlane.xlu0 %5898 }
0x2511   :  { %v5900_v46 = vsub.f32 %v5894_v40, %v5899_v32 }
0x2513   :  { %v5901_v52 = vmul.f32 1.442695, %v5900_v46 }
0x2514   :  { %v5909_v17 = vpop.permute.xlu0 %5908 }
0x2515   :  { %11260 = vpow2.f32 %v5901_v52  ;;  %10853 = vmatpush3.msra.mxu1 %v5909_v17 }
0x2516   :  { %10862 = vmatprep.subr.mxu1 %v11310_v1 }
0x2518   :  { %v6229_v49 = vpop.permute.xlu0 %6228 }
0x251c   :  { %v6227_v26 = vpop.permute.xlu0 %6226 }
0x2522   :  { %v11261_v53 = vpop.eup %11260 }
0x2523   :  { %v5903_v13 = vsel %vm927_vm6, %v11261_v53, 0.0 }
0x2524   :  { %5904 = vadd.xlane.f32.xlu1 %v5903_v13 }
0x2535   :  { %6061 = vrot.lane.b32.xlu1 %v12566_v31, %s11313_s29 }
0x2540   :  { %v5814_v42 = vpop.f32.mrf.mxu1 }
0x2541   :  { %v5818_v56 = vadd.f32 %v5814_v42, %v5576_v55 }
0x2542   :  { %v10846_v58 = vpop.f32.mrf.mxu1 }
0x25ad   :  { %v5905_v60 = vpop.xlane.xlu1 %5904 }
0x25ae   :  { %11262 = vrcp.f32 %v5905_v60 }
0x25b1   :  { %v6062_v2 = vpop.permute.xlu1 %6061 }
0x25bb   :  { %v11263_v61 = vpop.eup %11262 }
0x25bc   :  { %v5907_v0 = vmul.f32 %v11263_v61, %v11261_v53 }
0x25be   :  { %10855 = vmatmul.mubr.msk.f32.vlgmr.msra.gmra.mxu1 %vm927_vm6, %v5907_v0 }
0x25bf   :  { %10863 = vmatpush3.xpose.msk.msra.mxu1 %vm927_vm6, %v6062_v2  ;;  %10864 = vmatprep.mubr.msk.f32.mxu1 %vm13513_vm15, %v11310_v1 }
0x25c0   :  { %10872 = vmatprep.subr.mxu1 %v11310_v1 }
0x25c2   :  { %10865 = vmatmul.mubr.msk.f32.vlgmr.msra.gmra.mxu1 %vm927_vm6, %v12674_v45 }
0x25c3   :  { %10873 = vmatpush3.xpose.msk.msra.mxu1 %vm927_vm6, %v6229_v49  ;;  %10874 = vmatprep.mubr.msk.f32.mxu1 %vm13513_vm15, %v11310_v1 }
0x25c4   :  { %10882 = vmatprep.subr.mxu1 %v11310_v1 }
0x25c6   :  { %10875 = vmatmul.mubr.msk.f32.vlgmr.msra.gmra.mxu1 %vm927_vm6, %v6227_v26 }
0x25c7   :  { %10883 = vmatpush3.msra.mxu1 %v12612_v8  ;;  %10884 = vmatprep.mubr.msk.f32.mxu1 %vm13513_vm15, %v11310_v1 }
0x25c8   :  { %10892 = vmatprep.subr.mxu1 %v11310_v1 }
0x267e   :  { %v5980_v54 = vpop.f32.mrf.mxu1 }
0x267f   :  { %10860 = vmatmul.mubr.msk.f32.vlgmr.msra.gmra.mxu0 %vm927_vm6, %v5980_v54 }
0x2680   :  { %v10856_v4 = vpop.f32.mrf.mxu1  ;;  %10869 = vmatprep.mubr.msk.f32.mxu0 %vm13513_vm15, %v11310_v1 }
0x2682   :  { %v6134_v5 = vpop.f32.mrf.mxu1 }
0x2683   :  { %v6135_v8 = vadd.f32 %v6134_v5, %v11829_v44  ;;  %v9599_v5 = vld [vmem:[%s13453_s14 + $0x1] ss:$0 sm:$0xff] }
0x2684   :  { %v10866_v11 = vpop.f32.mrf.mxu1 }
0x2685   :  { %v6138_v62 = vsel %vm927_vm6, %v6135_v8, -inf }
0x2686   :  { %6139 = vmax.xlane.f32.xlu0 %v6138_v62  ;;  %v6300_v15 = vpop.f32.mrf.mxu1 }
0x2687   :  { %v6301_v34 = vadd.f32 %v6300_v15, %v11829_v44 }
0x2688   :  { %v10876_v6 = vpop.f32.mrf.mxu1 }
0x2689   :  { %v6304_v18 = vsel %vm927_vm6, %v6301_v34, -inf }
0x268a   :  { %6305 = vmax.xlane.f32.xlu1 %v6304_v18 }
0x269b   :  { %6149 = vrot.lane.b32.xlu1 %v12566_v31, %s11316_s2 }
0x269f   :  { %6540 = vrot.lane.b32.xlu1 %v12566_v31, %s13534_s12 }
0x26a3   :  { %6538 = vrot.lane.b32.xlu1 %v12674_v45, %s11318_s4 }
0x270f   :  { %v6140_v20 = vpop.xlane.xlu0 %6139 }
0x2710   :  { %v6141_v16 = vsub.f32 %v6135_v8, %v6140_v20 }
0x2712   :  { %v6142_v57 = vmul.f32 1.442695, %v6141_v16 }
0x2713   :  { %v6306_v59 = vpop.xlane.xlu1 %6305 }
0x2714   :  { %11264 = vpow2.f32 %v6142_v57  ;;  %v6307_v21 = vsub.f32 %v6301_v34, %v6306_v59 }
0x2716   :  { %v6308_v22 = vmul.f32 1.442695, %v6307_v21 }
0x2717   :  { %v6150_v23 = vpop.permute.xlu1 %6149 }
0x2718   :  { %11266 = vpow2.f32 %v6308_v22  ;;  %10868 = vmatpush3.msra.mxu0 %v6150_v23 }
0x2719   :  { %10877 = vmatprep.subr.mxu0 %v11310_v1 }
0x271b   :  { %v6541_v39 = vpop.permute.xlu1 %6540 }
0x2721   :  { %v11265_v3 = vpop.eup %11264 }
0x2722   :  { %v6144_v24 = vsel %vm927_vm6, %v11265_v3, 0.0 }
0x2723   :  { %6145 = vadd.xlane.f32.xlu0 %v6144_v24 }
0x2725   :  { %v11267_v25 = vpop.eup %11266 }
0x2726   :  { %v6310_v51 = vsel %vm927_vm6, %v11267_v25, 0.0 }
0x2727   :  { %6311 = vadd.xlane.f32.xlu0 %v6310_v51 }
0x273d   :  { %6315 = vrot.lane.b32.xlu0 %v12566_v31, %s11317_s27 }
0x273f   :  { %v6054_v27 = vpop.f32.mrf.mxu0 }
0x2740   :  { %v12724_v9 = vadd.f32 %v6054_v27, %v5818_v56 }
0x2741   :  { %v10861_v14 = vpop.f32.mrf.mxu0 }
0x2742   :  { %v7026_v62 = vadd.f32 %v9599_v5, %v12724_v9 }
0x2744   :  { %v7028_v18 = vadd.f32 %v7026_v62, %v12553_v10 }
0x2746   :  { %v7034_v20 = vsel %vm13539_vm8, %v7028_v18, 0.0  ;;  %vm13555_vm8 = vmmov %vm13521_vm0 }
0x27ac   :  { %v6146_v29 = vpop.xlane.xlu0 %6145 }
0x27ad   :  { %11268 = vrcp.f32 %v6146_v29 }
0x27b0   :  { %v6312_v30 = vpop.xlane.xlu0 %6311 }
0x27b1   :  { %11270 = vrcp.f32 %v6312_v30 }
0x27b4   :  { %v6316_v35 = vpop.permute.xlu0 %6315 }
0x27ba   :  { %v11269_v7 = vpop.eup %11268 }
0x27bb   :  { %v6148_v33 = vmul.f32 %v11269_v7, %v11265_v3 }
0x27bd   :  { %10870 = vmatmul.mubr.msk.f32.vlgmr.msra.gmra.mxu0 %vm927_vm6, %v6148_v33 }
0x27be   :  { %v11271_v19 = vpop.eup %11270  ;;  %10878 = vmatpush3.msra.mxu0 %v6316_v35  ;;  %10879 = vmatprep.mubr.msk.f32.mxu0 %vm13513_vm15, %v11310_v1 }
0x27bf   :  { %v6314_v37 = vmul.f32 %v11271_v19, %v11267_v25  ;;  %10887 = vmatprep.subr.mxu0 %v11310_v1 }
0x27c1   :  { %10880 = vmatmul.mubr.msk.f32.vlgmr.msra.gmra.mxu0 %vm927_vm6, %v6314_v37 }
0x27c2   :  { %10888 = vmatpush3.msra.mxu0 %v12619_v63  ;;  %10889 = vmatprep.mubr.msk.f32.mxu0 %vm13513_vm15, %v11310_v1  ;;  %v6539_v63 = vpop.permute.xlu1 %6538 }
0x27c3   :  { %10897 = vmatprep.subr.mxu0 %v11310_v1 }
0x287d   :  { %v6221_v38 = vpop.f32.mrf.mxu0 }
0x287e   :  { %10890 = vmatmul.mubr.msk.f32.vlgmr.msra.gmra.mxu0 %vm927_vm6, %v6221_v38 }
0x287f   :  { %v10871_v40 = vpop.f32.mrf.mxu0  ;;  %10899 = vmatprep.mubr.msk.f32.mxu0 %vm13513_vm15, %v11310_v1 }
0x2881   :  { %v6387_v41 = vpop.f32.mrf.mxu0 }
0x2882   :  { %10885 = vmatmul.mubr.msk.f32.vlgmr.msra.gmra.mxu1 %vm927_vm6, %v6387_v41 }
0x2883   :  { %10893 = vmatpush3.xpose.msk.msra.mxu1 %vm927_vm6, %v6541_v39  ;;  %v10881_v43 = vpop.f32.mrf.mxu0  ;;  %10894 = vmatprep.mubr.msk.f32.mxu1 %vm13513_vm15, %v11310_v1 }
0x2884   :  { %10902 = vmatprep.subr.mxu1 %v11310_v1 }
0x2886   :  { %10895 = vmatmul.mubr.msk.f32.vlgmr.msra.gmra.mxu1 %vm927_vm6, %v6539_v63 }
0x2887   :  { %10903 = vmatpush3.msra.mxu1 %v12660_v36  ;;  %10904 = vmatprep.mubr.msk.f32.mxu1 %vm13513_vm15, %v11310_v1 }
0x2888   :  { %10912 = vmatprep.subr.mxu1 %v11310_v1 }
0x293e   :  { %v6534_v32 = vpop.f32.mrf.mxu0 }
0x2940   :  { %v10891_v46 = vpop.f32.mrf.mxu0 }
0x2941   :  { %v9648_v46 = vld [vmem:[%s13458_s19 + $0x188] sm:$0xff] }
0x2942   :  { %v6461_v52 = vpop.f32.mrf.mxu1 }
0x2943   :  { %v6535_v17 = vadd.f32 %v6534_v32, %v6461_v52  ;;  %v9606_v32 = vld [vmem:[%s13458_s19 + $0x180] sm:$0xff] }
0x2944   :  { %v10886_v53 = vpop.f32.mrf.mxu1 }
0x2946   :  { %v6612_v13 = vpop.f32.mrf.mxu1 }
0x2947   :  { %v6613_v55 = vadd.f32 %v6612_v13, %v11829_v44 }
0x2948   :  { %v10896_v42 = vpop.f32.mrf.mxu1 }
0x2949   :  { %v6616_v56 = vsel %vm927_vm6, %v6613_v55, -inf  ;;  %v9604_v42 = vld [vmem:[%s13458_s19 + $0x100] sm:$0xff] }
0x294a   :  { %6617 = vmax.xlane.f32.xlu0 %v6616_v56  ;;  %v9605_v56 = vld [vmem:[%s13458_s19 + $0x140] sm:$0xff] }
0x2960   :  { %6627 = vrot.lane.b32.xlu0 %v12566_v31, %s13535_s6 }
0x2964   :  { %6778 = vrot.lane.b32.xlu0 %v12674_v45, %s13536_s28 }
0x29d3   :  { %v6618_v36 = vpop.xlane.xlu0 %6617 }
0x29d4   :  { %v6619_v58 = vsub.f32 %v6613_v55, %v6618_v36  ;;  %v9646_v36 = vld [vmem:[%s13458_s19 + $0x108] sm:$0xff] }
0x29d6   :  { %v6620_v60 = vmul.f32 1.442695, %v6619_v58  ;;  %v9610_v58 = vcombine.high %v9604_v42, %v9605_v56 }
0x29d7   :  { %v6628_v61 = vpop.permute.xlu0 %6627 }
0x29d8   :  { %11272 = vpow2.f32 %v6620_v60  ;;  %10898 = vmatpush3.msra.mxu0 %v6628_v61  ;;  %v9647_v60 = vld [vmem:[%s13458_s19 + $0x148] sm:$0xff]  ;;  %v9609_v61 = vcombine.low %v9604_v42, %v9605_v56  ;;  %v11112_v42 = vld [vmem:[%s13460_s21 + $0x578] sm:$0xff]   ;;  %v9608_v56 = vld [vmem:[%s13459_s20 + $0x10] sm:$0x3] }
0x29d9   :  { %10907 = vmatprep.subr.mxu0 %v11310_v1 }
0x29db   :  { %v6779_v4 = vpop.permute.xlu0 %6778 }
0x29e5   :  { %v11273_v0 = vpop.eup %11272 }
0x29e6   :  { %v6622_v2 = vsel %vm927_vm6, %v11273_v0, 0.0 }
0x29e7   :  { %6623 = vadd.xlane.f32.xlu1 %v6622_v2  ;;  %v9652_v2 = vcombine.high %v9646_v36, %v9647_v60 }
0x29f8   :  { %6780 = vrot.lane.b32.xlu1 %v12566_v31, %s13537_s30 }
0x2a70   :  { %v6624_v49 = vpop.xlane.xlu1 %6623 }
0x2a71   :  { %11274 = vrcp.f32 %v6624_v49  ;;  %v11080_v49 = vld [vmem:[%s13460_s21 + $0x4f8] sm:$0xff]  }
0x2a74   :  { %v6781_v45 = vpop.permute.xlu1 %6780 }
0x2a7e   :  { %v11275_v26 = vpop.eup %11274 }
0x2a7f   :  { %v6626_v54 = vmul.f32 %v11275_v26, %v11273_v0  ;;  %v9651_v0 = vcombine.low %v9646_v36, %v9647_v60  ;;  %v11081_v26 = vld [vmem:[%s13460_s21 + $0x478] sm:$0xff]   ;;  %v9650_v36 = vld [vmem:[%s13459_s20 + $0x12] sm:$0x3] }
0x2a81   :  { %10900 = vmatmul.mubr.msk.f32.vlgmr.msra.gmra.mxu0 %vm927_vm6, %v6626_v54 }
0x2a82   :  { %10908 = vmatpush3.xpose.msk.msra.mxu0 %vm927_vm6, %v6781_v45  ;;  %10909 = vmatprep.mubr.msk.f32.mxu0 %vm13513_vm15, %v11310_v1 }
0x2a83   :  { %10917 = vmatprep.subr.mxu0 %v11310_v1 }
0x2a85   :  { %10910 = vmatmul.mubr.msk.f32.vlgmr.msra.gmra.mxu0 %vm927_vm6, %v6779_v4 }
0x2a86   :  { %10918 = vmatpush3.msra.mxu0 %v12702_v50  ;;  %10919 = vmatprep.mubr.msk.f32.mxu0 %vm13513_vm15, %v11310_v1 }
0x2b41   :  { %v6699_v8 = vpop.f32.mrf.mxu0 }
0x2b42   :  { %10905 = vmatmul.mubr.msk.f32.vlgmr.msra.gmra.mxu1 %vm927_vm6, %v6699_v8 }
0x2b43   :  { %v10901_v11 = vpop.f32.mrf.mxu0  ;;  %10914 = vmatprep.mubr.msk.f32.mxu1 %vm13513_vm15, %v11310_v1  ;;  %vm13540_vm15 = vmmov %vm13521_vm0 }
0x2b45   :  { %v6852_v15 = vpop.f32.mrf.mxu0 }
0x2b46   :  { %v6853_v34 = vadd.f32 %v6852_v15, %v11829_v44 }
0x2b47   :  { %v10911_v50 = vpop.f32.mrf.mxu0 }
0x2b48   :  { %v6856_v6 = vsel %vm927_vm6, %v6853_v34, -inf }
0x2b49   :  { %6857 = vmax.xlane.f32.xlu1 %v6856_v6 }
0x2b4d   :  { %7035 = vadd.xlane.f32.xlu1 %v7034_v20  ;;  %v9603_v20 = vld [vmem:[%s13455_s16 + $0x1] ss:$0 sm:$0xff]  ;;  %s13554_s16 = sld [smem:[#allocation8_spill]] }
0x2bd2   :  { %v6858_v16 = vpop.xlane.xlu1 %6857 }
0x2bd3   :  { %v6859_v57 = vsub.f32 %v6853_v34, %v6858_v16  ;;  %v9602_v34 = vld [vmem:[%s13454_s15 + $0x1] ss:$0 sm:$0xff] }
0x2bd5   :  { %v6860_v59 = vmul.f32 1.442695, %v6859_v57 }
0x2bd7   :  { %11276 = vpow2.f32 %v6860_v59 }
0x2be4   :  { %v11277_v21 = vpop.eup %11276 }
0x2be5   :  { %v6862_v1 = vsel %vm927_vm6, %v11277_v21, 0.0 }
0x2be6   :  { %6863 = vadd.xlane.f32.xlu0 %v6862_v1  ;;  %v11083_v1 = vld [vmem:[%s13460_s21 + $0x438] sm:$0xff]  }
0x2bfc   :  { %6867 = vrot.lane.b32.xlu0 %v12566_v31, %s13538_s9  ;;  %v7036_v31 = vpop.xlane.xlu1 %7035 }
0x2bfd   :  { %v7040_v9 = vmul.f32 0.03125, %v7036_v31  ;;  %v11092_v31 = vld [vmem:[%s13460_s21 + $0x4e0] sm:$0xff]  }
0x2bff   :  { %v7042_v7 = vsub.f32 %v7028_v18, %v7040_v9  ;;  %v11093_v9 = vld [vmem:[%s13460_s21 + $0x460] sm:$0xff]  }
0x2c01   :  { %v7044_v37 = vmul.f32 %v7042_v7, %v7042_v7 }
0x2c02   :  { %v6773_v44 = vpop.f32.mrf.mxu1 }
0x2c03   :  { %v6777_v22 = vadd.f32 %v6773_v44, %v6535_v17  ;;  %v7046_v38 = vsel %vm13521_vm0, %v7044_v37, 0.0  ;;  %v9649_v17 = vld [vmem:[%s13458_s19 + $0x1c8] sm:$0xff]  ;;  %v11101_v37 = vld [vmem:[%s13460_s21 + $0x450] sm:$0xff]  }
0x2c04   :  { %v10906_v23 = vpop.f32.mrf.mxu1  ;;  %v9653_v13 = vcombine.low %v9648_v46, %v9649_v17  ;;  %v9654_v55 = vcombine.high %v9648_v46, %v9649_v17  ;;  %v11110_v46 = vld [vmem:[%s13460_s21 + $0x480] sm:$0xff]   ;;  %v9722_v17 = vld [vmem:[%s13458_s19 + $0x190] sm:$0xff] }
0x2c05   :  { %v11085_v23 = vld [vmem:[%s13460_s21 + $0x470] sm:$0xff]  }
0x2c06   :  { %7248 = vmatprep.subr.bf16.mxu0 %v9654_v55 }
0x2c6f   :  { %v6864_v3 = vpop.xlane.xlu0 %6863 }
0x2c70   :  { %11278 = vrcp.f32 %v6864_v3  ;;  %v11086_v3 = vld [vmem:[%s13460_s21 + $0x4b0] sm:$0xff]  }
0x2c73   :  { %v6868_v10 = vpop.permute.xlu0 %6867 }
0x2c74   :  { %10913 = vmatpush3.msra.mxu1 %v6868_v10  ;;  %v11087_v10 = vld [vmem:[%s13460_s21 + $0x430] sm:$0xff]  }
0x2c7d   :  { %v11279_v24 = vpop.eup %11278 }
0x2c7e   :  { %v6866_v25 = vmul.f32 %v11279_v24, %v11277_v21  ;;  %v11082_v21 = vld [vmem:[%s13460_s21 + $0x4b8] sm:$0xff]   ;;  %v11088_v24 = vld [vmem:[%s13460_s21 + $0x4e8] sm:$0xff]  }
0x2c80   :  { %10915 = vmatmul.mubr.msk.f32.vlgmr.msra.gmra.mxu1 %vm927_vm6, %v6866_v25  ;;  %v11089_v25 = vld [vmem:[%s13460_s21 + $0x468] sm:$0xff]  }
0x2c81   :  { %7150 = vmatprep.mubr.bf16.mxu1 %v11312_v12 }
0x2d40   :  { %v6939_v51 = vpop.f32.mrf.mxu1 }
0x2d41   :  { %10920 = vmatmul.mubr.msk.f32.vlgmr.msra.gmra.mxu0 %vm927_vm6, %v6939_v51  ;;  %vm13541_vm6 = vmmov %vm13521_vm0  ;;  %v11090_v51 = vld [vmem:[%s13460_s21 + $0x4a8] sm:$0xff]  }
0x2d42   :  { %v10916_v27 = vpop.f32.mrf.mxu1  ;;  %7268 = vmatprep.mubr.bf16.mxu0 %v11312_v12  ;;  %7249 = vmatpush1.bf16.msra.mxu0 %v9653_v13 }
0x2d43   :  { %7250 = vmatprep.subr.bf16.mxu0 %v9652_v2  ;;  %v11091_v27 = vld [vmem:[%s13460_s21 + $0x428] sm:$0xff]   ;;  %v7088_v2 = vrot.slane %v9608_v56, %v11553_v47 }
0x2d46   :  { %7251 = vmatpush1.bf16.msra.mxu0 %v9651_v0  ;;  %v7213_v0 = vrot.slane %v9650_v36, %v11556_v48 }
0x2d47   :  { %10423 = vmatprep.subr.bf16.mxu0 %v11081_v26 }
0x2e01   :  { %v7013_v14 = vpop.f32.mrf.mxu0 }
0x2e02   :  { %v7017_v29 = vadd.f32 %v7013_v14, %v6777_v22  ;;  %v11084_v22 = vld [vmem:[%s13460_s21 + $0x4f0] sm:$0xff]   ;;  %v11094_v14 = vld [vmem:[%s13460_s21 + $0x4a0] sm:$0xff]  }
0x2e03   :  { %v10921_v30 = vpop.f32.mrf.mxu0 }
0x2e04   :  { %v7027_v33 = vadd.f32 %v9599_v5, %v7017_v29  ;;  %v11095_v29 = vld [vmem:[%s13460_s21 + $0x420] sm:$0xff]   ;;  %v11096_v30 = vld [vmem:[%s13460_s21 + $0x4d8] sm:$0xff]  }
0x2e06   :  { %v7029_v35 = vadd.f32 %v7027_v33, %v12557_v28  ;;  %v9607_v28 = vld [vmem:[%s13458_s19 + $0x1c0] sm:$0xff]  ;;  %v11098_v33 = vld [vmem:[%s13460_s21 + $0x498] sm:$0xff]  }
0x2e07   :  { %v9612_v52 = vcombine.high %v9606_v32, %v9607_v28  ;;  %v9611_v53 = vcombine.low %v9606_v32, %v9607_v28  ;;  %v11108_v32 = vld [vmem:[%s13460_s21 + $0x4c0] sm:$0xff]  }
0x2e08   :  { %v7037_v19 = vsel %vm13540_vm15, %v7029_v35, 0.0  ;;  %v11109_v28 = vld [vmem:[%s13460_s21 + $0x440] sm:$0xff]   ;;  %vm13556_vm15 = vmmov %vm13521_vm0 }
0x2e09   :  { %7038 = vadd.xlane.f32.xlu1 %v7037_v19  ;;  %7130 = vmatprep.subr.bf16.mxu1 %v9612_v52  ;;  %v11100_v19 = vld [vmem:[%s13460_s21 + $0x4d0] sm:$0xff]   ;;  %v11111_v52 = vld [vmem:[%s13460_s21 + $0x400] sm:$0xff]  }
0x2e0a   :  { %7131 = vmatpush1.bf16.msra.mxu1 %v9611_v53  ;;  %v9723_v53 = vld [vmem:[%s13458_s19 + $0x1d0] sm:$0xff] }
0x2e0b   :  { %7132 = vmatprep.subr.bf16.mxu1 %v9610_v58  ;;  %v9728_v13 = vcombine.high %v9722_v17, %v9723_v53  ;;  %v9727_v55 = vcombine.low %v9722_v17, %v9723_v53  ;;  %v11120_v17 = vld [vmem:[%s13460_s21 + $0x560] sm:$0xff]   ;;  %v11121_v53 = vld [vmem:[%s13460_s21 + $0x5f0] sm:$0xff]  }
0x2e0d   :  { %7047 = vadd.xlane.f32.xlu1 %v7046_v38  ;;  %v11102_v38 = vld [vmem:[%s13460_s21 + $0x490] sm:$0xff]  }
0x2e0e   :  { %7133 = vmatpush1.bf16.msra.mxu1 %v9609_v61  ;;  %v7092_v61 = vrot.slane %v9608_v56, %v11556_v48  ;;  %v11125_v56 = vld [vmem:[%s13460_s21 + $0x5e8] sm:$0xff]  }
0x2e0f   :  { %10401 = vmatprep.subr.bf16.mxu1 %v11080_v49  ;;  %v7209_v49 = vrot.slane %v9650_v36, %v11553_v47  ;;  %v11126_v36 = vld [vmem:[%s13460_s21 + $0x518] sm:$0xff]  }
0x2e92   :  { %v7039_v39 = vpop.xlane.xlu1 %7038 }
0x2e93   :  { %v7041_v40 = vmul.f32 0.03125, %v7039_v39  ;;  %v11103_v39 = vld [vmem:[%s13460_s21 + $0x410] sm:$0xff]  }
0x2e95   :  { %v7043_v41 = vsub.f32 %v7029_v35, %v7041_v40  ;;  %v11099_v35 = vld [vmem:[%s13460_s21 + $0x418] sm:$0xff]   ;;  %v11104_v40 = vld [vmem:[%s13460_s21 + $0x4c8] sm:$0xff]  }
0x2e96   :  { %v7048_v54 = vpop.xlane.xlu1 %7047 }
0x2e97   :  { %v7045_v43 = vmul.f32 %v7043_v41, %v7043_v41  ;;  %v7052_v45 = vmul.f32 0.03125, %v7048_v54 }
0x2e99   :  { %v7049_v63 = vsel %vm13541_vm6, %v7045_v43, 0.0  ;;  %v7054_v4 = vadd.f32 1e-05, %v7052_v45  ;;  %v11106_v43 = vld [vmem:[%s13460_s21 + $0x488] sm:$0xff]  }
0x2e9a   :  { %7050 = vadd.xlane.f32.xlu1 %v7049_v63  ;;  %v11107_v63 = vld [vmem:[%s13460_s21 + $0x408] sm:$0xff]  }
0x2e9b   :  { %11280 = vrsqrt.f32 %v7054_v4 }
0x2ea8   :  { %v11281_v62 = vpop.eup %11280 }
0x2ea9   :  { %v7058_v15 = vmul.f32 %v11281_v62, %v7042_v7  ;;  %v11097_v7 = vld [vmem:[%s13460_s21 + $0x458] sm:$0xff]  }
0x2eab   :  { %v7066_v6 = vmul.f32 %v9602_v34, %v7058_v15 }
0x2ead   :  { %v12825_v57 = vadd.f32 %v9603_v20, %v7066_v6 }
0x2f23   :  { %v7051_v5 = vpop.xlane.xlu1 %7050 }
0x2f24   :  { %v7053_v8 = vmul.f32 0.03125, %v7051_v5 }
0x2f26   :  { %v7055_v11 = vadd.f32 1e-05, %v7053_v8 }
0x2f28   :  { %11282 = vrsqrt.f32 %v7055_v11 }
0x2f35   :  { %v11283_v50 = vpop.eup %11282 }
0x2f36   :  { %v7059_v18 = vmul.f32 %v11283_v50, %v7043_v41  ;;  %v11105_v41 = vld [vmem:[%s13460_s21 + $0x448] sm:$0xff]  }
0x2f38   :  { %v7067_v16 = vmul.f32 %v9602_v34, %v7059_v18 }
0x2f3a   :  { %v12827_v59 = vadd.f32 %v9603_v20, %v7067_v16 }
0x2f3c   :  { %v12837_v44 = vpack.c.bf16 %v12827_v59, %v12825_v57 }
0x2f3e   :  { %9613 = vmatmul.mubr.msk.bf16.vlgmr.msra.gmra.mxu1 %vm13542_vm1, %v12837_v44  ;;  %9655 = vmatmul.mubr.msk.bf16.vlgmr.msra.gmra.mxu0 %vm13543_vm9, %v12837_v44 }
0x2f3f   :  { %10402 = vmatpush3.bf16.msra.mxu1 %v11082_v21  ;;  %10424 = vmatpush3.bf16.msra.mxu0 %v11083_v1 }
0x2f40   :  { %10403 = vmatprep.subr.bf16.mxu1 %v11084_v22  ;;  %10425 = vmatprep.subr.bf16.mxu0 %v11085_v23 }
0x2f43   :  { %10404 = vmatpush3.bf16.msra.mxu1 %v11086_v3  ;;  %10426 = vmatpush3.bf16.msra.mxu0 %v11087_v10  ;;  %v9720_v10 = vld [vmem:[%s13458_s19 + $0x110] sm:$0xff] }
0x2f44   :  { %10405 = vmatprep.subr.bf16.mxu1 %v11088_v24  ;;  %10427 = vmatprep.subr.bf16.mxu0 %v11089_v25  ;;  %v9721_v24 = vld [vmem:[%s13458_s19 + $0x150] sm:$0xff] }
0x2f47   :  { %10406 = vmatpush3.bf16.msra.mxu1 %v11090_v51  ;;  %10428 = vmatpush3.bf16.msra.mxu0 %v11091_v27 }
0x2f48   :  { %10407 = vmatprep.subr.bf16.mxu1 %v11092_v31  ;;  %10429 = vmatprep.subr.bf16.mxu0 %v11093_v9 }
0x2f4b   :  { %10408 = vmatpush3.bf16.msra.mxu1 %v11094_v14  ;;  %10430 = vmatpush3.bf16.msra.mxu0 %v11095_v29  ;;  %v9726_v29 = vcombine.high %v9720_v10, %v9721_v24 }
0x2f4c   :  { %10409 = vmatprep.subr.bf16.mxu1 %v11096_v30  ;;  %10431 = vmatprep.subr.bf16.mxu0 %v11097_v7  ;;  %v11113_v30 = vld [vmem:[%s13460_s21 + $0x538] sm:$0xff]  }
0x2f4d   :  { %v9780_v7 = vld [vmem:[%s13458_s19 + $0x198] sm:$0xff] }
0x2f4f   :  { %10410 = vmatpush3.bf16.msra.mxu1 %v11098_v33  ;;  %10432 = vmatpush3.bf16.msra.mxu0 %v11099_v35  ;;  %v9781_v33 = vld [vmem:[%s13458_s19 + $0x1d8] sm:$0xff]  ;;  %v11114_v35 = vld [vmem:[%s13460_s21 + $0x570] sm:$0xff]  }
0x2f50   :  { %10411 = vmatprep.subr.bf16.mxu1 %v11100_v19  ;;  %10433 = vmatprep.subr.bf16.mxu0 %v11101_v37  ;;  %v9725_v19 = vcombine.low %v9720_v10, %v9721_v24  ;;  %v9786_v37 = vcombine.high %v9780_v7, %v9781_v33 }
0x2f53   :  { %10412 = vmatpush3.bf16.msra.mxu1 %v11102_v38  ;;  %10434 = vmatpush3.bf16.msra.mxu0 %v11103_v39  ;;  %v11115_v38 = vld [vmem:[%s13460_s21 + $0x530] sm:$0xff]   ;;  %v9778_v39 = vld [vmem:[%s13458_s19 + $0x118] sm:$0xff] }
0x2f54   :  { %10413 = vmatprep.subr.bf16.mxu1 %v11104_v40  ;;  %10435 = vmatprep.subr.bf16.mxu0 %v11105_v41  ;;  %v9779_v40 = vld [vmem:[%s13458_s19 + $0x158] sm:$0xff]  ;;  %v11116_v41 = vld [vmem:[%s13460_s21 + $0x568] sm:$0xff]  }
0x2f57   :  { %10414 = vmatpush3.bf16.msra.mxu1 %v11106_v43  ;;  %10436 = vmatpush3.bf16.msra.mxu0 %v11107_v63  ;;  %v9785_v43 = vcombine.low %v9780_v7, %v9781_v33  ;;  %v9784_v63 = vcombine.high %v9778_v39, %v9779_v40 }
0x2f58   :  { %10415 = vmatprep.subr.bf16.mxu1 %v11108_v32  ;;  %10437 = vmatprep.subr.bf16.mxu0 %v11109_v28  ;;  %v11118_v32 = vld [vmem:[%s13460_s21 + $0x528] sm:$0xff]   ;;  %v9783_v28 = vcombine.low %v9778_v39, %v9779_v40 }
0x2f5b   :  { %10416 = vmatpush3.bf16.msra.mxu1 %v11110_v46  ;;  %10438 = vmatpush3.bf16.msra.mxu0 %v11111_v52  ;;  %v11117_v46 = vld [vmem:[%s13460_s21 + $0x5f8] sm:$0xff]  }
0x2f5c   :  { %7639 = vmatprep.subr.bf16.mxu1 %v9728_v13  ;;  %10445 = vmatprep.subr.bf16.mxu0 %v11112_v42  ;;  %v11119_v52 = vld [vmem:[%s13460_s21 + $0x5b8] sm:$0xff]   ;;  %v11122_v13 = vld [vmem:[%s13460_s21 + $0x520] sm:$0xff]  }
0x2f5d   :  { %v11124_v42 = vld [vmem:[%s13460_s21 + $0x558] sm:$0xff]  }
0x2ffe   :  { %v7152_v58 = vpop.f32.mrf.mxu1  ;;  %v7270_v60 = vpop.f32.mrf.mxu0 }
0x2fff   :  { %v7153_v15 = vadd.f32 %v7152_v58, %v7088_v2  ;;  %v7271_v34 = vadd.f32 %v7270_v60, %v7209_v49  ;;  %v11127_v58 = vld [vmem:[%s13460_s21 + $0x5a8] sm:$0xff]   ;;  %v11128_v60 = vld [vmem:[%s13460_s21 + $0x550] sm:$0xff]  }
0x3000   :  { %v7154_v26 = vpop.f32.mrf.mxu1  ;;  %v7272_v54 = vpop.f32.mrf.mxu0 }
0x3001   :  { %v7155_v5 = vadd.f32 %v7154_v26, %v7092_v61  ;;  %v7273_v8 = vadd.f32 %v7272_v54, %v7213_v0  ;;  %v7161_v25 = vmax.f32 %v7153_v15, 0.0  ;;  %v7279_v51 = vmax.f32 %v7271_v34, 0.0  ;;  %v11133_v26 = vld [vmem:[%s13460_s21 + $0x5d8] sm:$0xff]   ;;  %v11134_v54 = vld [vmem:[%s13460_s21 + $0x508] sm:$0xff]   ;;  %v13059_v15 = vld [vmem:[%s13458_s19 + $0x1e0] sm:$0xff] }
0x3002   :  { %v7156_v45 = vpop.f32.mrf.mxu1  ;;  %v7274_v4 = vpop.f32.mrf.mxu0  ;;  %v11140_v34 = vld [vmem:[%s13460_s21 + $0x5c8] sm:$0xff]  }
0x3003   :  { %v7157_v11 = vadd.f32 %v7156_v45, %v7088_v2  ;;  %v7275_v62 = vadd.f32 %v7274_v4, %v7209_v49  ;;  %v7162_v1 = vmax.f32 %v7155_v5, 0.0  ;;  %v7280_v22 = vmax.f32 %v7273_v8, 0.0  ;;  %v11131_v2 = vld [vmem:[%s13460_s21 + $0x5a0] sm:$0xff]   ;;  %v11132_v49 = vld [vmem:[%s13460_s21 + $0x548] sm:$0xff]   ;;  %v11135_v45 = vld [vmem:[%s13460_s21 + $0x598] sm:$0xff]  }
0x3004   :  { %v7158_v50 = vpop.f32.mrf.mxu1  ;;  %v7276_v6 = vpop.f32.mrf.mxu0  ;;  %v11136_v4 = vld [vmem:[%s13460_s21 + $0x540] sm:$0xff]   ;;  %v11137_v5 = vld [vmem:[%s13460_s21 + $0x5d0] sm:$0xff]  }
0x3005   :  { %v7159_v18 = vadd.f32 %v7158_v50, %v7092_v61  ;;  %v7277_v20 = vadd.f32 %v7276_v6, %v7213_v0  ;;  %v7163_v16 = vmax.f32 %v7157_v11, 0.0  ;;  %v7281_v21 = vmax.f32 %v7275_v62, 0.0  ;;  %v11129_v61 = vld [vmem:[%s13460_s21 + $0x5e0] sm:$0xff]   ;;  %v11130_v0 = vld [vmem:[%s13460_s21 + $0x510] sm:$0xff]  }
0x3006   :  { %v11138_v8 = vld [vmem:[%s13460_s21 + $0x500] sm:$0xff]   ;;  %v11139_v11 = vld [vmem:[%s13460_s21 + $0x590] sm:$0xff]  }
0x3007   :  { %v7164_v23 = vmax.f32 %v7159_v18, 0.0  ;;  %v7282_v3 = vmax.f32 %v7277_v20, 0.0  ;;  %v7165_v9 = vpack.c.bf16 %v7163_v16, %v7161_v25  ;;  %v7283_v14 = vpack.c.bf16 %v7281_v21, %v7279_v51  ;;  %v13054_v62 = vld [vmem:[%s13458_s19 + $0x1a0] sm:$0xff]  ;;  %v11141_v18 = vld [vmem:[%s13460_s21 + $0x588] sm:$0xff]  }
0x3008   :  { %v9844_v50 = vcombine.high %v13054_v62, %v13059_v15  ;;  %v9843_v6 = vcombine.low %v13054_v62, %v13059_v15  ;;  %v11142_v20 = vld [vmem:[%s13460_s21 + $0x5c0] sm:$0xff]   ;;  %v13080_v21 = vld [vmem:[%s13458_s19 + $0x1a8] sm:$0xff]  ;;  %v11144_v15 = vld [vmem:[%s13460_s21 + $0x678] sm:$0xff]  }
0x3009   :  { %v7166_v27 = vpack.c.bf16 %v7164_v23, %v7162_v1  ;;  %v7284_v31 = vpack.c.bf16 %v7282_v3, %v7280_v22  ;;  %v11143_v16 = vld [vmem:[%s13460_s21 + $0x580] sm:$0xff]   ;;  %v13085_v1 = vld [vmem:[%s13458_s19 + $0x1e8] sm:$0xff] }
0x300a   :  { %v9902_v22 = vcombine.high %v13080_v21, %v13085_v1  ;;  %v9901_v23 = vcombine.low %v13080_v21, %v13085_v1  ;;  %v11151_v21 = vld [vmem:[%s13460_s21 + $0x6b8] sm:$0xff]   ;;  %v11150_v1 = vld [vmem:[%s13460_s21 + $0x628] sm:$0xff]  }
0x300b   :  { %7445 = vmatprep.mubr.bf16.mxu1 %v7284_v31  ;;  %7582 = vmatprep.mubr.bf16.mxu0 %v7166_v27 }
0x300c   :  { %7446 = vmatmul.mubr.bf16.vlgmr.msra.gmra.mxu1 %v7283_v14  ;;  %7583 = vmatmul.mubr.bf16.vlgmr.msra.gmra.mxu0 %v7165_v9 }
0x300d   :  { %7640 = vmatpush1.bf16.msra.mxu1 %v9727_v55  ;;  %7659 = vmatprep.mubr.bf16.mxu1 %v11312_v12  ;;  %v11123_v55 = vld [vmem:[%s13460_s21 + $0x5b0] sm:$0xff]  }
0x300e   :  { %7641 = vmatprep.subr.bf16.mxu1 %v9726_v29  ;;  %10446 = vmatpush3.bf16.msra.mxu0 %v11113_v30 }
0x300f   :  { %10447 = vmatprep.subr.bf16.mxu0 %v11114_v35  ;;  %v9724_v35 = vld [vmem:[%s13459_s20 + $0x14] sm:$0x3] }
0x3010   :  { %v7600_v39 = vrot.slane %v9724_v35, %v11553_v47 }
0x3011   :  { %7642 = vmatpush1.bf16.msra.mxu1 %v9725_v19 }
0x3012   :  { %7895 = vmatprep.subr.bf16.mxu1 %v9786_v37  ;;  %10448 = vmatpush3.bf16.msra.mxu0 %v11115_v38  ;;  %v7604_v38 = vrot.slane %v9724_v35, %v11556_v48  ;;  %v11158_v35 = vld [vmem:[%s13460_s21 + $0x618] sm:$0xff]  }
0x3013   :  { %10449 = vmatprep.subr.bf16.mxu0 %v11116_v41 }
0x3014   :  { %9729 = vmatmul.mubr.msk.bf16.vlgmr.msra.gmra.mxu1 %vm13544_vm10, %v12837_v44 }
0x3015   :  { %7896 = vmatpush1.bf16.msra.mxu1 %v9785_v43  ;;  %7915 = vmatprep.mubr.bf16.mxu1 %v11312_v12 }
0x3016   :  { %7897 = vmatprep.subr.bf16.mxu1 %v9784_v63  ;;  %10450 = vmatpush3.bf16.msra.mxu0 %v11118_v32 }
0x3017   :  { %10451 = vmatprep.subr.bf16.mxu0 %v11120_v17 }
0x3019   :  { %7898 = vmatpush1.bf16.msra.mxu1 %v9783_v28 }
0x301a   :  { %10467 = vmatprep.subr.bf16.mxu1 %v11117_v46  ;;  %10452 = vmatpush3.bf16.msra.mxu0 %v11122_v13 }
0x301b   :  { %10453 = vmatprep.subr.bf16.mxu0 %v11124_v42 }
0x301c   :  { %9787 = vmatmul.mubr.msk.bf16.vlgmr.msra.gmra.mxu1 %vm13545_vm12, %v12837_v44 }
0x301d   :  { %10468 = vmatpush3.bf16.msra.mxu1 %v11119_v52  ;;  %v9782_v52 = vld [vmem:[%s13459_s20 + $0x16] sm:$0x3] }
0x301e   :  { %10469 = vmatprep.subr.bf16.mxu1 %v11121_v53  ;;  %10454 = vmatpush3.bf16.msra.mxu0 %v11126_v36  ;;  %v7860_v42 = vrot.slane %v9782_v52, %v11556_v48  ;;  %v9837_v36 = vld [vmem:[%s13458_s19 + $0x160] sm:$0xff] }
0x301f   :  { %10455 = vmatprep.subr.bf16.mxu0 %v11128_v60  ;;  %v7856_v60 = vrot.slane %v9782_v52, %v11553_v47  ;;  %v11169_v52 = vld [vmem:[%s13460_s21 + $0x6d0] sm:$0xff]  }
0x3021   :  { %10470 = vmatpush3.bf16.msra.mxu1 %v11123_v55 }
0x3022   :  { %10471 = vmatprep.subr.bf16.mxu1 %v11125_v56  ;;  %10456 = vmatpush3.bf16.msra.mxu0 %v11130_v0  ;;  %v9836_v56 = vld [vmem:[%s13458_s19 + $0x120] sm:$0xff] }
0x3023   :  { %10457 = vmatprep.subr.bf16.mxu0 %v11132_v49 }
0x3025   :  { %10472 = vmatpush3.bf16.msra.mxu1 %v11127_v58 }
0x3026   :  { %10473 = vmatprep.subr.bf16.mxu1 %v11129_v61  ;;  %10458 = vmatpush3.bf16.msra.mxu0 %v11134_v54 }
0x3027   :  { %10459 = vmatprep.subr.bf16.mxu0 %v11136_v4 }
0x3029   :  { %10474 = vmatpush3.bf16.msra.mxu1 %v11131_v2 }
0x302a   :  { %10475 = vmatprep.subr.bf16.mxu1 %v11133_v26  ;;  %10460 = vmatpush3.bf16.msra.mxu0 %v11138_v8  ;;  %v9842_v26 = vcombine.high %v9836_v56, %v9837_v36 }
0x302b   :  { %8151 = vmatprep.subr.bf16.mxu0 %v9844_v50 }
0x302d   :  { %10476 = vmatpush3.bf16.msra.mxu1 %v11135_v45 }
0x302e   :  { %10477 = vmatprep.subr.bf16.mxu1 %v11137_v5 }
0x3031   :  { %10478 = vmatpush3.bf16.msra.mxu1 %v11139_v11  ;;  %v9841_v11 = vcombine.low %v9836_v56, %v9837_v36 }
0x3032   :  { %10479 = vmatprep.subr.bf16.mxu1 %v11140_v34 }
0x3035   :  { %10480 = vmatpush3.bf16.msra.mxu1 %v11141_v18  ;;  %v9894_v18 = vld [vmem:[%s13458_s19 + $0x128] sm:$0xff] }
0x3036   :  { %10481 = vmatprep.subr.bf16.mxu1 %v11142_v20  ;;  %v9895_v20 = vld [vmem:[%s13458_s19 + $0x168] sm:$0xff] }
0x3039   :  { %10482 = vmatpush3.bf16.msra.mxu1 %v11143_v16 }
0x303a   :  { %8407 = vmatprep.subr.bf16.mxu1 %v9902_v22 }
0x30cc   :  { %v10417_v3 = vpop.f32.mrf.mxu1  ;;  %v10439_v10 = vpop.f32.mrf.mxu0 }
0x30ce   :  { %v10418_v24 = vpop.f32.mrf.mxu1  ;;  %v10440_v25 = vpop.f32.mrf.mxu0 }
0x30cf   :  { %v10419_v51 = vadd.f32 %v10418_v24, %v10417_v3  ;;  %v10441_v27 = vadd.f32 %v10440_v25, %v10439_v10  ;;  %v9900_v3 = vcombine.high %v9894_v18, %v9895_v20  ;;  %v11145_v10 = vld [vmem:[%s13460_s21 + $0x638] sm:$0xff]   ;;  %v11146_v24 = vld [vmem:[%s13460_s21 + $0x670] sm:$0xff]   ;;  %v9899_v25 = vcombine.low %v9894_v18, %v9895_v20 }
0x30d0   :  { %v10420_v31 = vpop.f32.mrf.mxu1  ;;  %v10442_v9 = vpop.f32.mrf.mxu0 }
0x30d1   :  { %v13091_v14 = vadd.f32 %v10441_v27, %v10419_v51  ;;  %v11147_v51 = vld [vmem:[%s13460_s21 + $0x630] sm:$0xff]   ;;  %v11149_v27 = vld [vmem:[%s13460_s21 + $0x6f8] sm:$0xff]  }
0x30d2   :  { %v10421_v29 = vpop.f32.mrf.mxu1  ;;  %v10443_v30 = vpop.f32.mrf.mxu0 }
0x30d3   :  { %v10422_v7 = vadd.f32 %v10421_v29, %v10420_v31  ;;  %v10444_v33 = vadd.f32 %v10443_v30, %v10442_v9  ;;  %v11148_v31 = vld [vmem:[%s13460_s21 + $0x668] sm:$0xff]   ;;  %v11153_v9 = vld [vmem:[%s13460_s21 + $0x6f0] sm:$0xff]   ;;  %v11154_v29 = vld [vmem:[%s13460_s21 + $0x620] sm:$0xff]  }
0x30d4   :  { %v7661_v19 = vpop.f32.mrf.mxu1  ;;  %v11155_v30 = vld [vmem:[%s13460_s21 + $0x6b0] sm:$0xff]  }
0x30d5   :  { %v13096_v37 = vadd.f32 %v10444_v33, %v10422_v7  ;;  %v7662_v32 = vadd.f32 %v7661_v19, %v7600_v39  ;;  %v11156_v7 = vld [vmem:[%s13460_s21 + $0x658] sm:$0xff]   ;;  %v11157_v33 = vld [vmem:[%s13460_s21 + $0x6e8] sm:$0xff]  }
0x30d6   :  { %v7663_v40 = vpop.f32.mrf.mxu1  ;;  %v11159_v19 = vld [vmem:[%s13460_s21 + $0x6a8] sm:$0xff]  }
0x30d7   :  { %v7664_v43 = vadd.f32 %v7663_v40, %v7604_v38  ;;  %v7670_v58 = vmax.f32 %v7662_v32, 0.0  ;;  %v11162_v40 = vld [vmem:[%s13460_s21 + $0x610] sm:$0xff]   ;;  %v11166_v32 = vld [vmem:[%s13460_s21 + $0x608] sm:$0xff]  }
0x30d8   :  { %v7665_v41 = vpop.f32.mrf.mxu1 }
0x30d9   :  { %v7666_v63 = vadd.f32 %v7665_v41, %v7600_v39  ;;  %v7671_v13 = vmax.f32 %v7664_v43, 0.0  ;;  %v11161_v39 = vld [vmem:[%s13460_s21 + $0x6e0] sm:$0xff]   ;;  %v11164_v43 = vld [vmem:[%s13460_s21 + $0x648] sm:$0xff]  }
0x30da   :  { %v7667_v28 = vpop.f32.mrf.mxu1  ;;  %v11163_v41 = vld [vmem:[%s13460_s21 + $0x6a0] sm:$0xff]  }
0x30db   :  { %v7668_v46 = vadd.f32 %v7667_v28, %v7604_v38  ;;  %v7672_v17 = vmax.f32 %v7666_v63, 0.0  ;;  %v11160_v38 = vld [vmem:[%s13460_s21 + $0x650] sm:$0xff]   ;;  %v11165_v63 = vld [vmem:[%s13460_s21 + $0x6d8] sm:$0xff]  }
0x30dc   :  { %v7917_v53 = vpop.f32.mrf.mxu1  ;;  %v11167_v28 = vld [vmem:[%s13460_s21 + $0x698] sm:$0xff]  }
0x30dd   :  { %v7673_v55 = vmax.f32 %v7668_v46, 0.0  ;;  %v7674_v2 = vpack.c.bf16 %v7672_v17, %v7670_v58  ;;  %v7918_v4 = vadd.f32 %v7917_v53, %v7856_v60  ;;  %v11168_v46 = vld [vmem:[%s13460_s21 + $0x640] sm:$0xff]   ;;  %v11171_v53 = vld [vmem:[%s13460_s21 + $0x690] sm:$0xff]   ;;  %v11173_v58 = vld [vmem:[%s13460_s21 + $0x688] sm:$0xff]  }
0x30de   :  { %v7919_v61 = vpop.f32.mrf.mxu1  ;;  %v11170_v17 = vld [vmem:[%s13460_s21 + $0x600] sm:$0xff]  }
0x30df   :  { %v7675_v0 = vpack.c.bf16 %v7673_v55, %v7671_v13  ;;  %v7920_v54 = vadd.f32 %v7919_v61, %v7860_v42  ;;  %v13213_v13 = vld [vmem:[%s13458_s19 + $0x1b0] sm:$0xff]  ;;  %v11175_v61 = vld [vmem:[%s13460_s21 + $0x680] sm:$0xff]  }
0x30e0   :  { %v7921_v49 = vpop.f32.mrf.mxu1  ;;  %v13218_v55 = vld [vmem:[%s13458_s19 + $0x1f0] sm:$0xff] }
0x30e1   :  { %v7922_v45 = vadd.f32 %v7921_v49, %v7856_v60  ;;  %7836 = vmatprep.mubr.bf16.mxu0 %v7675_v0  ;;  %v7927_v34 = vmax.f32 %v7920_v54, 0.0  ;;  %v9960_v56 = vcombine.high %v13213_v13, %v13218_v55  ;;  %v9959_v36 = vcombine.low %v13213_v13, %v13218_v55  ;;  %v11174_v60 = vld [vmem:[%s13460_s21 + $0x6c0] sm:$0xff]   ;;  %v13239_v0 = vld [vmem:[%s13458_s19 + $0x1b8] sm:$0xff] }
0x30e2   :  { %7837 = vmatmul.mubr.bf16.vlgmr.msra.gmra.mxu0 %v7674_v2  ;;  %v7923_v5 = vpop.f32.mrf.mxu1  ;;  %v13244_v2 = vld [vmem:[%s13458_s19 + $0x1f8] sm:$0xff] }
0x30e3   :  { %v7924_v8 = vadd.f32 %v7923_v5, %v7860_v42  ;;  %8152 = vmatpush1.bf16.msra.mxu0 %v9843_v6  ;;  %8171 = vmatprep.mubr.bf16.mxu0 %v11312_v12  ;;  %v7928_v62 = vmax.f32 %v7922_v45, 0.0  ;;  %v7926_v6 = vmax.f32 %v7918_v4, 0.0  ;;  %v11172_v42 = vld [vmem:[%s13460_s21 + $0x6c8] sm:$0xff]   ;;  %v10018_v49 = vcombine.high %v13239_v0, %v13244_v2  ;;  %v10011_v13 = vld [vmem:[%s13458_s19 + $0x178] sm:$0xff] }
0x30e4   :  { %8153 = vmatprep.subr.bf16.mxu0 %v9842_v26  ;;  %v10017_v26 = vcombine.low %v13239_v0, %v13244_v2  ;;  %v11182_v0 = vld [vmem:[%s13460_s21 + $0x728] sm:$0xff]   ;;  %v11184_v2 = vld [vmem:[%s13460_s21 + $0x760] sm:$0xff]  }
0x30e5   :  { %v7929_v50 = vmax.f32 %v7924_v8, 0.0  ;;  %v7930_v22 = vpack.c.bf16 %v7928_v62, %v7926_v6 }
0x30e7   :  { %v7931_v16 = vpack.c.bf16 %v7929_v50, %v7927_v34  ;;  %8154 = vmatpush1.bf16.msra.mxu0 %v9841_v11 }
0x30e8   :  { %10489 = vmatprep.subr.bf16.mxu0 %v11144_v15  ;;  %v9840_v15 = vld [vmem:[%s13459_s20 + $0x18] sm:$0x3] }
0x30e9   :  { %8092 = vmatprep.mubr.bf16.mxu1 %v7931_v16  ;;  %v8116_v20 = vrot.slane %v9840_v15, %v11556_v48  ;;  %v8112_v6 = vrot.slane %v9840_v15, %v11553_v47  ;;  %v11181_v15 = vld [vmem:[%s13460_s21 + $0x7f8] sm:$0xff]  }
0x30ea   :  { %8093 = vmatmul.mubr.bf16.vlgmr.msra.gmra.mxu1 %v7930_v22  ;;  %9845 = vmatmul.mubr.msk.bf16.vlgmr.msra.gmra.mxu0 %vm13546_vm13, %v12837_v44 }
0x30eb   :  { %8408 = vmatpush1.bf16.msra.mxu1 %v9901_v23  ;;  %8427 = vmatprep.mubr.bf16.mxu1 %v11312_v12  ;;  %v11152_v23 = vld [vmem:[%s13460_s21 + $0x660] sm:$0xff]  }
0x30ec   :  { %8409 = vmatprep.subr.bf16.mxu1 %v9900_v3  ;;  %10490 = vmatpush3.bf16.msra.mxu0 %v11145_v10 }
0x30ed   :  { %10491 = vmatprep.subr.bf16.mxu0 %v11146_v24 }
0x30ef   :  { %8410 = vmatpush1.bf16.msra.mxu1 %v9899_v25 }
0x30f0   :  { %10492 = vmatpush3.bf16.msra.mxu0 %v11147_v51  ;;  %10511 = vmatprep.subr.bf16.mxu1 %v11149_v27 }
0x30f1   :  { %10493 = vmatprep.subr.bf16.mxu0 %v11148_v31 }
0x30f2   :  { %9903 = vmatmul.mubr.msk.bf16.vlgmr.msra.gmra.mxu1 %vm13547_vm14, %v12837_v44 }
0x30f3   :  { %10512 = vmatpush3.bf16.msra.mxu1 %v11151_v21 }
0x30f4   :  { %10494 = vmatpush3.bf16.msra.mxu0 %v11150_v1  ;;  %10513 = vmatprep.subr.bf16.mxu1 %v11153_v9 }
0x30f5   :  { %10495 = vmatprep.subr.bf16.mxu0 %v11152_v23 }
0x30f7   :  { %10514 = vmatpush3.bf16.msra.mxu1 %v11155_v30 }
0x30f8   :  { %10496 = vmatpush3.bf16.msra.mxu0 %v11154_v29  ;;  %10515 = vmatprep.subr.bf16.mxu1 %v11157_v33 }
0x30f9   :  { %10497 = vmatprep.subr.bf16.mxu0 %v11156_v7 }
0x30fb   :  { %10516 = vmatpush3.bf16.msra.mxu1 %v11159_v19  ;;  %v9952_v19 = vld [vmem:[%s13458_s19 + $0x130] sm:$0xff] }
0x30fc   :  { %10498 = vmatpush3.bf16.msra.mxu0 %v11158_v35  ;;  %10517 = vmatprep.subr.bf16.mxu1 %v11161_v39 }
0x30fd   :  { %10499 = vmatprep.subr.bf16.mxu0 %v11160_v38  ;;  %v9953_v38 = vld [vmem:[%s13458_s19 + $0x170] sm:$0xff] }
0x30ff   :  { %10518 = vmatpush3.bf16.msra.mxu1 %v11163_v41 }
0x3100   :  { %10500 = vmatpush3.bf16.msra.mxu0 %v11162_v40  ;;  %10519 = vmatprep.subr.bf16.mxu1 %v11165_v63 }
0x3101   :  { %10501 = vmatprep.subr.bf16.mxu0 %v11164_v43 }
0x3103   :  { %10520 = vmatpush3.bf16.msra.mxu1 %v11167_v28  ;;  %v9958_v28 = vcombine.high %v9952_v19, %v9953_v38 }
0x3104   :  { %10502 = vmatpush3.bf16.msra.mxu0 %v11166_v32  ;;  %10521 = vmatprep.subr.bf16.mxu1 %v11169_v52 }
0x3105   :  { %10503 = vmatprep.subr.bf16.mxu0 %v11168_v46 }
0x3107   :  { %10522 = vmatpush3.bf16.msra.mxu1 %v11171_v53 }
0x3108   :  { %10504 = vmatpush3.bf16.msra.mxu0 %v11170_v17  ;;  %10523 = vmatprep.subr.bf16.mxu1 %v11172_v42 }
0x3109   :  { %8663 = vmatprep.subr.bf16.mxu0 %v9960_v56  ;;  %v9957_v56 = vcombine.low %v9952_v19, %v9953_v38 }
0x310b   :  { %10524 = vmatpush3.bf16.msra.mxu1 %v11173_v58 }
0x310c   :  { %10525 = vmatprep.subr.bf16.mxu1 %v11174_v60  ;;  %v11176_v60 = vld [vmem:[%s13460_s21 + $0x778] sm:$0xff]  }
0x310f   :  { %10526 = vmatpush3.bf16.msra.mxu1 %v11175_v61 }
0x3110   :  { %8919 = vmatprep.subr.bf16.mxu1 %v10018_v49 }
0x31a2   :  { %v10461_v54 = vpop.f32.mrf.mxu0 }
0x31a4   :  { %v10462_v45 = vpop.f32.mrf.mxu0 }
0x31a5   :  { %v10463_v4 = vadd.f32 %v10462_v45, %v10461_v54  ;;  %v10010_v54 = vld [vmem:[%s13458_s19 + $0x138] sm:$0xff] }
0x31a6   :  { %v10464_v5 = vpop.f32.mrf.mxu0 }
0x31a7   :  { %v7845_v8 = vadd.f32 %v10463_v4, %v13091_v14  ;;  %v10016_v4 = vcombine.high %v10010_v54, %v10011_v13 }
0x31a8   :  { %v10465_v11 = vpop.f32.mrf.mxu0 }
0x31a9   :  { %v10466_v62 = vadd.f32 %v10465_v11, %v10464_v5  ;;  %v11177_v5 = vld [vmem:[%s13460_s21 + $0x738] sm:$0xff]   ;;  %v10015_v11 = vcombine.low %v10010_v54, %v10011_v13 }
0x31aa   :  { %v10483_v34 = vpop.f32.mrf.mxu1  ;;  %v8173_v50 = vpop.f32.mrf.mxu0 }
0x31ab   :  { %v7846_v18 = vadd.f32 %v10466_v62, %v13096_v37  ;;  %v8174_v27 = vadd.f32 %v8173_v50, %v8112_v6  ;;  %v9898_v37 = vld [vmem:[%s13459_s20 + $0x1a] sm:$0x3]  ;;  %v11179_v62 = vld [vmem:[%s13460_s21 + $0x730] sm:$0xff]   ;;  %v11186_v50 = vld [vmem:[%s13460_s21 + $0x720] sm:$0xff]  }
0x31ac   :  { %v10484_v16 = vpop.f32.mrf.mxu1  ;;  %v8175_v22 = vpop.f32.mrf.mxu0  ;;  %v8372_v35 = vrot.slane %v9898_v37, %v11556_v48  ;;  %v8368_v40 = vrot.slane %v9898_v37, %v11553_v47  ;;  %v11203_v37 = vld [vmem:[%s13460_s21 + $0x790] sm:$0xff]  }
0x31ad   :  { %v10485_v3 = vadd.f32 %v10484_v16, %v10483_v34  ;;  %v8176_v25 = vadd.f32 %v8175_v22, %v8116_v20  ;;  %v8182_v39 = vmax.f32 %v8174_v27, 0.0  ;;  %v11180_v34 = vld [vmem:[%s13460_s21 + $0x768] sm:$0xff]   ;;  %v11192_v22 = vld [vmem:[%s13460_s21 + $0x750] sm:$0xff]  }
0x31ae   :  { %v10486_v10 = vpop.f32.mrf.mxu1  ;;  %v8177_v24 = vpop.f32.mrf.mxu0  ;;  %v11191_v16 = vld [vmem:[%s13460_s21 + $0x7a8] sm:$0xff]  }
0x31af   :  { %v13257_v14 = vadd.f32 %v10485_v3, %v7845_v8  ;;  %v8178_v51 = vadd.f32 %v8177_v24, %v8112_v6  ;;  %v8183_v30 = vmax.f32 %v8176_v25, 0.0  ;;  %v11178_v8 = vld [vmem:[%s13460_s21 + $0x770] sm:$0xff]   ;;  %v11190_v6 = vld [vmem:[%s13460_s21 + $0x718] sm:$0xff]   ;;  %v11193_v3 = vld [vmem:[%s13460_s21 + $0x7e0] sm:$0xff]  }
0x31b0   :  { %v10487_v31 = vpop.f32.mrf.mxu1  ;;  %v8179_v21 = vpop.f32.mrf.mxu0  ;;  %v11195_v24 = vld [vmem:[%s13460_s21 + $0x7a0] sm:$0xff]   ;;  %v11196_v25 = vld [vmem:[%s13460_s21 + $0x748] sm:$0xff]  }
0x31b1   :  { %v10488_v1 = vadd.f32 %v10487_v31, %v10486_v10  ;;  %v8180_v23 = vadd.f32 %v8179_v21, %v8116_v20  ;;  %v8184_v9 = vmax.f32 %v8178_v51, 0.0  ;;  %v11189_v20 = vld [vmem:[%s13460_s21 + $0x7e8] sm:$0xff]   ;;  %v11194_v10 = vld [vmem:[%s13460_s21 + $0x710] sm:$0xff]   ;;  %v11197_v51 = vld [vmem:[%s13460_s21 + $0x7d8] sm:$0xff]  }
0x31b2   :  { %v8429_v29 = vpop.f32.mrf.mxu1  ;;  %v11198_v27 = vld [vmem:[%s13460_s21 + $0x708] sm:$0xff]   ;;  %v11199_v31 = vld [vmem:[%s13460_s21 + $0x798] sm:$0xff]   ;;  %v11200_v21 = vld [vmem:[%s13460_s21 + $0x740] sm:$0xff]  }
0x31b3   :  { %v13262_v7 = vadd.f32 %v10488_v1, %v7846_v18  ;;  %v8185_v33 = vmax.f32 %v8180_v23, 0.0  ;;  %v8186_v63 = vpack.c.bf16 %v8184_v9, %v8182_v39  ;;  %v8430_v17 = vadd.f32 %v8429_v29, %v8368_v40  ;;  %v11187_v18 = vld [vmem:[%s13460_s21 + $0x7b0] sm:$0xff]   ;;  %v11202_v23 = vld [vmem:[%s13460_s21 + $0x700] sm:$0xff]   ;;  %v11204_v9 = vld [vmem:[%s13460_s21 + $0x7c8] sm:$0xff]  }
0x31b4   :  { %v8431_v41 = vpop.f32.mrf.mxu1  ;;  %v11201_v1 = vld [vmem:[%s13460_s21 + $0x7d0] sm:$0xff]   ;;  %v11205_v29 = vld [vmem:[%s13460_s21 + $0x788] sm:$0xff]  }
0x31b5   :  { %v8187_v43 = vpack.c.bf16 %v8185_v33, %v8183_v30  ;;  %v8432_v46 = vadd.f32 %v8431_v41, %v8372_v35  ;;  %v8438_v55 = vmax.f32 %v8430_v17, 0.0  ;;  %v11206_v30 = vld [vmem:[%s13460_s21 + $0x7c0] sm:$0xff]  }
0x31b6   :  { %v8433_v32 = vpop.f32.mrf.mxu1  ;;  %v11207_v33 = vld [vmem:[%s13460_s21 + $0x780] sm:$0xff]  }
0x31b7   :  { %v8434_v52 = vadd.f32 %v8433_v32, %v8368_v40  ;;  %8348 = vmatprep.mubr.bf16.mxu0 %v8187_v43  ;;  %v8439_v61 = vmax.f32 %v8432_v46, 0.0 }
0x31b8   :  { %8349 = vmatmul.mubr.bf16.vlgmr.msra.gmra.mxu0 %v8186_v63  ;;  %v8435_v53 = vpop.f32.mrf.mxu1  ;;  %v9956_v63 = vld [vmem:[%s13459_s20 + $0x1c] sm:$0x3] }
0x31b9   :  { %v8436_v42 = vadd.f32 %v8435_v53, %v8372_v35  ;;  %8664 = vmatpush1.bf16.msra.mxu0 %v9959_v36  ;;  %8683 = vmatprep.mubr.bf16.mxu0 %v11312_v12  ;;  %v8440_v58 = vmax.f32 %v8434_v52, 0.0  ;;  %v8628_v52 = vrot.slane %v9956_v63, %v11556_v48  ;;  %v8624_v17 = vrot.slane %v9956_v63, %v11553_v47 }
0x31ba   :  { %8665 = vmatprep.subr.bf16.mxu0 %v9958_v28 }
0x31bb   :  { %v8441_v49 = vmax.f32 %v8436_v42, 0.0  ;;  %v8442_v45 = vpack.c.bf16 %v8440_v58, %v8438_v55 }
0x31bd   :  { %v8443_v36 = vpack.c.bf16 %v8441_v49, %v8439_v61  ;;  %8666 = vmatpush1.bf16.msra.mxu0 %v9957_v56 }
0x31be   :  { %10533 = vmatprep.subr.bf16.mxu0 %v11176_v60 }
0x31bf   :  { %8604 = vmatprep.mubr.bf16.mxu1 %v8443_v36 }
0x31c0   :  { %8605 = vmatmul.mubr.bf16.vlgmr.msra.gmra.mxu1 %v8442_v45  ;;  %9961 = vmatmul.mubr.msk.bf16.vlgmr.msra.gmra.mxu0 %vm13548_vm2, %v12837_v44 }
0x31c1   :  { %8920 = vmatpush1.bf16.msra.mxu1 %v10017_v26  ;;  %8939 = vmatprep.mubr.bf16.mxu1 %v11312_v12  ;;  %v11183_v12 = vld [vmem:[%s13460_s21 + $0x7b8] sm:$0xff]   ;;  %v11185_v26 = vld [vmem:[%s13460_s21 + $0x7f0] sm:$0xff]  }
0x31c2   :  { %8921 = vmatprep.subr.bf16.mxu1 %v10016_v4  ;;  %10534 = vmatpush3.bf16.msra.mxu0 %v11177_v5 }
0x31c3   :  { %10535 = vmatprep.subr.bf16.mxu0 %v11178_v8 }
0x31c5   :  { %8922 = vmatpush1.bf16.msra.mxu1 %v10015_v11 }
0x31c6   :  { %10536 = vmatpush3.bf16.msra.mxu0 %v11179_v62  ;;  %10555 = vmatprep.subr.bf16.mxu1 %v11181_v15 }
0x31c7   :  { %10537 = vmatprep.subr.bf16.mxu0 %v11180_v34 }
0x31c8   :  { %10019 = vmatmul.mubr.msk.bf16.vlgmr.msra.gmra.mxu1 %vm13549_vm3, %v12837_v44  ;;  %v11188_v44 = vld [vmem:[%s13460_s21 + $0x758] sm:$0xff]  }
0x31c9   :  { %10556 = vmatpush3.bf16.msra.mxu1 %v11183_v12 }
0x31ca   :  { %10538 = vmatpush3.bf16.msra.mxu0 %v11182_v0  ;;  %10557 = vmatprep.subr.bf16.mxu1 %v11185_v26 }
0x31cb   :  { %10539 = vmatprep.subr.bf16.mxu0 %v11184_v2 }
0x31cd   :  { %10558 = vmatpush3.bf16.msra.mxu1 %v11187_v18 }
0x31ce   :  { %10540 = vmatpush3.bf16.msra.mxu0 %v11186_v50  ;;  %10559 = vmatprep.subr.bf16.mxu1 %v11189_v20 }
0x31cf   :  { %10541 = vmatprep.subr.bf16.mxu0 %v11188_v44 }
0x31d1   :  { %10560 = vmatpush3.bf16.msra.mxu1 %v11191_v16 }
0x31d2   :  { %10542 = vmatpush3.bf16.msra.mxu0 %v11190_v6  ;;  %10561 = vmatprep.subr.bf16.mxu1 %v11193_v3 }
0x31d3   :  { %10543 = vmatprep.subr.bf16.mxu0 %v11192_v22 }
0x31d5   :  { %10562 = vmatpush3.bf16.msra.mxu1 %v11195_v24 }
0x31d6   :  { %10544 = vmatpush3.bf16.msra.mxu0 %v11194_v10  ;;  %10563 = vmatprep.subr.bf16.mxu1 %v11197_v51 }
0x31d7   :  { %10545 = vmatprep.subr.bf16.mxu0 %v11196_v25 }
0x31d9   :  { %10564 = vmatpush3.bf16.msra.mxu1 %v11199_v31 }
0x31da   :  { %10546 = vmatpush3.bf16.msra.mxu0 %v11198_v27  ;;  %10565 = vmatprep.subr.bf16.mxu1 %v11201_v1 }
0x31db   :  { %10547 = vmatprep.subr.bf16.mxu0 %v11200_v21 }
0x31dd   :  { %10566 = vmatpush3.bf16.msra.mxu1 %v11203_v37 }
0x31de   :  { %10548 = vmatpush3.bf16.msra.mxu0 %v11202_v23  ;;  %10567 = vmatprep.subr.bf16.mxu1 %v11204_v9 }
0x31e1   :  { %10568 = vmatpush3.bf16.msra.mxu1 %v11205_v29 }
0x31e2   :  { %10569 = vmatprep.subr.bf16.mxu1 %v11206_v30  ;;  %v10069_v30 = vld [vmem:[%s13461_s22 + $0x1] ss:$0 sm:$0xff] }
0x31e5   :  { %10570 = vmatpush3.bf16.msra.mxu1 %v11207_v33 }
0x3278   :  { %v10505_v35 = vpop.f32.mrf.mxu0 }
0x327a   :  { %v10506_v19 = vpop.f32.mrf.mxu0 }
0x327b   :  { %v10507_v38 = vadd.f32 %v10506_v19, %v10505_v35 }
0x327c   :  { %v10508_v39 = vpop.f32.mrf.mxu0 }
0x327d   :  { %v8357_v40 = vadd.f32 %v10507_v38, %v13257_v14 }
0x327e   :  { %v10509_v41 = vpop.f32.mrf.mxu0 }
0x327f   :  { %v10510_v43 = vadd.f32 %v10509_v41, %v10508_v39 }
0x3280   :  { %v10527_v32 = vpop.f32.mrf.mxu1  ;;  %v8685_v28 = vpop.f32.mrf.mxu0 }
0x3281   :  { %v8358_v46 = vadd.f32 %v10510_v43, %v13262_v7  ;;  %v8686_v54 = vadd.f32 %v8685_v28, %v8624_v17  ;;  %v10014_v7 = vld [vmem:[%s13459_s20 + $0x1e] sm:$0x3] }
0x3282   :  { %v10528_v53 = vpop.f32.mrf.mxu1  ;;  %v8687_v42 = vpop.f32.mrf.mxu0  ;;  %v8884_v15 = vrot.slane %v10014_v7, %v11556_v48  ;;  %v8880_v12 = vrot.slane %v10014_v7, %v11553_v47 }
0x3283   :  { %v10529_v56 = vadd.f32 %v10528_v53, %v10527_v32  ;;  %v8688_v61 = vadd.f32 %v8687_v42, %v8628_v52  ;;  %v8694_v34 = vmax.f32 %v8686_v54, 0.0  ;;  %v9187_v54 = vld [vmem:[%s13462_s23 + $0x10] sm:$0xff] }
0x3284   :  { %v10530_v58 = vpop.f32.mrf.mxu1  ;;  %v8689_v60 = vpop.f32.mrf.mxu0 }
0x3285   :  { %v8613_v14 = vadd.f32 %v10529_v56, %v8357_v40  ;;  %v8690_v49 = vadd.f32 %v8689_v60, %v8624_v17  ;;  %v8695_v8 = vmax.f32 %v8688_v61, 0.0 }
0x3286   :  { %v10531_v13 = vpop.f32.mrf.mxu1  ;;  %v8691_v55 = vpop.f32.mrf.mxu0 }
0x3287   :  { %v10532_v36 = vadd.f32 %v10531_v13, %v10530_v58  ;;  %v8692_v45 = vadd.f32 %v8691_v55, %v8628_v52  ;;  %v8696_v4 = vmax.f32 %v8690_v49, 0.0  ;;  %v9188_v49 = vld [vmem:[%s13462_s23 + $0x18] sm:$0xff]  ;;  %v9278_v13 = vld [vmem:[%s13554_s16 + $0x8] sm:$0xff] }
0x3288   :  { %v8941_v5 = vpop.f32.mrf.mxu1  ;;  %10922 = vmatprep.subr.mxu0 %v9188_v49  ;;  %v9186_v55 = vld [vmem:[%s13462_s23 + $0x8] sm:$0xff] }
0x3289   :  { %v8614_v11 = vadd.f32 %v10532_v36, %v8358_v46  ;;  %v8697_v62 = vmax.f32 %v8692_v45, 0.0  ;;  %v8698_v26 = vpack.c.bf16 %v8696_v4, %v8694_v34  ;;  %v8942_v20 = vadd.f32 %v8941_v5, %v8880_v12  ;;  %v9185_v36 = vld [vmem:[%s13462_s23] sm:$0xff] }
0x328a   :  { %v8943_v0 = vpop.f32.mrf.mxu1 }
0x328b   :  { %v8699_v2 = vpack.c.bf16 %v8697_v62, %v8695_v8  ;;  %v8944_v18 = vadd.f32 %v8943_v0, %v8884_v15  ;;  %v8950_v24 = vmax.f32 %v8942_v20, 0.0 }
0x328c   :  { %v8945_v50 = vpop.f32.mrf.mxu1 }
0x328d   :  { %v8946_v44 = vadd.f32 %v8945_v50, %v8880_v12  ;;  %8860 = vmatprep.mubr.bf16.mxu0 %v8699_v2  ;;  %v8951_v3 = vmax.f32 %v8944_v18, 0.0  ;;  %v10073_v12 = vld [vmem:[%s13457_s18 + $0x1] ss:$0 sm:$0xff] }
0x328e   :  { %8861 = vmatmul.mubr.bf16.vlgmr.msra.gmra.mxu0 %v8698_v26  ;;  %v8947_v6 = vpop.f32.mrf.mxu1 }
0x328f   :  { %v8948_v16 = vadd.f32 %v8947_v6, %v8884_v15  ;;  %v8952_v22 = vmax.f32 %v8946_v44, 0.0  ;;  %10923 = vmatpush3.msra.mxu0 %v9188_v49  ;;  %v10072_v15 = vld [vmem:[%s13456_s17 + $0x1] ss:$0 sm:$0xff]  ;;  %v10074_v6 = vld [vmem:[%s13463_s24] ss:$0 sm:$0xff]  ;;  %s11324_s17 = smov [#allocation2]  }
0x3290   :  { %10924 = vmatprep.subr.mxu0 %v9187_v54  ;;  %s9298_s18 = sshll.u32 %s11324_s17, 4  ;;  %s9299_s18 = int_to_ptr.vmem [resolvable:$true] %s9298_s18 }
0x3291   :  { %v8953_v10 = vmax.f32 %v8948_v16, 0.0  ;;  %v8954_v48 = vpack.c.bf16 %v8952_v22, %v8950_v24  ;;  %10925 = vmatpush3.msra.mxu0 %v9187_v54  ;;  %s11288_s4 = scalar_lea.vmem %s9299_s18, 256  ;;  %p11293_p1 = scmp.lt.s32.totalorder %s9299_s18, %s9299_s18 }
0x3292   :  { %10926 = vmatprep.subr.mxu0 %v9186_v55  ;;  %p11289_p0 = scmp.ne.s32.totalorder %s9299_s18, %s11288_s4  ;;  %p11294_p2 = scmp.lt.s32.totalorder %s11288_s4, %s11288_s4 }
0x3293   :  { %v8955_v25 = vpack.c.bf16 %v8953_v10, %v8951_v3  ;;  %10927 = vmatpush3.msra.mxu0 %v9186_v55 }
0x3294   :  { %10928 = vmatprep.subr.mxu0 %v9185_v36  ;;  %p11295_p3 = por %p11294_p2, %p11293_p1 }
0x3295   :  { %9116 = vmatprep.mubr.bf16.mxu1 %v8955_v25  ;;  %10929 = vmatpush3.msra.mxu0 %v9185_v36 }
0x3296   :  { %9117 = vmatmul.mubr.bf16.vlgmr.msra.gmra.mxu1 %v8954_v48  ;;  %p11296_p4 = pnand %p11295_p3, %p11289_p0 }
0x334e   :  { %v10549_v47 = vpop.f32.mrf.mxu0 }
0x3350   :  { %v10550_v51 = vpop.f32.mrf.mxu0 }
0x3351   :  { %v10551_v31 = vadd.f32 %v10550_v51, %v10549_v47 }
0x3352   :  { %v10552_v27 = vpop.f32.mrf.mxu0 }
0x3353   :  { %v8869_v37 = vadd.f32 %v10551_v31, %v8613_v14 }
0x3354   :  { %v10553_v21 = vpop.f32.mrf.mxu0 }
0x3355   :  { %v10554_v9 = vadd.f32 %v10553_v21, %v10552_v27 }
0x3356   :  { %v10571_v1 = vpop.f32.mrf.mxu1 }
0x3357   :  { %v8870_v38 = vadd.f32 %v10554_v9, %v8614_v11 }
0x3358   :  { %v10572_v23 = vpop.f32.mrf.mxu1 }
0x3359   :  { %v10573_v29 = vadd.f32 %v10572_v23, %v10571_v1 }
0x335a   :  { %v10574_v33 = vpop.f32.mrf.mxu1 }
0x335b   :  { %v9125_v35 = vadd.f32 %v10573_v29, %v8869_v37 }
0x335c   :  { %v10575_v19 = vpop.f32.mrf.mxu1 }
0x335d   :  { %v9135_v39 = vadd.f32 %v10069_v30, %v9125_v35  ;;  %v10576_v40 = vadd.f32 %v10575_v19, %v10574_v33 }
0x335f   :  { %v9126_v41 = vadd.f32 %v10576_v40, %v8870_v38  ;;  %v9137_v43 = vadd.f32 %v9135_v39, %v12825_v57 }
0x3361   :  { %v9136_v63 = vadd.f32 %v10069_v30, %v9126_v41  ;;  %v9143_v32 = vsel %vm13550_vm4, %v9137_v43, 0.0 }
0x3362   :  { %9144 = vadd.xlane.f32.xlu1 %v9143_v32 }
0x3363   :  { %v9138_v28 = vadd.f32 %v9136_v63, %v12827_v59  ;;  %v9277_v59 = vld [vmem:[%s13554_s16] sm:$0xff] }
0x3365   :  { %v9146_v46 = vsel %vm13551_vm5, %v9138_v28, 0.0 }
0x3366   :  { %9147 = vadd.xlane.f32.xlu1 %v9146_v46 }
0x33eb   :  { %v9145_v52 = vpop.xlane.xlu1 %9144 }
0x33ec   :  { %v9149_v17 = vmul.f32 0.03125, %v9145_v52 }
0x33ee   :  { %v9151_v53 = vsub.f32 %v9137_v43, %v9149_v17 }
0x33ef   :  { %v9148_v42 = vpop.xlane.xlu1 %9147 }
0x33f0   :  { %v9150_v56 = vmul.f32 0.03125, %v9148_v42  ;;  %v9153_v58 = vmul.f32 %v9151_v53, %v9151_v53 }
0x33f2   :  { %v9152_v60 = vsub.f32 %v9138_v28, %v9150_v56  ;;  %v9155_v14 = vsel %vm13552_vm11, %v9153_v58, 0.0 }
0x33f3   :  { %9156 = vadd.xlane.f32.xlu0 %v9155_v14 }
0x33f4   :  { %v9154_v57 = vmul.f32 %v9152_v60, %v9152_v60 }
0x33f6   :  { %v9158_v61 = vsel %vm13553_vm7, %v9154_v57, 0.0 }
0x33f7   :  { %9159 = vadd.xlane.f32.xlu1 %v9158_v61 }
0x3408   :  { %9281 = vperm.xlu1 %10951, %v9277_v59  }
0x340c   :  { %9286 = vperm.xlu1 %10951, %v9278_v13  }
0x347c   :  { %v9157_v45 = vpop.xlane.xlu0 %9156 }
0x347d   :  { %v9161_v7 = vmul.f32 0.03125, %v9157_v45 }
0x347f   :  { %v9163_v4 = vadd.f32 1e-05, %v9161_v7 }
0x3480   :  { %v9160_v5 = vpop.xlane.xlu1 %9159 }
0x3481   :  { %11284 = vrsqrt.f32 %v9163_v4  ;;  %v9162_v8 = vmul.f32 0.03125, %v9160_v5 }
0x3483   :  { %v9164_v11 = vadd.f32 1e-05, %v9162_v8 }
0x3484   :  { %v9282_v20 = vpop.permute.xlu1 %9281 }
0x3485   :  { %11286 = vrsqrt.f32 %v9164_v11 }
0x3488   :  { %v9287_v3 = vpop.permute.xlu1 %9286 }
0x348e   :  { %v11285_v62 = vpop.eup %11284 }
0x348f   :  { %v9167_v34 = vmul.f32 %v11285_v62, %v9151_v53 }
0x3491   :  { %v9175_v0 = vmul.f32 %v10072_v15, %v9167_v34 }
0x3492   :  { %v11287_v2 = vpop.eup %11286 }
0x3493   :  { %v9168_v26 = vmul.f32 %v11287_v2, %v9152_v60  ;;  %v9183_v50 = vadd.f32 %v10073_v12, %v9175_v0 }
0x3495   :  { %v9176_v18 = vmul.f32 %v10072_v15, %v9168_v26  ;;  %10930 = vmatprep.mubr.msk.f32.mxu0 %vm13555_vm8, %v9183_v50 }
0x3497   :  { %v9184_v44 = vadd.f32 %v10073_v12, %v9176_v18 }
0x3499   :  { %10931 = vmatmul.mubr.msk.f32.vlgmr.msra.gmra.mxu0 %vm13556_vm15, %v9184_v44 }
0x3559   :  { %v10932_v16 = vpop.f32.mrf.mxu0 }
0x355a   :  { %v9274_v22 = vadd.f32 %v10932_v16, %v10074_v6 }
0x355b   :  { %v9268_v10 = vpop.f32.mrf.mxu0 }
0x355c   :  { %v9290_v24 = vmul.f32 %v9287_v3, %v9274_v22  ;;  %v9269_v25 = vadd.f32 %v10074_v6, %v9268_v10 }
0x355e   :  { %9292 = vst [vmem:[#allocation2 + $0x8] sm:$0xff] %v9290_v24  ;;  %v9289_v48 = vmul.f32 %v9282_v20, %v9269_v25 }
0x3560   :  { %9291 = vst [vmem:[#allocation2] sm:$0xff] %v9289_v48 }
0x3561   :  { %11299 = shalt.err (!%p11296_p4)
}
0x3562   :  { %s11325_s24 = smov 128   ;;  %s11326_s5 = smov 8  }
0x3563   :  { %9304 = dma.vmem_to_hbm [thread:$0]  %s9299_s18, 256, %s13464_s25, [#allocation3], %s11325_s24, %s11325_s24, %s11326_s5  }
0x3564   :  { %11308 = dma.done.wait [#allocation3], 256  }
0x3565   :  { %11309 = vsyncadd [#allocation3], 4294967040 }
0x3566   :  { %9308 = vsyncpa [#allocation3], 1 }

</bundles_post_ra>
